<compile_context>
chip_gen: v6e
topology: v6e:2x2x1
jax: 0.10.0
libtpu: 0.0.40
codegen_flags: <defaults>
</compile_context>

<pallas_src>
import functools

import jax
import jax.numpy as jnp
from jax import lax
from jax.experimental import pallas as pl
from jax.experimental.pallas import tpu as pltpu

# TODO(synk): PReLU alpha is baked as a static constant (nn.PReLU() default);
# pass it as a (C,1) operand if a learned alpha is required.
PRELU_ALPHA = 0.25
BN_EPS = 1e-5
VMEM_LIMIT = 32 * 1024 * 1024          # safe on v5e/v6e/v7x (v7x physical VMEM = 64 MiB)
_TILE_BUDGET = 12 * 1024 * 1024        # double-buffered in+out tiles stay well under VMEM


def _choose_lane_tile(m, bytes_per_lane):
    """Largest lane tile (multiple of 128) dividing m that fits the VMEM budget."""
    for t in (2048, 1024, 512, 256, 128):
        if m % t == 0 and 2 * t * bytes_per_lane <= _TILE_BUDGET:
            return t
    return m   # fall back to the full (possibly non-128-multiple) spatial extent


# ---------------------------------------------------------------------------
# Kernel 1: fused  act(scale * (W @ X) + shift)  over a (C_out, tile_m) block.
# Covers: conv-transpose 2x2 (4 stacked channel matmuls), 1x1/3x3/5x5 convs via
# im2col, conv bias, eval-mode BatchNorm affine, ReLU / PReLU / sigmoid.
# ---------------------------------------------------------------------------
def _matmul_affine_act_kernel(x_ref, w_ref, scale_ref, shift_ref, o_ref, *, act):
    # x_ref: (K, tm)  w_ref: (C_out, K)  scale/shift: (C_out, 1)  o_ref: (C_out, tm)
    y = jnp.dot(w_ref[...], x_ref[...], preferred_element_type=jnp.float32)
    y = y * scale_ref[...] + shift_ref[...]
    if act == "relu":
        y = jnp.maximum(y, 0.0)
    elif act == "prelu":
        y = jnp.where(y > 0, y, PRELU_ALPHA * y)
    elif act == "sigmoid":
        y = jax.nn.sigmoid(y)
    o_ref[...] = y.astype(o_ref.dtype)


def matmul_affine_act(x_nkm, w, scale, shift, *, act="linear"):
    """x_nkm: (N, K, M), w: (C_out, K) -> (N, C_out, M), fused per-channel affine + act."""
    n, k, m = x_nkm.shape
    c_out = w.shape[0]
    scale = jnp.broadcast_to(jnp.asarray(scale, jnp.float32).reshape(-1, 1), (c_out, 1))
    shift = jnp.broadcast_to(jnp.asarray(shift, jnp.float32).reshape(-1, 1), (c_out, 1))
    tm = _choose_lane_tile(m, (k + c_out) * 4)
    kernel = functools.partial(_matmul_affine_act_kernel, act=act)
    return pl.pallas_call(
        kernel,
        out_shape=jax.ShapeDtypeStruct((n, c_out, m), x_nkm.dtype),
        grid_spec=pltpu.PrefetchScalarGridSpec(
            num_scalar_prefetch=0,
            grid=(n, m // tm),              # batch x lane-tiles, both parallel
            in_specs=[
                pl.BlockSpec((None, k, tm), lambda b, j: (b, 0, j)),
                pl.BlockSpec((c_out, k), lambda b, j: (0, 0)),
                pl.BlockSpec((c_out, 1), lambda b, j: (0, 0)),
                pl.BlockSpec((c_out, 1), lambda b, j: (0, 0)),
            ],
            out_specs=pl.BlockSpec((None, c_out, tm), lambda b, j: (b, 0, j)),
        ),
        compiler_params=pltpu.CompilerParams(
            dimension_semantics=("parallel", "parallel"),
            vmem_limit_bytes=VMEM_LIMIT,
        ),
    )(x_nkm, w, scale, shift)


# ---------------------------------------------------------------------------
# Kernel 2: fused DAU tail.
#   out = W_sa @ (res * sigmoid(sa_logits)) + W_ca @ (res * ca) + x
# = conv1x1(cat([res*SA, res*CA])) + x  in a single pass (no materialized concat).
# ---------------------------------------------------------------------------
def _dau_tail_kernel(res_ref, sa_ref, ca_ref, x_ref, wa_ref, wb_ref, o_ref):
    res = res_ref[...]                                    # (C, tm)
    sa_branch = res * jax.nn.sigmoid(sa_ref[...])         # (1, tm) broadcast over sublanes
    ca_branch = res * ca_ref[...]                         # (C, 1) broadcast over lanes
    y = jnp.dot(wa_ref[...], sa_branch, preferred_element_type=jnp.float32)
    y = y + jnp.dot(wb_ref[...], ca_branch, preferred_element_type=jnp.float32)
    o_ref[...] = (y + x_ref[...]).astype(o_ref.dtype)


def dau_tail(res, sa_logits, ca, x, wa, wb):
    n, c, m = res.shape
    tm = _choose_lane_tile(m, (4 * c + 1) * 4)
    return pl.pallas_call(
        _dau_tail_kernel,
        out_shape=jax.ShapeDtypeStruct((n, c, m), res.dtype),
        grid_spec=pltpu.PrefetchScalarGridSpec(
            num_scalar_prefetch=0,
            grid=(n, m // tm),
            in_specs=[
                pl.BlockSpec((None, c, tm), lambda b, j: (b, 0, j)),   # res
                pl.BlockSpec((None, 1, tm), lambda b, j: (b, 0, j)),   # spatial-attn logits
                pl.BlockSpec((None, c, 1), lambda b, j: (b, 0, 0)),    # channel-attn gates
                pl.BlockSpec((None, c, tm), lambda b, j: (b, 0, j)),   # residual input
                pl.BlockSpec((c, c), lambda b, j: (0, 0)),             # conv1x1, SA half
                pl.BlockSpec((c, c), lambda b, j: (0, 0)),             # conv1x1, CA half
            ],
            out_specs=pl.BlockSpec((None, c, tm), lambda b, j: (b, 0, j)),
        ),
        compiler_params=pltpu.CompilerParams(
            dimension_semantics=("parallel", "parallel"),
            vmem_limit_bytes=VMEM_LIMIT,
        ),
    )(res, sa_logits, ca, x, wa, wb)


# ---------------------------------------------------------------------------
# Glue (layout plumbing only; heavy compute stays in the Pallas matmuls above).
# ---------------------------------------------------------------------------
def _im2col(x_nchw, k):
    """(N, C, H, W) -> (N, C*k*k, H*W) patches for a stride-1, pad=k//2 conv."""
    n, c, h, w = x_nchw.shape
    p = k // 2
    xp = jnp.pad(x_nchw, ((0, 0), (0, 0), (p, p), (p, p)))
    cols = [xp[:, :, dy:dy + h, dx:dx + w] for dy in range(k) for dx in range(k)]
    return jnp.concatenate(cols, axis=1).reshape(n, c * k * k, h * w)


def _flatten_conv_w(w):
    """PyTorch (C_out, C_in, k, k) -> (C_out, k*k*C_in) matching _im2col ordering."""
    return jnp.transpose(w, (0, 2, 3, 1)).reshape(w.shape[0], -1)


def conv_transpose_2x2(x, w, b):
    """nn.ConvTranspose2d(k=2, s=2): 4 stacked channel matmuls + pixel interleave."""
    n, c_in, h, wd = x.shape
    c_out = w.shape[1]
    w_stack = jnp.transpose(w, (2, 3, 1, 0)).reshape(4 * c_out, c_in)   # rows: (dy, dx, o)
    y = matmul_affine_act(x.reshape(n, c_in, h * wd), w_stack, 1.0, jnp.tile(b, 4))
    y = y.reshape(n, 2, 2, c_out, h, wd)
    return jnp.transpose(y, (0, 3, 4, 1, 5, 2)).reshape(n, c_out, 2 * h, 2 * wd)


def conv_block(x, p):
    """ConvBlock: Conv3x3(bias) -> BatchNorm2d -> ReLU, fused in one matmul pass."""
    # TODO(synk): BatchNorm uses running statistics (inference mode); training-mode
    # batch statistics would need a second reduction pass and are not fused here.
    n, _, h, w = x.shape
    inv = p["gamma"] / jnp.sqrt(p["rv"] + BN_EPS)
    shift = p["beta"] + (p["b"] - p["rm"]) * inv
    y = matmul_affine_act(_im2col(x, 3), _flatten_conv_w(p["w"]), inv, shift, act="relu")
    return y.reshape(n, -1, h, w)


def dau_forward(x, p):
    """DAU: conv3x3 -> PReLU -> conv3x3 -> {spatial attn, channel attn} -> conv1x1 -> +x."""
    n, c, h, w = x.shape
    m = h * w
    r = matmul_affine_act(_im2col(x, 3), _flatten_conv_w(p["body_w1"]), 1.0, 0.0, act="prelu")
    res = matmul_affine_act(_im2col(r.reshape(n, c, h, w), 3),
                            _flatten_conv_w(p["body_w2"]), 1.0, 0.0)
    res_nchw = res.reshape(n, c, h, w)

    # spatial attention logits: ChannelPool (max | mean over C) -> 5x5 conv (2 -> 1)
    pooled = jnp.concatenate([jnp.max(res_nchw, axis=1, keepdims=True),
                              jnp.mean(res_nchw, axis=1, keepdims=True)], axis=1)
    sa_logits = matmul_affine_act(_im2col(pooled, 5), _flatten_conv_w(p["sa_w"]), 1.0, 0.0)

    # channel attention gates: tiny (N, C) MLP, done as plain JAX glue
    gap = jnp.mean(res, axis=2)                                            # (N, C)
    hmid = jnp.maximum(gap @ p["ca_w1"].reshape(-1, c).T + p["ca_b1"], 0.0)
    ca = jax.nn.sigmoid(hmid @ p["ca_w2"].reshape(c, -1).T + p["ca_b2"])   # (N, C)

    # fused tail: attention scaling + concat + 1x1 conv + residual add
    w1x1 = p["conv1x1_w"].reshape(c, 2 * c)
    out = dau_tail(res, sa_logits, ca.reshape(n, c, 1), x.reshape(n, c, m),
                   w1x1[:, :c], w1x1[:, c:])
    return out.reshape(n, c, h, w)


def up_block_forward(up_x, down_x, params, attention=1):
    """UpBlockForUNetWithResNet50.forward (upsampling_method='conv_transpose')."""
    if attention == 1:
        down_x = dau_forward(down_x, params["dau"])
    x = conv_transpose_2x2(up_x, params["up_w"], params["up_b"])
    x = jnp.concatenate([x, down_x], axis=1)
    x = conv_block(x, params["cb1"])
    x = conv_block(x, params["cb2"])
    return x


# ---------------------------------------------------------------------------
# Pure-JAX reference (independent lax.conv path) for correctness checking.
# ---------------------------------------------------------------------------
def _ref_conv(x, w, pad):
    return lax.conv_general_dilated(x, w, (1, 1), ((pad, pad), (pad, pad)),
                                    dimension_numbers=("NCHW", "OIHW", "NCHW"))


def ref_conv_block(x, p):
    z = _ref_conv(x, p["w"], 1) + p["b"][None, :, None, None]
    z = (z - p["rm"][None, :, None, None]) / jnp.sqrt(p["rv"][None, :, None, None] + BN_EPS)
    z = z * p["gamma"][None, :, None, None] + p["beta"][None, :, None, None]
    return jnp.maximum(z, 0.0)


def ref_dau(x, p):
    c = x.shape[1]
    r = _ref_conv(x, p["body_w1"], 1)
    r = jnp.where(r > 0, r, PRELU_ALPHA * r)
    res = _ref_conv(r, p["body_w2"], 1)
    pooled = jnp.concatenate([jnp.max(res, axis=1, keepdims=True),
                              jnp.mean(res, axis=1, keepdims=True)], axis=1)
    sa_branch = res * jax.nn.sigmoid(_ref_conv(pooled, p["sa_w"], 2))
    gap = jnp.mean(res, axis=(2, 3))
    hmid = jnp.maximum(gap @ p["ca_w1"].reshape(-1, c).T + p["ca_b1"], 0.0)
    ca = jax.nn.sigmoid(hmid @ p["ca_w2"].reshape(c, -1).T + p["ca_b2"])
    cat = jnp.concatenate([res * sa_branch_scale_dummy(res, sa_branch), res * ca[:, :, None, None]], axis=1) \
        if False else jnp.concatenate([sa_branch, res * ca[:, :, None, None]], axis=1)
    return _ref_conv(cat, p["conv1x1_w"], 0) + x


def sa_branch_scale_dummy(res, sa_branch):  # never called (kept trivial)
    return sa_branch


def ref_forward(up_x, down_x, params, attention=1):
    if attention == 1:
        down_x = ref_dau(down_x, params["dau"])
    t = jnp.einsum("ncij,coab->noiajb", up_x, params["up_w"])
    n, _, h, w = up_x.shape
    c_out = params["up_w"].shape[1]
    x = t.reshape(n, c_out, 2 * h, 2 * w) + params["up_b"][None, :, None, None]
    x = jnp.concatenate([x, down_x], axis=1)
    x = ref_conv_block(x, params["cb1"])
    x = ref_conv_block(x, params["cb2"])
    return x


if __name__ == "__main__":
    key = jax.random.PRNGKey(0)
    ks = jax.random.split(key, 20)

    def rnd(i, shape, s=0.1):
        return jax.random.normal(ks[i], shape, dtype=jnp.float32) * s

    # small shapes consistent with the module: in_channels=16, out_channels=8,
    # batch=2, up_x 16x16 (-> upsampled 32x32), down_x 32x32, DAU n_feat=8, reduction=8.
    N, IN_CH, OUT_CH, H, W = 2, 16, 8, 16, 16
    RED = 8

    up_x = jax.random.normal(ks[0], (N, IN_CH, H, W), dtype=jnp.float32)
    down_x = jax.random.normal(ks[1], (N, OUT_CH, 2 * H, 2 * W), dtype=jnp.float32)

    params = {
        "up_w": rnd(2, (IN_CH, OUT_CH, 2, 2)),          # ConvTranspose2d weight (in, out, 2, 2)
        "up_b": rnd(3, (OUT_CH,)),
        "dau": {
            "body_w1": rnd(4, (OUT_CH, OUT_CH, 3, 3)),
            "body_w2": rnd(5, (OUT_CH, OUT_CH, 3, 3)),
            "sa_w": rnd(6, (1, 2, 5, 5)),
            "ca_w1": rnd(7, (OUT_CH // RED, OUT_CH, 1, 1)),
            "ca_b1": rnd(8, (OUT_CH // RED,)),
            "ca_w2": rnd(9, (OUT_CH, OUT_CH // RED, 1, 1)),
            "ca_b2": rnd(10, (OUT_CH,)),
            "conv1x1_w": rnd(11, (OUT_CH, 2 * OUT_CH, 1, 1)),
        },
        "cb1": {
            "w": rnd(12, (OUT_CH, IN_CH, 3, 3)), "b": rnd(13, (OUT_CH,)),
            "gamma": 1.0 + rnd(14, (OUT_CH,)), "beta": rnd(15, (OUT_CH,)),
            "rm": jnp.zeros((OUT_CH,), jnp.float32), "rv": jnp.ones((OUT_CH,), jnp.float32),
        },
        "cb2": {
            "w": rnd(16, (OUT_CH, OUT_CH, 3, 3)), "b": rnd(17, (OUT_CH,)),
            "gamma": 1.0 + rnd(18, (OUT_CH,)), "beta": rnd(19, (OUT_CH,)),
            "rm": jnp.zeros((OUT_CH,), jnp.float32), "rv": jnp.ones((OUT_CH,), jnp.float32),
        },
    }

    fwd = jax.jit(functools.partial(up_block_forward, attention=1))
    out = jax.block_until_ready(fwd(up_x, down_x, params))

    ref = jax.block_until_ready(ref_forward(up_x, down_x, params, attention=1))
    assert out.shape == (N, OUT_CH, 2 * H, 2 * W), out.shape
    assert jnp.allclose(out, ref, atol=2e-2, rtol=2e-2), float(jnp.max(jnp.abs(out - ref)))

    print("KERNEL_OK")
</pallas_src>

<mosaic_0001>
module attributes {stable_mosaic.version = 11 : i64} {
  func.func @_matmul_affine_act_kernel(%arg0: i32, %arg1: i32, %arg2: memref<1x72x1024xf32, #tpu.memory_space<vmem>>, %arg3: memref<8x72xf32, #tpu.memory_space<vmem>>, %arg4: memref<8x1xf32, #tpu.memory_space<vmem>>, %arg5: memref<8x1xf32, #tpu.memory_space<vmem>>, %arg6: memref<1x8x1024xf32, #tpu.memory_space<vmem>>) attributes {dimension_semantics = [#tpu.dimension_semantics<parallel>, #tpu.dimension_semantics<parallel>], iteration_bounds = array<i64: 2, 1>, scalar_prefetch = 0 : i64, scratch_operands = 0 : i64, tpu.core_type = #tpu.core_type<tc>, window_params = [{transform_indices = @transform_0, window_bounds = array<i64: 1, 72, 1024>}, {pipeline_mode = #tpu.pipeline_mode<synchronous>, transform_indices = @transform_1, window_bounds = array<i64: 8, 72>}, {pipeline_mode = #tpu.pipeline_mode<synchronous>, transform_indices = @transform_2, window_bounds = array<i64: 8, 1>}, {pipeline_mode = #tpu.pipeline_mode<synchronous>, transform_indices = @transform_3, window_bounds = array<i64: 8, 1>}, {transform_indices = @transform_4, window_bounds = array<i64: 1, 8, 1024>}]} {
    %c0 = arith.constant 0 : index
    %c0_0 = arith.constant 0 : index
    %0 = vector.load %arg3[%c0, %c0_0] : memref<8x72xf32, #tpu.memory_space<vmem>>, vector<8x72xf32>
    %c0_1 = arith.constant 0 : index
    %c0_2 = arith.constant 0 : index
    %c0_3 = arith.constant 0 : index
    %1 = vector.load %arg2[%c0_1, %c0_2, %c0_3] : memref<1x72x1024xf32, #tpu.memory_space<vmem>>, vector<1x72x1024xf32>
    %2 = vector.shape_cast %1 : vector<1x72x1024xf32> to vector<72x1024xf32>
    %cst = arith.constant dense<0.000000e+00> : vector<8x1024xf32>
    %3 = tpu.matmul %0, %2, %cst {dimension_numbers = #tpu.dot_dimension_numbers<[1], [0], [0], [1], [0, 0, 1, 1], [], []>} : vector<8x72xf32>, vector<72x1024xf32>, vector<8x1024xf32> -> vector<8x1024xf32>
    %c0_4 = arith.constant 0 : index
    %c0_5 = arith.constant 0 : index
    %4 = vector.load %arg4[%c0_4, %c0_5] : memref<8x1xf32, #tpu.memory_space<vmem>>, vector<8x1xf32>
    %5 = vector.broadcast %4 : vector<8x1xf32> to vector<8x1024xf32>
    %6 = arith.mulf %3, %5 : vector<8x1024xf32>
    %c0_6 = arith.constant 0 : index
    %c0_7 = arith.constant 0 : index
    %7 = vector.load %arg5[%c0_6, %c0_7] : memref<8x1xf32, #tpu.memory_space<vmem>>, vector<8x1xf32>
    %8 = vector.broadcast %7 : vector<8x1xf32> to vector<8x1024xf32>
    %9 = arith.addf %6, %8 : vector<8x1024xf32>
    %cst_8 = arith.constant 0.000000e+00 : f32
    %10 = vector.broadcast %cst_8 : f32 to vector<8x1024xf32>
    %11 = arith.cmpf ogt, %9, %10 : vector<8x1024xf32>
    %cst_9 = arith.constant 2.500000e-01 : f32
    %12 = vector.broadcast %cst_9 : f32 to vector<8x1024xf32>
    %13 = arith.mulf %12, %9 : vector<8x1024xf32>
    %14 = arith.select %11, %9, %13 : vector<8x1024xi1>, vector<8x1024xf32>
    %c0_10 = arith.constant 0 : index
    %c0_11 = arith.constant 0 : index
    %c0_12 = arith.constant 0 : index
    %15 = vector.load %arg6[%c0_10, %c0_11, %c0_12] : memref<1x8x1024xf32, #tpu.memory_space<vmem>>, vector<1x8x1024xf32>
    %16 = vector.shape_cast %15 : vector<1x8x1024xf32> to vector<8x1024xf32>
    %17 = vector.shape_cast %14 : vector<8x1024xf32> to vector<1x8x1024xf32>
    tpu.vector_store %arg6[%c0_10, %c0_11, %c0_12], %17 {strides = array<i32>} : memref<1x8x1024xf32, #tpu.memory_space<vmem>>, vector<1x8x1024xf32>,
    return
  }
  func.func @transform_0(%arg0: i32, %arg1: i32) -> (i32, i32, i32) {
    %c0_i32 = arith.constant 0 : i32
    %c0_i32_0 = arith.constant 0 : i32
    return %arg0, %c0_i32, %arg1 : i32, i32, i32
  }
  func.func @transform_1(%arg0: i32, %arg1: i32) -> (i32, i32) {
    %c0_i32 = arith.constant 0 : i32
    %c0_i32_0 = arith.constant 0 : i32
    %c0_i32_1 = arith.constant 0 : i32
    return %c0_i32, %c0_i32_0 : i32, i32
  }
  func.func @transform_2(%arg0: i32, %arg1: i32) -> (i32, i32) {
    %c0_i32 = arith.constant 0 : i32
    %c0_i32_0 = arith.constant 0 : i32
    %c0_i32_1 = arith.constant 0 : i32
    return %c0_i32, %c0_i32_0 : i32, i32
  }
  func.func @transform_3(%arg0: i32, %arg1: i32) -> (i32, i32) {
    %c0_i32 = arith.constant 0 : i32
    %c0_i32_0 = arith.constant 0 : i32
    %c0_i32_1 = arith.constant 0 : i32
    return %c0_i32, %c0_i32_0 : i32, i32
  }
  func.func @transform_4(%arg0: i32, %arg1: i32) -> (i32, i32, i32) {
    %c0_i32 = arith.constant 0 : i32
    %c0_i32_0 = arith.constant 0 : i32
    return %arg0, %c0_i32, %arg1 : i32, i32, i32
  }
}

module attributes {stable_mosaic.version = 11 : i64} {
  func.func @_matmul_affine_act_kernel(%arg0: i32, %arg1: i32, %arg2: memref<1x72x1024xf32, #tpu.memory_space<vmem>>, %arg3: memref<8x72xf32, #tpu.memory_space<vmem>>, %arg4: memref<8x1xf32, #tpu.memory_space<vmem>>, %arg5: memref<8x1xf32, #tpu.memory_space<vmem>>, %arg6: memref<1x8x1024xf32, #tpu.memory_space<vmem>>) attributes {dimension_semantics = [#tpu.dimension_semantics<parallel>, #tpu.dimension_semantics<parallel>], iteration_bounds = array<i64: 2, 1>, scalar_prefetch = 0 : i64, scratch_operands = 0 : i64, tpu.core_type = #tpu.core_type<tc>, window_params = [{transform_indices = @transform_0, window_bounds = array<i64: 1, 72, 1024>}, {pipeline_mode = #tpu.pipeline_mode<synchronous>, transform_indices = @transform_1, window_bounds = array<i64: 8, 72>}, {pipeline_mode = #tpu.pipeline_mode<synchronous>, transform_indices = @transform_2, window_bounds = array<i64: 8, 1>}, {pipeline_mode = #tpu.pipeline_mode<synchronous>, transform_indices = @transform_3, window_bounds = array<i64: 8, 1>}, {transform_indices = @transform_4, window_bounds = array<i64: 1, 8, 1024>}]} {
    %c0 = arith.constant 0 : index
    %c0_0 = arith.constant 0 : index
    %0 = vector.load %arg3[%c0, %c0_0] : memref<8x72xf32, #tpu.memory_space<vmem>>, vector<8x72xf32>
    %c0_1 = arith.constant 0 : index
    %c0_2 = arith.constant 0 : index
    %c0_3 = arith.constant 0 : index
    %1 = vector.load %arg2[%c0_1, %c0_2, %c0_3] : memref<1x72x1024xf32, #tpu.memory_space<vmem>>, vector<1x72x1024xf32>
    %2 = vector.shape_cast %1 : vector<1x72x1024xf32> to vector<72x1024xf32>
    %cst = arith.constant dense<0.000000e+00> : vector<8x1024xf32>
    %3 = tpu.matmul %0, %2, %cst {dimension_numbers = #tpu.dot_dimension_numbers<[1], [0], [0], [1], [0, 0, 1, 1], [], []>} : vector<8x72xf32>, vector<72x1024xf32>, vector<8x1024xf32> -> vector<8x1024xf32>
    %c0_4 = arith.constant 0 : index
    %c0_5 = arith.constant 0 : index
    %4 = vector.load %arg4[%c0_4, %c0_5] : memref<8x1xf32, #tpu.memory_space<vmem>>, vector<8x1xf32>
    %5 = vector.broadcast %4 : vector<8x1xf32> to vector<8x1024xf32>
    %6 = arith.mulf %3, %5 : vector<8x1024xf32>
    %c0_6 = arith.constant 0 : index
    %c0_7 = arith.constant 0 : index
    %7 = vector.load %arg5[%c0_6, %c0_7] : memref<8x1xf32, #tpu.memory_space<vmem>>, vector<8x1xf32>
    %8 = vector.broadcast %7 : vector<8x1xf32> to vector<8x1024xf32>
    %9 = arith.addf %6, %8 : vector<8x1024xf32>
    %c0_8 = arith.constant 0 : index
    %c0_9 = arith.constant 0 : index
    %c0_10 = arith.constant 0 : index
    %10 = vector.load %arg6[%c0_8, %c0_9, %c0_10] : memref<1x8x1024xf32, #tpu.memory_space<vmem>>, vector<1x8x1024xf32>
    %11 = vector.shape_cast %10 : vector<1x8x1024xf32> to vector<8x1024xf32>
    %12 = vector.shape_cast %9 : vector<8x1024xf32> to vector<1x8x1024xf32>
    tpu.vector_store %arg6[%c0_8, %c0_9, %c0_10], %12 {strides = array<i32>} : memref<1x8x1024xf32, #tpu.memory_space<vmem>>, vector<1x8x1024xf32>,
    return
  }
  func.func @transform_0(%arg0: i32, %arg1: i32) -> (i32, i32, i32) {
    %c0_i32 = arith.constant 0 : i32
    %c0_i32_0 = arith.constant 0 : i32
    return %arg0, %c0_i32, %arg1 : i32, i32, i32
  }
  func.func @transform_1(%arg0: i32, %arg1: i32) -> (i32, i32) {
    %c0_i32 = arith.constant 0 : i32
    %c0_i32_0 = arith.constant 0 : i32
    %c0_i32_1 = arith.constant 0 : i32
    return %c0_i32, %c0_i32_0 : i32, i32
  }
  func.func @transform_2(%arg0: i32, %arg1: i32) -> (i32, i32) {
    %c0_i32 = arith.constant 0 : i32
    %c0_i32_0 = arith.constant 0 : i32
    %c0_i32_1 = arith.constant 0 : i32
    return %c0_i32, %c0_i32_0 : i32, i32
  }
  func.func @transform_3(%arg0: i32, %arg1: i32) -> (i32, i32) {
    %c0_i32 = arith.constant 0 : i32
    %c0_i32_0 = arith.constant 0 : i32
    %c0_i32_1 = arith.constant 0 : i32
    return %c0_i32, %c0_i32_0 : i32, i32
  }
  func.func @transform_4(%arg0: i32, %arg1: i32) -> (i32, i32, i32) {
    %c0_i32 = arith.constant 0 : i32
    %c0_i32_0 = arith.constant 0 : i32
    return %arg0, %c0_i32, %arg1 : i32, i32, i32
  }
}

module attributes {stable_mosaic.version = 11 : i64} {
  func.func @_matmul_affine_act_kernel(%arg0: i32, %arg1: i32, %arg2: memref<1x50x1024xf32, #tpu.memory_space<vmem>>, %arg3: memref<1x50xf32, #tpu.memory_space<vmem>>, %arg4: memref<1x1xf32, #tpu.memory_space<vmem>>, %arg5: memref<1x1xf32, #tpu.memory_space<vmem>>, %arg6: memref<1x1x1024xf32, #tpu.memory_space<vmem>>) attributes {dimension_semantics = [#tpu.dimension_semantics<parallel>, #tpu.dimension_semantics<parallel>], iteration_bounds = array<i64: 2, 1>, scalar_prefetch = 0 : i64, scratch_operands = 0 : i64, tpu.core_type = #tpu.core_type<tc>, window_params = [{transform_indices = @transform_0, window_bounds = array<i64: 1, 50, 1024>}, {pipeline_mode = #tpu.pipeline_mode<synchronous>, transform_indices = @transform_1, window_bounds = array<i64: 1, 50>}, {pipeline_mode = #tpu.pipeline_mode<synchronous>, transform_indices = @transform_2, window_bounds = array<i64: 1, 1>}, {pipeline_mode = #tpu.pipeline_mode<synchronous>, transform_indices = @transform_3, window_bounds = array<i64: 1, 1>}, {transform_indices = @transform_4, window_bounds = array<i64: 1, 1, 1024>}]} {
    %c0 = arith.constant 0 : index
    %c0_0 = arith.constant 0 : index
    %0 = vector.load %arg3[%c0, %c0_0] : memref<1x50xf32, #tpu.memory_space<vmem>>, vector<1x50xf32>
    %c0_1 = arith.constant 0 : index
    %c0_2 = arith.constant 0 : index
    %c0_3 = arith.constant 0 : index
    %1 = vector.load %arg2[%c0_1, %c0_2, %c0_3] : memref<1x50x1024xf32, #tpu.memory_space<vmem>>, vector<1x50x1024xf32>
    %2 = vector.shape_cast %1 : vector<1x50x1024xf32> to vector<50x1024xf32>
    %cst = arith.constant dense<0.000000e+00> : vector<1x1024xf32>
    %3 = tpu.matmul %0, %2, %cst {dimension_numbers = #tpu.dot_dimension_numbers<[1], [0], [0], [1], [0, 0, 1, 1], [], []>} : vector<1x50xf32>, vector<50x1024xf32>, vector<1x1024xf32> -> vector<1x1024xf32>
    %c0_4 = arith.constant 0 : index
    %c0_5 = arith.constant 0 : index
    %4 = vector.load %arg4[%c0_4, %c0_5] : memref<1x1xf32, #tpu.memory_space<vmem>>, vector<1x1xf32>
    %5 = vector.broadcast %4 : vector<1x1xf32> to vector<1x1024xf32>
    %6 = arith.mulf %3, %5 : vector<1x1024xf32>
    %c0_6 = arith.constant 0 : index
    %c0_7 = arith.constant 0 : index
    %7 = vector.load %arg5[%c0_6, %c0_7] : memref<1x1xf32, #tpu.memory_space<vmem>>, vector<1x1xf32>
    %8 = vector.broadcast %7 : vector<1x1xf32> to vector<1x1024xf32>
    %9 = arith.addf %6, %8 : vector<1x1024xf32>
    %c0_8 = arith.constant 0 : index
    %c0_9 = arith.constant 0 : index
    %c0_10 = arith.constant 0 : index
    %10 = vector.load %arg6[%c0_8, %c0_9, %c0_10] : memref<1x1x1024xf32, #tpu.memory_space<vmem>>, vector<1x1x1024xf32>
    %11 = vector.shape_cast %10 : vector<1x1x1024xf32> to vector<1x1024xf32>
    %12 = vector.shape_cast %9 : vector<1x1024xf32> to vector<1x1x1024xf32>
    tpu.vector_store %arg6[%c0_8, %c0_9, %c0_10], %12 {strides = array<i32>} : memref<1x1x1024xf32, #tpu.memory_space<vmem>>, vector<1x1x1024xf32>,
    return
  }
  func.func @transform_0(%arg0: i32, %arg1: i32) -> (i32, i32, i32) {
    %c0_i32 = arith.constant 0 : i32
    %c0_i32_0 = arith.constant 0 : i32
    return %arg0, %c0_i32, %arg1 : i32, i32, i32
  }
  func.func @transform_1(%arg0: i32, %arg1: i32) -> (i32, i32) {
    %c0_i32 = arith.constant 0 : i32
    %c0_i32_0 = arith.constant 0 : i32
    %c0_i32_1 = arith.constant 0 : i32
    return %c0_i32, %c0_i32_0 : i32, i32
  }
  func.func @transform_2(%arg0: i32, %arg1: i32) -> (i32, i32) {
    %c0_i32 = arith.constant 0 : i32
    %c0_i32_0 = arith.constant 0 : i32
    %c0_i32_1 = arith.constant 0 : i32
    return %c0_i32, %c0_i32_0 : i32, i32
  }
  func.func @transform_3(%arg0: i32, %arg1: i32) -> (i32, i32) {
    %c0_i32 = arith.constant 0 : i32
    %c0_i32_0 = arith.constant 0 : i32
    %c0_i32_1 = arith.constant 0 : i32
    return %c0_i32, %c0_i32_0 : i32, i32
  }
  func.func @transform_4(%arg0: i32, %arg1: i32) -> (i32, i32, i32) {
    %c0_i32 = arith.constant 0 : i32
    %c0_i32_0 = arith.constant 0 : i32
    return %arg0, %c0_i32, %arg1 : i32, i32, i32
  }
}

module attributes {stable_mosaic.version = 11 : i64} {
  func.func @_dau_tail_kernel(%arg0: i32, %arg1: i32, %arg2: memref<1x8x1024xf32, #tpu.memory_space<vmem>>, %arg3: memref<1x1x1024xf32, #tpu.memory_space<vmem>>, %arg4: memref<1x8x1xf32, #tpu.memory_space<vmem>>, %arg5: memref<1x8x1024xf32, #tpu.memory_space<vmem>>, %arg6: memref<8x8xf32, #tpu.memory_space<vmem>>, %arg7: memref<8x8xf32, #tpu.memory_space<vmem>>, %arg8: memref<1x8x1024xf32, #tpu.memory_space<vmem>>) attributes {dimension_semantics = [#tpu.dimension_semantics<parallel>, #tpu.dimension_semantics<parallel>], iteration_bounds = array<i64: 2, 1>, scalar_prefetch = 0 : i64, scratch_operands = 0 : i64, tpu.core_type = #tpu.core_type<tc>, window_params = [{transform_indices = @transform_0, window_bounds = array<i64: 1, 8, 1024>}, {transform_indices = @transform_1, window_bounds = array<i64: 1, 1, 1024>}, {transform_indices = @transform_2, window_bounds = array<i64: 1, 8, 1>}, {transform_indices = @transform_3, window_bounds = array<i64: 1, 8, 1024>}, {pipeline_mode = #tpu.pipeline_mode<synchronous>, transform_indices = @transform_4, window_bounds = array<i64: 8, 8>}, {pipeline_mode = #tpu.pipeline_mode<synchronous>, transform_indices = @transform_5, window_bounds = array<i64: 8, 8>}, {transform_indices = @transform_6, window_bounds = array<i64: 1, 8, 1024>}]} {
    %c0 = arith.constant 0 : index
    %c0_0 = arith.constant 0 : index
    %c0_1 = arith.constant 0 : index
    %0 = vector.load %arg2[%c0, %c0_0, %c0_1] : memref<1x8x1024xf32, #tpu.memory_space<vmem>>, vector<1x8x1024xf32>
    %1 = vector.shape_cast %0 : vector<1x8x1024xf32> to vector<8x1024xf32>
    %c0_2 = arith.constant 0 : index
    %c0_3 = arith.constant 0 : index
    %c0_4 = arith.constant 0 : index
    %2 = vector.load %arg3[%c0_2, %c0_3, %c0_4] : memref<1x1x1024xf32, #tpu.memory_space<vmem>>, vector<1x1x1024xf32>
    %3 = vector.shape_cast %2 : vector<1x1x1024xf32> to vector<1x1024xf32>
    %4 = arith.negf %3 : vector<1x1024xf32>
    %5 = math.exp %4 : vector<1x1024xf32>
    %cst = arith.constant 1.000000e+00 : f32
    %6 = vector.broadcast %cst : f32 to vector<1x1024xf32>
    %7 = arith.addf %6, %5 : vector<1x1024xf32>
    %8 = arith.divf %6, %7 : vector<1x1024xf32>
    %9 = vector.broadcast %8 : vector<1x1024xf32> to vector<8x1024xf32>
    %10 = arith.mulf %1, %9 : vector<8x1024xf32>
    %c0_5 = arith.constant 0 : index
    %c0_6 = arith.constant 0 : index
    %c0_7 = arith.constant 0 : index
    %11 = vector.load %arg4[%c0_5, %c0_6, %c0_7] : memref<1x8x1xf32, #tpu.memory_space<vmem>>, vector<1x8x1xf32>
    %12 = vector.shape_cast %11 : vector<1x8x1xf32> to vector<8x1xf32>
    %13 = vector.broadcast %12 : vector<8x1xf32> to vector<8x1024xf32>
    %14 = arith.mulf %1, %13 : vector<8x1024xf32>
    %c0_8 = arith.constant 0 : index
    %c0_9 = arith.constant 0 : index
    %15 = vector.load %arg6[%c0_8, %c0_9] : memref<8x8xf32, #tpu.memory_space<vmem>>, vector<8x8xf32>
    %cst_10 = arith.constant dense<0.000000e+00> : vector<8x1024xf32>
    %16 = tpu.matmul %15, %10, %cst_10 {dimension_numbers = #tpu.dot_dimension_numbers<[1], [0], [0], [1], [0, 0, 1, 1], [], []>} : vector<8x8xf32>, vector<8x1024xf32>, vector<8x1024xf32> -> vector<8x1024xf32>
    %c0_11 = arith.constant 0 : index
    %c0_12 = arith.constant 0 : index
    %17 = vector.load %arg7[%c0_11, %c0_12] : memref<8x8xf32, #tpu.memory_space<vmem>>, vector<8x8xf32>
    %cst_13 = arith.constant dense<0.000000e+00> : vector<8x1024xf32>
    %18 = tpu.matmul %17, %14, %cst_13 {dimension_numbers = #tpu.dot_dimension_numbers<[1], [0], [0], [1], [0, 0, 1, 1], [], []>} : vector<8x8xf32>, vector<8x1024xf32>, vector<8x1024xf32> -> vector<8x1024xf32>
    %19 = arith.addf %16, %18 : vector<8x1024xf32>
    %c0_14 = arith.constant 0 : index
    %c0_15 = arith.constant 0 : index
    %c0_16 = arith.constant 0 : index
    %20 = vector.load %arg5[%c0_14, %c0_15, %c0_16] : memref<1x8x1024xf32, #tpu.memory_space<vmem>>, vector<1x8x1024xf32>
    %21 = vector.shape_cast %20 : vector<1x8x1024xf32> to vector<8x1024xf32>
    %22 = arith.addf %19, %21 : vector<8x1024xf32>
    %c0_17 = arith.constant 0 : index
    %c0_18 = arith.constant 0 : index
    %c0_19 = arith.constant 0 : index
    %23 = vector.load %arg8[%c0_17, %c0_18, %c0_19] : memref<1x8x1024xf32, #tpu.memory_space<vmem>>, vector<1x8x1024xf32>
    %24 = vector.shape_cast %23 : vector<1x8x1024xf32> to vector<8x1024xf32>
    %25 = vector.shape_cast %22 : vector<8x1024xf32> to vector<1x8x1024xf32>
    tpu.vector_store %arg8[%c0_17, %c0_18, %c0_19], %25 {strides = array<i32>} : memref<1x8x1024xf32, #tpu.memory_space<vmem>>, vector<1x8x1024xf32>,
    return
  }
  func.func @transform_0(%arg0: i32, %arg1: i32) -> (i32, i32, i32) {
    %c0_i32 = arith.constant 0 : i32
    %c0_i32_0 = arith.constant 0 : i32
    return %arg0, %c0_i32, %arg1 : i32, i32, i32
  }
  func.func @transform_1(%arg0: i32, %arg1: i32) -> (i32, i32, i32) {
    %c0_i32 = arith.constant 0 : i32
    %c0_i32_0 = arith.constant 0 : i32
    return %arg0, %c0_i32, %arg1 : i32, i32, i32
  }
  func.func @transform_2(%arg0: i32, %arg1: i32) -> (i32, i32, i32) {
    %c0_i32 = arith.constant 0 : i32
    %c0_i32_0 = arith.constant 0 : i32
    %c0_i32_1 = arith.constant 0 : i32
    return %arg0, %c0_i32, %c0_i32_0 : i32, i32, i32
  }
  func.func @transform_3(%arg0: i32, %arg1: i32) -> (i32, i32, i32) {
    %c0_i32 = arith.constant 0 : i32
    %c0_i32_0 = arith.constant 0 : i32
    return %arg0, %c0_i32, %arg1 : i32, i32, i32
  }
  func.func @transform_4(%arg0: i32, %arg1: i32) -> (i32, i32) {
    %c0_i32 = arith.constant 0 : i32
    %c0_i32_0 = arith.constant 0 : i32
    %c0_i32_1 = arith.constant 0 : i32
    return %c0_i32, %c0_i32_0 : i32, i32
  }
  func.func @transform_5(%arg0: i32, %arg1: i32) -> (i32, i32) {
    %c0_i32 = arith.constant 0 : i32
    %c0_i32_0 = arith.constant 0 : i32
    %c0_i32_1 = arith.constant 0 : i32
    return %c0_i32, %c0_i32_0 : i32, i32
  }
  func.func @transform_6(%arg0: i32, %arg1: i32) -> (i32, i32, i32) {
    %c0_i32 = arith.constant 0 : i32
    %c0_i32_0 = arith.constant 0 : i32
    return %arg0, %c0_i32, %arg1 : i32, i32, i32
  }
}

module attributes {stable_mosaic.version = 11 : i64} {
  func.func @_matmul_affine_act_kernel(%arg0: i32, %arg1: i32, %arg2: memref<1x16x256xf32, #tpu.memory_space<vmem>>, %arg3: memref<32x16xf32, #tpu.memory_space<vmem>>, %arg4: memref<32x1xf32, #tpu.memory_space<vmem>>, %arg5: memref<32x1xf32, #tpu.memory_space<vmem>>, %arg6: memref<1x32x256xf32, #tpu.memory_space<vmem>>) attributes {dimension_semantics = [#tpu.dimension_semantics<parallel>, #tpu.dimension_semantics<parallel>], iteration_bounds = array<i64: 2, 1>, scalar_prefetch = 0 : i64, scratch_operands = 0 : i64, tpu.core_type = #tpu.core_type<tc>, window_params = [{transform_indices = @transform_0, window_bounds = array<i64: 1, 16, 256>}, {pipeline_mode = #tpu.pipeline_mode<synchronous>, transform_indices = @transform_1, window_bounds = array<i64: 32, 16>}, {pipeline_mode = #tpu.pipeline_mode<synchronous>, transform_indices = @transform_2, window_bounds = array<i64: 32, 1>}, {pipeline_mode = #tpu.pipeline_mode<synchronous>, transform_indices = @transform_3, window_bounds = array<i64: 32, 1>}, {transform_indices = @transform_4, window_bounds = array<i64: 1, 32, 256>}]} {
    %c0 = arith.constant 0 : index
    %c0_0 = arith.constant 0 : index
    %0 = vector.load %arg3[%c0, %c0_0] : memref<32x16xf32, #tpu.memory_space<vmem>>, vector<32x16xf32>
    %c0_1 = arith.constant 0 : index
    %c0_2 = arith.constant 0 : index
    %c0_3 = arith.constant 0 : index
    %1 = vector.load %arg2[%c0_1, %c0_2, %c0_3] : memref<1x16x256xf32, #tpu.memory_space<vmem>>, vector<1x16x256xf32>
    %2 = vector.shape_cast %1 : vector<1x16x256xf32> to vector<16x256xf32>
    %cst = arith.constant dense<0.000000e+00> : vector<32x256xf32>
    %3 = tpu.matmul %0, %2, %cst {dimension_numbers = #tpu.dot_dimension_numbers<[1], [0], [0], [1], [0, 0, 1, 1], [], []>} : vector<32x16xf32>, vector<16x256xf32>, vector<32x256xf32> -> vector<32x256xf32>
    %c0_4 = arith.constant 0 : index
    %c0_5 = arith.constant 0 : index
    %4 = vector.load %arg4[%c0_4, %c0_5] : memref<32x1xf32, #tpu.memory_space<vmem>>, vector<32x1xf32>
    %5 = vector.broadcast %4 : vector<32x1xf32> to vector<32x256xf32>
    %6 = arith.mulf %3, %5 : vector<32x256xf32>
    %c0_6 = arith.constant 0 : index
    %c0_7 = arith.constant 0 : index
    %7 = vector.load %arg5[%c0_6, %c0_7] : memref<32x1xf32, #tpu.memory_space<vmem>>, vector<32x1xf32>
    %8 = vector.broadcast %7 : vector<32x1xf32> to vector<32x256xf32>
    %9 = arith.addf %6, %8 : vector<32x256xf32>
    %c0_8 = arith.constant 0 : index
    %c0_9 = arith.constant 0 : index
    %c0_10 = arith.constant 0 : index
    %10 = vector.load %arg6[%c0_8, %c0_9, %c0_10] : memref<1x32x256xf32, #tpu.memory_space<vmem>>, vector<1x32x256xf32>
    %11 = vector.shape_cast %10 : vector<1x32x256xf32> to vector<32x256xf32>
    %12 = vector.shape_cast %9 : vector<32x256xf32> to vector<1x32x256xf32>
    tpu.vector_store %arg6[%c0_8, %c0_9, %c0_10], %12 {strides = array<i32>} : memref<1x32x256xf32, #tpu.memory_space<vmem>>, vector<1x32x256xf32>,
    return
  }
  func.func @transform_0(%arg0: i32, %arg1: i32) -> (i32, i32, i32) {
    %c0_i32 = arith.constant 0 : i32
    %c0_i32_0 = arith.constant 0 : i32
    return %arg0, %c0_i32, %arg1 : i32, i32, i32
  }
  func.func @transform_1(%arg0: i32, %arg1: i32) -> (i32, i32) {
    %c0_i32 = arith.constant 0 : i32
    %c0_i32_0 = arith.constant 0 : i32
    %c0_i32_1 = arith.constant 0 : i32
    return %c0_i32, %c0_i32_0 : i32, i32
  }
  func.func @transform_2(%arg0: i32, %arg1: i32) -> (i32, i32) {
    %c0_i32 = arith.constant 0 : i32
    %c0_i32_0 = arith.constant 0 : i32
    %c0_i32_1 = arith.constant 0 : i32
    return %c0_i32, %c0_i32_0 : i32, i32
  }
  func.func @transform_3(%arg0: i32, %arg1: i32) -> (i32, i32) {
    %c0_i32 = arith.constant 0 : i32
    %c0_i32_0 = arith.constant 0 : i32
    %c0_i32_1 = arith.constant 0 : i32
    return %c0_i32, %c0_i32_0 : i32, i32
  }
  func.func @transform_4(%arg0: i32, %arg1: i32) -> (i32, i32, i32) {
    %c0_i32 = arith.constant 0 : i32
    %c0_i32_0 = arith.constant 0 : i32
    return %arg0, %c0_i32, %arg1 : i32, i32, i32
  }
}

module attributes {stable_mosaic.version = 11 : i64} {
  func.func @_matmul_affine_act_kernel(%arg0: i32, %arg1: i32, %arg2: memref<1x144x1024xf32, #tpu.memory_space<vmem>>, %arg3: memref<8x144xf32, #tpu.memory_space<vmem>>, %arg4: memref<8x1xf32, #tpu.memory_space<vmem>>, %arg5: memref<8x1xf32, #tpu.memory_space<vmem>>, %arg6: memref<1x8x1024xf32, #tpu.memory_space<vmem>>) attributes {dimension_semantics = [#tpu.dimension_semantics<parallel>, #tpu.dimension_semantics<parallel>], iteration_bounds = array<i64: 2, 1>, scalar_prefetch = 0 : i64, scratch_operands = 0 : i64, tpu.core_type = #tpu.core_type<tc>, window_params = [{transform_indices = @transform_0, window_bounds = array<i64: 1, 144, 1024>}, {pipeline_mode = #tpu.pipeline_mode<synchronous>, transform_indices = @transform_1, window_bounds = array<i64: 8, 144>}, {pipeline_mode = #tpu.pipeline_mode<synchronous>, transform_indices = @transform_2, window_bounds = array<i64: 8, 1>}, {pipeline_mode = #tpu.pipeline_mode<synchronous>, transform_indices = @transform_3, window_bounds = array<i64: 8, 1>}, {transform_indices = @transform_4, window_bounds = array<i64: 1, 8, 1024>}]} {
    %c0 = arith.constant 0 : index
    %c0_0 = arith.constant 0 : index
    %0 = vector.load %arg3[%c0, %c0_0] : memref<8x144xf32, #tpu.memory_space<vmem>>, vector<8x144xf32>
    %c0_1 = arith.constant 0 : index
    %c0_2 = arith.constant 0 : index
    %c0_3 = arith.constant 0 : index
    %1 = vector.load %arg2[%c0_1, %c0_2, %c0_3] : memref<1x144x1024xf32, #tpu.memory_space<vmem>>, vector<1x144x1024xf32>
    %2 = vector.shape_cast %1 : vector<1x144x1024xf32> to vector<144x1024xf32>
    %cst = arith.constant dense<0.000000e+00> : vector<8x1024xf32>
    %3 = tpu.matmul %0, %2, %cst {dimension_numbers = #tpu.dot_dimension_numbers<[1], [0], [0], [1], [0, 0, 1, 1], [], []>} : vector<8x144xf32>, vector<144x1024xf32>, vector<8x1024xf32> -> vector<8x1024xf32>
    %c0_4 = arith.constant 0 : index
    %c0_5 = arith.constant 0 : index
    %4 = vector.load %arg4[%c0_4, %c0_5] : memref<8x1xf32, #tpu.memory_space<vmem>>, vector<8x1xf32>
    %5 = vector.broadcast %4 : vector<8x1xf32> to vector<8x1024xf32>
    %6 = arith.mulf %3, %5 : vector<8x1024xf32>
    %c0_6 = arith.constant 0 : index
    %c0_7 = arith.constant 0 : index
    %7 = vector.load %arg5[%c0_6, %c0_7] : memref<8x1xf32, #tpu.memory_space<vmem>>, vector<8x1xf32>
    %8 = vector.broadcast %7 : vector<8x1xf32> to vector<8x1024xf32>
    %9 = arith.addf %6, %8 : vector<8x1024xf32>
    %cst_8 = arith.constant 0.000000e+00 : f32
    %10 = vector.broadcast %cst_8 : f32 to vector<8x1024xf32>
    %11 = arith.maximumf %9, %10 : vector<8x1024xf32>
    %c0_9 = arith.constant 0 : index
    %c0_10 = arith.constant 0 : index
    %c0_11 = arith.constant 0 : index
    %12 = vector.load %arg6[%c0_9, %c0_10, %c0_11] : memref<1x8x1024xf32, #tpu.memory_space<vmem>>, vector<1x8x1024xf32>
    %13 = vector.shape_cast %12 : vector<1x8x1024xf32> to vector<8x1024xf32>
    %14 = vector.shape_cast %11 : vector<8x1024xf32> to vector<1x8x1024xf32>
    tpu.vector_store %arg6[%c0_9, %c0_10, %c0_11], %14 {strides = array<i32>} : memref<1x8x1024xf32, #tpu.memory_space<vmem>>, vector<1x8x1024xf32>,
    return
  }
  func.func @transform_0(%arg0: i32, %arg1: i32) -> (i32, i32, i32) {
    %c0_i32 = arith.constant 0 : i32
    %c0_i32_0 = arith.constant 0 : i32
    return %arg0, %c0_i32, %arg1 : i32, i32, i32
  }
  func.func @transform_1(%arg0: i32, %arg1: i32) -> (i32, i32) {
    %c0_i32 = arith.constant 0 : i32
    %c0_i32_0 = arith.constant 0 : i32
    %c0_i32_1 = arith.constant 0 : i32
    return %c0_i32, %c0_i32_0 : i32, i32
  }
  func.func @transform_2(%arg0: i32, %arg1: i32) -> (i32, i32) {
    %c0_i32 = arith.constant 0 : i32
    %c0_i32_0 = arith.constant 0 : i32
    %c0_i32_1 = arith.constant 0 : i32
    return %c0_i32, %c0_i32_0 : i32, i32
  }
  func.func @transform_3(%arg0: i32, %arg1: i32) -> (i32, i32) {
    %c0_i32 = arith.constant 0 : i32
    %c0_i32_0 = arith.constant 0 : i32
    %c0_i32_1 = arith.constant 0 : i32
    return %c0_i32, %c0_i32_0 : i32, i32
  }
  func.func @transform_4(%arg0: i32, %arg1: i32) -> (i32, i32, i32) {
    %c0_i32 = arith.constant 0 : i32
    %c0_i32_0 = arith.constant 0 : i32
    return %arg0, %c0_i32, %arg1 : i32, i32, i32
  }
}

module attributes {stable_mosaic.version = 11 : i64} {
  func.func @_matmul_affine_act_kernel(%arg0: i32, %arg1: i32, %arg2: memref<1x72x1024xf32, #tpu.memory_space<vmem>>, %arg3: memref<8x72xf32, #tpu.memory_space<vmem>>, %arg4: memref<8x1xf32, #tpu.memory_space<vmem>>, %arg5: memref<8x1xf32, #tpu.memory_space<vmem>>, %arg6: memref<1x8x1024xf32, #tpu.memory_space<vmem>>) attributes {dimension_semantics = [#tpu.dimension_semantics<parallel>, #tpu.dimension_semantics<parallel>], iteration_bounds = array<i64: 2, 1>, scalar_prefetch = 0 : i64, scratch_operands = 0 : i64, tpu.core_type = #tpu.core_type<tc>, window_params = [{transform_indices = @transform_0, window_bounds = array<i64: 1, 72, 1024>}, {pipeline_mode = #tpu.pipeline_mode<synchronous>, transform_indices = @transform_1, window_bounds = array<i64: 8, 72>}, {pipeline_mode = #tpu.pipeline_mode<synchronous>, transform_indices = @transform_2, window_bounds = array<i64: 8, 1>}, {pipeline_mode = #tpu.pipeline_mode<synchronous>, transform_indices = @transform_3, window_bounds = array<i64: 8, 1>}, {transform_indices = @transform_4, window_bounds = array<i64: 1, 8, 1024>}]} {
    %c0 = arith.constant 0 : index
    %c0_0 = arith.constant 0 : index
    %0 = vector.load %arg3[%c0, %c0_0] : memref<8x72xf32, #tpu.memory_space<vmem>>, vector<8x72xf32>
    %c0_1 = arith.constant 0 : index
    %c0_2 = arith.constant 0 : index
    %c0_3 = arith.constant 0 : index
    %1 = vector.load %arg2[%c0_1, %c0_2, %c0_3] : memref<1x72x1024xf32, #tpu.memory_space<vmem>>, vector<1x72x1024xf32>
    %2 = vector.shape_cast %1 : vector<1x72x1024xf32> to vector<72x1024xf32>
    %cst = arith.constant dense<0.000000e+00> : vector<8x1024xf32>
    %3 = tpu.matmul %0, %2, %cst {dimension_numbers = #tpu.dot_dimension_numbers<[1], [0], [0], [1], [0, 0, 1, 1], [], []>} : vector<8x72xf32>, vector<72x1024xf32>, vector<8x1024xf32> -> vector<8x1024xf32>
    %c0_4 = arith.constant 0 : index
    %c0_5 = arith.constant 0 : index
    %4 = vector.load %arg4[%c0_4, %c0_5] : memref<8x1xf32, #tpu.memory_space<vmem>>, vector<8x1xf32>
    %5 = vector.broadcast %4 : vector<8x1xf32> to vector<8x1024xf32>
    %6 = arith.mulf %3, %5 : vector<8x1024xf32>
    %c0_6 = arith.constant 0 : index
    %c0_7 = arith.constant 0 : index
    %7 = vector.load %arg5[%c0_6, %c0_7] : memref<8x1xf32, #tpu.memory_space<vmem>>, vector<8x1xf32>
    %8 = vector.broadcast %7 : vector<8x1xf32> to vector<8x1024xf32>
    %9 = arith.addf %6, %8 : vector<8x1024xf32>
    %cst_8 = arith.constant 0.000000e+00 : f32
    %10 = vector.broadcast %cst_8 : f32 to vector<8x1024xf32>
    %11 = arith.maximumf %9, %10 : vector<8x1024xf32>
    %c0_9 = arith.constant 0 : index
    %c0_10 = arith.constant 0 : index
    %c0_11 = arith.constant 0 : index
    %12 = vector.load %arg6[%c0_9, %c0_10, %c0_11] : memref<1x8x1024xf32, #tpu.memory_space<vmem>>, vector<1x8x1024xf32>
    %13 = vector.shape_cast %12 : vector<1x8x1024xf32> to vector<8x1024xf32>
    %14 = vector.shape_cast %11 : vector<8x1024xf32> to vector<1x8x1024xf32>
    tpu.vector_store %arg6[%c0_9, %c0_10, %c0_11], %14 {strides = array<i32>} : memref<1x8x1024xf32, #tpu.memory_space<vmem>>, vector<1x8x1024xf32>,
    return
  }
  func.func @transform_0(%arg0: i32, %arg1: i32) -> (i32, i32, i32) {
    %c0_i32 = arith.constant 0 : i32
    %c0_i32_0 = arith.constant 0 : i32
    return %arg0, %c0_i32, %arg1 : i32, i32, i32
  }
  func.func @transform_1(%arg0: i32, %arg1: i32) -> (i32, i32) {
    %c0_i32 = arith.constant 0 : i32
    %c0_i32_0 = arith.constant 0 : i32
    %c0_i32_1 = arith.constant 0 : i32
    return %c0_i32, %c0_i32_0 : i32, i32
  }
  func.func @transform_2(%arg0: i32, %arg1: i32) -> (i32, i32) {
    %c0_i32 = arith.constant 0 : i32
    %c0_i32_0 = arith.constant 0 : i32
    %c0_i32_1 = arith.constant 0 : i32
    return %c0_i32, %c0_i32_0 : i32, i32
  }
  func.func @transform_3(%arg0: i32, %arg1: i32) -> (i32, i32) {
    %c0_i32 = arith.constant 0 : i32
    %c0_i32_0 = arith.constant 0 : i32
    %c0_i32_1 = arith.constant 0 : i32
    return %c0_i32, %c0_i32_0 : i32, i32
  }
  func.func @transform_4(%arg0: i32, %arg1: i32) -> (i32, i32, i32) {
    %c0_i32 = arith.constant 0 : i32
    %c0_i32_0 = arith.constant 0 : i32
    return %arg0, %c0_i32, %arg1 : i32, i32, i32
  }
}

</mosaic_0001>

<bundles_post_ra>
// kernel: up_block_forward.7
= control target key start
LH: loop header
LB: loop body
LE: loop exit
PB: predicated region body
PF: predicated region fallthrough
CT: control target
= control target key end

     0   :  { %s839_s15 = smov 0   ;;  %s841_s16 = smov 0   ;;  %s983_s0 = inlined_call_operand.vmem [shape: f32[2,72,1024], index: 0, kind: input, shape index: {}]   ;;  %s984_s1 = inlined_call_operand.vmem [shape: f32[8,72], index: 1, kind: input, shape index: {}]   ;;  %s985_s2 = inlined_call_operand.vmem [shape: f32[8,1], index: 2, kind: input, shape index: {}]   ;;  %s986_s3 = inlined_call_operand.vmem [shape: f32[8,1], index: 3, kind: input, shape index: {}]   ;;  %s987_s4 = inlined_call_operand.vmem [shape: f32[2,8,1024], index: 4, kind: output, shape index: {}]  }
   0x1   :  { %s843_s17 = smov 0  }
   0x2 LB: > { %s26_s18 = sadd.s32 1, %s806_s16  ;;  %p749_p0 = scmp.ge.s32.totalorder %s810_s17, 1  ;;  %s810_s17 = sphi %s843_s17, %s14_s17   ;;  %s806_s16 = sphi %s841_s16, %s989_s16   ;;  %s802_s15 = sphi %s839_s15, %s988_s15  }
   0x3   : > { %p28_p1 = scmp.ge.s32.totalorder %s26_s18, 2  ;;  %p183_p2 = scmp.lt.s32.totalorder %s810_s17, 3 }
   0x5   : > { %s991_s18 = smov (%p28_p1, %s26_s18), 0  ;;  %p184_p3 = pnand %p749_p0, %p183_p2 }
   0x6   : > { %p218_p4 = scmp.lt.s32.totalorder (!%p184_p3), %s802_s15, 1 }
   0x7   : > { %187 = sbr.rel (%p184_p3) target bundleno = 259 (0x103), region = 36 }
   0xc   : > { %v598_v0 = vld [vmem:[%s985_s2] sm:$0xff]  ;;  %v812_v1 = vmov 0.0   ;;  %s993_s15 = smov (!%p218_p4, %s802_s15), 1  ;;  %v813_v2 = vmov 0   ;;  %vm310_vm0 = vcmask 588800  }
   0xd   : > { %378 = vmatprep.mubr.f32.mxu0 %v812_v1  ;;  %449 = vmatprep.mubr.f32.mxu1 %v812_v1  ;;  %s760_s21 = smul.u32 576, %s993_s15  ;;  %v612_v3 = vld [vmem:[%s986_s3] sm:$0xff]  ;;  %s759_s29 = sshll.u32 %s993_s15, 6 }
   0xe   : > { %787 = vset.pattern.permute.xlu0 %v813_v2  ;;  %v912_v40 = vld [vmem:[%s984_s1] sm:$0xff]  ;;  %s964_s6 = scalar_lea.vmem %s987_s4, %s759_s29 }
   0xf   : > { %601 = vperm.xlu0 %787, %v598_v0   ;;  %s871_s26 = scalar_lea.vmem %s983_s0, %s760_s21 }
  0x10   : > { %v303_v4 = vld [vmem:[%s871_s26 + $0x208] sm:$0xff]  ;;  %v305_v5 = vld [vmem:[%s871_s26 + $0x218] sm:$0xff]  ;;  %v302_v6 = vld [vmem:[%s871_s26 + $0x200] sm:$0xff] }
  0x11   : > { %328 = vmatprep.subr.mxu0 %v303_v4  ;;  %399 = vmatprep.subr.mxu1 %v305_v5  ;;  %v304_v7 = vld [vmem:[%s871_s26 + $0x210] sm:$0xff]  ;;  %v295_v8 = vld [vmem:[%s871_s26 + $0x1c8] sm:$0xff]  ;;  %v297_v9 = vld [vmem:[%s871_s26 + $0x1d8] sm:$0xff] }
  0x12   : > { %329 = vmatpush1.msra.mxu0 %v302_v6  ;;  %400 = vmatpush1.msra.mxu1 %v304_v7  ;;  %v294_v10 = vld [vmem:[%s871_s26 + $0x1c0] sm:$0xff]  ;;  %v296_v11 = vld [vmem:[%s871_s26 + $0x1d0] sm:$0xff]  ;;  %v287_v12 = vld [vmem:[%s871_s26 + $0x188] sm:$0xff] }
  0x13   : > { %615 = vperm.xlu0 %787, %v612_v3   ;;  %330 = vmatprep.subr.mxu0 %v295_v8  ;;  %v289_v13 = vld [vmem:[%s871_s26 + $0x198] sm:$0xff]  ;;  %v286_v14 = vld [vmem:[%s871_s26 + $0x180] sm:$0xff]  ;;  %v288_v15 = vld [vmem:[%s871_s26 + $0x190] sm:$0xff] }
  0x14   : > { %401 = vmatprep.subr.mxu1 %v297_v9  ;;  %331 = vmatpush1.msra.mxu0 %v294_v10  ;;  %v279_v16 = vld [vmem:[%s871_s26 + $0x148] sm:$0xff]  ;;  %v281_v17 = vld [vmem:[%s871_s26 + $0x158] sm:$0xff]  ;;  %v278_v18 = vld [vmem:[%s871_s26 + $0x140] sm:$0xff] }
  0x15   : > { %402 = vmatpush1.msra.mxu1 %v296_v11  ;;  %332 = vmatprep.subr.mxu0 %v287_v12  ;;  %v280_v19 = vld [vmem:[%s871_s26 + $0x150] sm:$0xff]  ;;  %v271_v20 = vld [vmem:[%s871_s26 + $0x108] sm:$0xff]  ;;  %v273_v21 = vld [vmem:[%s871_s26 + $0x118] sm:$0xff] }
  0x16   : > { %403 = vmatprep.subr.mxu1 %v289_v13  ;;  %333 = vmatpush1.msra.mxu0 %v286_v14  ;;  %v270_v22 = vld [vmem:[%s871_s26 + $0x100] sm:$0xff]  ;;  %v272_v23 = vld [vmem:[%s871_s26 + $0x110] sm:$0xff]  ;;  %v263_v24 = vld [vmem:[%s871_s26 + $0xc8] sm:$0xff] }
  0x17   : > { %404 = vmatpush1.msra.mxu1 %v288_v15  ;;  %334 = vmatprep.subr.mxu0 %v279_v16  ;;  %v265_v25 = vld [vmem:[%s871_s26 + $0xd8] sm:$0xff]  ;;  %v262_v26 = vld [vmem:[%s871_s26 + $0xc0] sm:$0xff]  ;;  %v264_v27 = vld [vmem:[%s871_s26 + $0xd0] sm:$0xff] }
  0x18   : > { %405 = vmatprep.subr.mxu1 %v281_v17  ;;  %335 = vmatpush1.msra.mxu0 %v278_v18  ;;  %v255_v28 = vld [vmem:[%s871_s26 + $0x88] sm:$0xff]  ;;  %v257_v29 = vld [vmem:[%s871_s26 + $0x98] sm:$0xff]  ;;  %v254_v30 = vld [vmem:[%s871_s26 + $0x80] sm:$0xff] }
  0x19   : > { %406 = vmatpush1.msra.mxu1 %v280_v19  ;;  %336 = vmatprep.subr.mxu0 %v271_v20  ;;  %v256_v31 = vld [vmem:[%s871_s26 + $0x90] sm:$0xff]  ;;  %v247_v32 = vld [vmem:[%s871_s26 + $0x48] sm:$0xff]  ;;  %v249_v33 = vld [vmem:[%s871_s26 + $0x58] sm:$0xff] }
  0x1a   : > { %407 = vmatprep.subr.mxu1 %v273_v21  ;;  %337 = vmatpush1.msra.mxu0 %v270_v22  ;;  %v246_v34 = vld [vmem:[%s871_s26 + $0x40] sm:$0xff]  ;;  %v248_v35 = vld [vmem:[%s871_s26 + $0x50] sm:$0xff]  ;;  %v239_v36 = vld [vmem:[%s871_s26 + $0x8] sm:$0xff] }
  0x1b   : > { %408 = vmatpush1.msra.mxu1 %v272_v23  ;;  %338 = vmatprep.subr.mxu0 %v263_v24  ;;  %v241_v37 = vld [vmem:[%s871_s26 + $0x18] sm:$0xff]  ;;  %v238_v38 = vld [vmem:[%s871_s26] sm:$0xff]  ;;  %v240_v39 = vld [vmem:[%s871_s26 + $0x10] sm:$0xff] }
  0x1c   : > { %409 = vmatprep.subr.mxu1 %v265_v25  ;;  %339 = vmatpush1.msra.mxu0 %v262_v26  ;;  %v307_v41 = vld [vmem:[%s871_s26 + $0x228] sm:$0xff]  ;;  %v309_v42 = vld [vmem:[%s871_s26 + $0x238] sm:$0xff]  ;;  %v306_v43 = vld [vmem:[%s871_s26 + $0x220] sm:$0xff] }
  0x1d   : > { %410 = vmatpush1.msra.mxu1 %v264_v27  ;;  %340 = vmatprep.subr.mxu0 %v255_v28  ;;  %v308_v44 = vld [vmem:[%s871_s26 + $0x230] sm:$0xff]  ;;  %v299_v45 = vld [vmem:[%s871_s26 + $0x1e8] sm:$0xff]  ;;  %v301_v46 = vld [vmem:[%s871_s26 + $0x1f8] sm:$0xff] }
  0x1e   : > { %411 = vmatprep.subr.mxu1 %v257_v29  ;;  %341 = vmatpush1.msra.mxu0 %v254_v30  ;;  %v298_v47 = vld [vmem:[%s871_s26 + $0x1e0] sm:$0xff]  ;;  %v300_v48 = vld [vmem:[%s871_s26 + $0x1f0] sm:$0xff]  ;;  %v291_v49 = vld [vmem:[%s871_s26 + $0x1a8] sm:$0xff] }
  0x1f   : > { %412 = vmatpush1.msra.mxu1 %v256_v31  ;;  %342 = vmatprep.subr.mxu0 %v247_v32  ;;  %v293_v50 = vld [vmem:[%s871_s26 + $0x1b8] sm:$0xff]  ;;  %v290_v51 = vld [vmem:[%s871_s26 + $0x1a0] sm:$0xff]  ;;  %v292_v52 = vld [vmem:[%s871_s26 + $0x1b0] sm:$0xff] }
  0x20   : > { %413 = vmatprep.subr.mxu1 %v249_v33  ;;  %343 = vmatpush1.msra.mxu0 %v246_v34  ;;  %v283_v53 = vld [vmem:[%s871_s26 + $0x168] sm:$0xff]  ;;  %v285_v54 = vld [vmem:[%s871_s26 + $0x178] sm:$0xff]  ;;  %v282_v55 = vld [vmem:[%s871_s26 + $0x160] sm:$0xff] }
  0x21   : > { %414 = vmatpush1.msra.mxu1 %v248_v35  ;;  %344 = vmatprep.subr.mxu0 %v239_v36  ;;  %v284_v56 = vld [vmem:[%s871_s26 + $0x170] sm:$0xff]  ;;  %v275_v57 = vld [vmem:[%s871_s26 + $0x128] sm:$0xff]  ;;  %v277_v58 = vld [vmem:[%s871_s26 + $0x138] sm:$0xff] }
  0x22   : > { %415 = vmatprep.subr.mxu1 %v241_v37  ;;  %345 = vmatpush1.msra.mxu0 %v238_v38  ;;  %v274_v59 = vld [vmem:[%s871_s26 + $0x120] sm:$0xff]  ;;  %v276_v60 = vld [vmem:[%s871_s26 + $0x130] sm:$0xff]  ;;  %v267_v61 = vld [vmem:[%s871_s26 + $0xe8] sm:$0xff] }
  0x23   : > { %416 = vmatpush1.msra.mxu1 %v240_v39  ;;  %753 = vmatmul.mubr.msk.f32.vlgmr.msra.gmra.mxu0 %vm310_vm0, %v912_v40  ;;  %v269_v62 = vld [vmem:[%s871_s26 + $0xf8] sm:$0xff]  ;;  %v266_v63 = vld [vmem:[%s871_s26 + $0xe0] sm:$0xff]  ;;  %v268_v0 = vld [vmem:[%s871_s26 + $0xf0] sm:$0xff] }
  0x24   : > { %754 = vmatmul.mubr.msk.f32.vlgmr.msra.gmra.mxu1 %vm310_vm0, %v912_v40  ;;  %470 = vmatprep.subr.mxu0 %v307_v41  ;;  %v259_v2 = vld [vmem:[%s871_s26 + $0xa8] sm:$0xff]  ;;  %v261_v3 = vld [vmem:[%s871_s26 + $0xb8] sm:$0xff]  ;;  %v258_v4 = vld [vmem:[%s871_s26 + $0xa0] sm:$0xff] }
  0x25   : > { %541 = vmatprep.subr.mxu1 %v309_v42  ;;  %471 = vmatpush1.msra.mxu0 %v306_v43  ;;  %v260_v5 = vld [vmem:[%s871_s26 + $0xb0] sm:$0xff]  ;;  %v251_v6 = vld [vmem:[%s871_s26 + $0x68] sm:$0xff]  ;;  %v253_v7 = vld [vmem:[%s871_s26 + $0x78] sm:$0xff] }
  0x26   : > { %542 = vmatpush1.msra.mxu1 %v308_v44  ;;  %472 = vmatprep.subr.mxu0 %v299_v45  ;;  %v250_v8 = vld [vmem:[%s871_s26 + $0x60] sm:$0xff]  ;;  %v252_v9 = vld [vmem:[%s871_s26 + $0x70] sm:$0xff]  ;;  %v243_v10 = vld [vmem:[%s871_s26 + $0x28] sm:$0xff] }
  0x27   : > { %543 = vmatprep.subr.mxu1 %v301_v46  ;;  %473 = vmatpush1.msra.mxu0 %v298_v47  ;;  %v245_v11 = vld [vmem:[%s871_s26 + $0x38] sm:$0xff]  ;;  %v242_v12 = vld [vmem:[%s871_s26 + $0x20] sm:$0xff]  ;;  %v244_v13 = vld [vmem:[%s871_s26 + $0x30] sm:$0xff] }
  0x28   : > { %544 = vmatpush1.msra.mxu1 %v300_v48  ;;  %474 = vmatprep.subr.mxu0 %v291_v49 }
  0x29   : > { %545 = vmatprep.subr.mxu1 %v293_v50  ;;  %475 = vmatpush1.msra.mxu0 %v290_v51 }
  0x2a   : > { %546 = vmatpush1.msra.mxu1 %v292_v52  ;;  %476 = vmatprep.subr.mxu0 %v283_v53 }
  0x2b   : > { %547 = vmatprep.subr.mxu1 %v285_v54  ;;  %477 = vmatpush1.msra.mxu0 %v282_v55 }
  0x2c   : > { %548 = vmatpush1.msra.mxu1 %v284_v56  ;;  %478 = vmatprep.subr.mxu0 %v275_v57 }
  0x2d   : > { %549 = vmatprep.subr.mxu1 %v277_v58  ;;  %479 = vmatpush1.msra.mxu0 %v274_v59 }
  0x2e   : > { %550 = vmatpush1.msra.mxu1 %v276_v60  ;;  %480 = vmatprep.subr.mxu0 %v267_v61 }
  0x2f   : > { %551 = vmatprep.subr.mxu1 %v269_v62  ;;  %481 = vmatpush1.msra.mxu0 %v266_v63 }
  0x30   : > { %552 = vmatpush1.msra.mxu1 %v268_v0  ;;  %482 = vmatprep.subr.mxu0 %v259_v2 }
  0x31   : > { %553 = vmatprep.subr.mxu1 %v261_v3  ;;  %483 = vmatpush1.msra.mxu0 %v258_v4 }
  0x32   : > { %554 = vmatpush1.msra.mxu1 %v260_v5  ;;  %484 = vmatprep.subr.mxu0 %v251_v6 }
  0x33   : > { %555 = vmatprep.subr.mxu1 %v253_v7  ;;  %485 = vmatpush1.msra.mxu0 %v250_v8 }
  0x34   : > { %556 = vmatpush1.msra.mxu1 %v252_v9  ;;  %486 = vmatprep.subr.mxu0 %v243_v10 }
  0x35   : > { %557 = vmatprep.subr.mxu1 %v245_v11  ;;  %487 = vmatpush1.msra.mxu0 %v242_v12 }
  0x36   : > { %520 = vmatprep.mubr.f32.mxu0 %v812_v1  ;;  %558 = vmatpush1.msra.mxu1 %v244_v13 }
  0x37   : > { %591 = vmatprep.mubr.f32.mxu1 %v812_v1  ;;  %755 = vmatmul.mubr.msk.f32.vlgmr.msra.gmra.mxu0 %vm310_vm0, %v912_v40 }
  0x38   : > { %756 = vmatmul.mubr.msk.f32.vlgmr.msra.gmra.mxu1 %vm310_vm0, %v912_v40 }
  0x8a   : > { %v602_v14 = vpop.permute.xlu0 %601 }
  0x8e   : > { %v616_v15 = vpop.permute.xlu0 %615 }
  0xe3   : > { %v380_v16 = vpop.f32.mrf.mxu0 }
  0xe4   : > { %v451_v17 = vpop.f32.mrf.mxu1  ;;  %v604_v18 = vmul.f32 %v602_v14, %v380_v16 }
  0xe5   : > { %v606_v19 = vmul.f32 %v602_v14, %v451_v17  ;;  %v382_v20 = vpop.f32.mrf.mxu0 }
  0xe6   : > { %v453_v21 = vpop.f32.mrf.mxu1  ;;  %v618_v22 = vadd.f32 %v616_v15, %v604_v18  ;;  %v605_v24 = vmul.f32 %v602_v14, %v382_v20 }
  0xe7   : > { %v620_v23 = vadd.f32 %v616_v15, %v606_v19  ;;  %v607_v25 = vmul.f32 %v602_v14, %v453_v21 }
  0xe8   : > { %vm626_vm1 = vcmp.gt.f32.partialorder %v618_v22, 0.0  ;;  %v634_v1 = vmul.f32 0.25, %v618_v22  ;;  %v619_v27 = vadd.f32 %v616_v15, %v605_v24 }
  0xe9   : > { %vm628_vm2 = vcmp.gt.f32.partialorder %v620_v23, 0.0  ;;  %v636_v26 = vmul.f32 0.25, %v620_v23  ;;  %v621_v28 = vadd.f32 %v616_v15, %v607_v25 }
  0xea   : > { %v642_v29 = vsel %vm626_vm1, %v618_v22, %v634_v1  ;;  %vm627_vm3 = vcmp.gt.f32.partialorder %v619_v27, 0.0  ;;  %v635_v31 = vmul.f32 0.25, %v619_v27 }
  0xeb   : > { %v644_v30 = vsel %vm628_vm2, %v620_v23, %v636_v26  ;;  %650 = vst [vmem:[%s964_s6] sm:$0xff] %v642_v29  ;;  %vm629_vm4 = vcmp.gt.f32.partialorder %v621_v28, 0.0  ;;  %v637_v32 = vmul.f32 0.25, %v621_v28 }
  0xec   : > { %652 = vst [vmem:[%s964_s6 + $0x10] sm:$0xff] %v644_v30  ;;  %v643_v33 = vsel %vm627_vm3, %v619_v27, %v635_v31 }
  0xed   : > { %v645_v34 = vsel %vm629_vm4, %v621_v28, %v637_v32  ;;  %651 = vst [vmem:[%s964_s6 + $0x8] sm:$0xff] %v643_v33 }
  0xee   : > { %653 = vst [vmem:[%s964_s6 + $0x18] sm:$0xff] %v645_v34 }
  0xf7   : > { %v522_v35 = vpop.f32.mrf.mxu0 }
  0xf8   : > { %v593_v36 = vpop.f32.mrf.mxu1  ;;  %v608_v37 = vmul.f32 %v602_v14, %v522_v35 }
  0xf9   : > { %v610_v38 = vmul.f32 %v602_v14, %v593_v36  ;;  %v524_v39 = vpop.f32.mrf.mxu0 }
  0xfa   : > { %v595_v40 = vpop.f32.mrf.mxu1  ;;  %v622_v41 = vadd.f32 %v616_v15, %v608_v37  ;;  %v609_v43 = vmul.f32 %v602_v14, %v524_v39 }
  0xfb   : > { %v624_v42 = vadd.f32 %v616_v15, %v610_v38  ;;  %v611_v44 = vmul.f32 %v602_v14, %v595_v40 }
  0xfc   : > { %vm630_vm5 = vcmp.gt.f32.partialorder %v622_v41, 0.0  ;;  %v638_v45 = vmul.f32 0.25, %v622_v41  ;;  %v623_v47 = vadd.f32 %v616_v15, %v609_v43 }
  0xfd   : > { %vm632_vm6 = vcmp.gt.f32.partialorder %v624_v42, 0.0  ;;  %v640_v46 = vmul.f32 0.25, %v624_v42  ;;  %v625_v48 = vadd.f32 %v616_v15, %v611_v44 }
  0xfe   : > { %v646_v49 = vsel %vm630_vm5, %v622_v41, %v638_v45  ;;  %vm631_vm7 = vcmp.gt.f32.partialorder %v623_v47, 0.0  ;;  %v639_v51 = vmul.f32 0.25, %v623_v47 }
  0xff   : > { %v648_v50 = vsel %vm632_vm6, %v624_v42, %v640_v46  ;;  %654 = vst [vmem:[%s964_s6 + $0x20] sm:$0xff] %v646_v49  ;;  %vm633_vm8 = vcmp.gt.f32.partialorder %v625_v48, 0.0  ;;  %v641_v52 = vmul.f32 0.25, %v625_v48 }
 0x100   : > { %656 = vst [vmem:[%s964_s6 + $0x30] sm:$0xff] %v648_v50  ;;  %v647_v53 = vsel %vm631_vm7, %v623_v47, %v639_v51 }
 0x101   : > { %v649_v54 = vsel %vm633_vm8, %v625_v48, %v641_v52  ;;  %655 = vst [vmem:[%s964_s6 + $0x28] sm:$0xff] %v647_v53 }
 0x102   : > { %657 = vst [vmem:[%s964_s6 + $0x38] sm:$0xff] %v649_v54 }
 0x103 PF: > { %s14_s17 = sadd.s32 1, %s810_s17   ;;  %s988_s15 = smov %s806_s16 }
 0x104   : > { %p11_p5 = scmp.ge.s32.totalorder %s14_s17, 4   ;;  %s989_s16 = smov %s991_s18 }
 0x106   :  { %13 = sbr.rel (!%p11_p5) target bundleno = 2 (0x2), region = 66 }

// kernel: up_block_forward.8
= control target key start
LH: loop header
LB: loop body
LE: loop exit
PB: predicated region body
PF: predicated region fallthrough
CT: control target
= control target key end

     0   :  { %s815_s15 = smov 0   ;;  %s817_s16 = smov 0   ;;  %s949_s0 = inlined_call_operand.vmem [shape: f32[2,72,1024], index: 0, kind: input, shape index: {}]   ;;  %s950_s1 = inlined_call_operand.vmem [shape: f32[8,72], index: 1, kind: input, shape index: {}]   ;;  %s951_s2 = inlined_call_operand.vmem [shape: f32[8,1], index: 2, kind: input, shape index: {}]   ;;  %s952_s3 = inlined_call_operand.vmem [shape: f32[8,1], index: 3, kind: input, shape index: {}]   ;;  %s953_s4 = inlined_call_operand.vmem [shape: f32[2,8,1024], index: 4, kind: output, shape index: {}]  }
   0x1   :  { %s819_s17 = smov 0  }
   0x2 LB: > { %s26_s18 = sadd.s32 1, %s782_s16  ;;  %p725_p0 = scmp.ge.s32.totalorder %s786_s17, 1  ;;  %s786_s17 = sphi %s819_s17, %s14_s17   ;;  %s782_s16 = sphi %s817_s16, %s955_s16   ;;  %s778_s15 = sphi %s815_s15, %s954_s15  }
   0x3   : > { %p28_p1 = scmp.ge.s32.totalorder %s26_s18, 2  ;;  %p183_p2 = scmp.lt.s32.totalorder %s786_s17, 3 }
   0x5   : > { %s957_s18 = smov (%p28_p1, %s26_s18), 0  ;;  %p184_p3 = pnand %p725_p0, %p183_p2 }
   0x6   : > { %p218_p4 = scmp.lt.s32.totalorder (!%p184_p3), %s778_s15, 1 }
   0x7   : > { %187 = sbr.rel (%p184_p3) target bundleno = 256 (0x100), region = 36 }
   0xc   : > { %v598_v0 = vld [vmem:[%s951_s2] sm:$0xff]  ;;  %v788_v1 = vmov 0.0   ;;  %s959_s15 = smov (!%p218_p4, %s778_s15), 1  ;;  %v789_v2 = vmov 0   ;;  %vm310_vm0 = vcmask 588800  }
   0xd   : > { %378 = vmatprep.mubr.f32.mxu0 %v788_v1  ;;  %449 = vmatprep.mubr.f32.mxu1 %v788_v1  ;;  %s736_s21 = smul.u32 576, %s959_s15  ;;  %v612_v3 = vld [vmem:[%s952_s3] sm:$0xff]  ;;  %s735_s29 = sshll.u32 %s959_s15, 6 }
   0xe   : > { %763 = vset.pattern.permute.xlu0 %v789_v2  ;;  %v888_v40 = vld [vmem:[%s950_s1] sm:$0xff]  ;;  %s235_s6 = scalar_lea.vmem %s953_s4, %s735_s29 }
   0xf   : > { %601 = vperm.xlu0 %763, %v598_v0   ;;  %s847_s26 = scalar_lea.vmem %s949_s0, %s736_s21 }
  0x10   : > { %v303_v4 = vld [vmem:[%s847_s26 + $0x208] sm:$0xff]  ;;  %v305_v5 = vld [vmem:[%s847_s26 + $0x218] sm:$0xff]  ;;  %v302_v6 = vld [vmem:[%s847_s26 + $0x200] sm:$0xff] }
  0x11   : > { %328 = vmatprep.subr.mxu0 %v303_v4  ;;  %399 = vmatprep.subr.mxu1 %v305_v5  ;;  %v304_v7 = vld [vmem:[%s847_s26 + $0x210] sm:$0xff]  ;;  %v295_v8 = vld [vmem:[%s847_s26 + $0x1c8] sm:$0xff]  ;;  %v297_v9 = vld [vmem:[%s847_s26 + $0x1d8] sm:$0xff] }
  0x12   : > { %329 = vmatpush1.msra.mxu0 %v302_v6  ;;  %400 = vmatpush1.msra.mxu1 %v304_v7  ;;  %v294_v10 = vld [vmem:[%s847_s26 + $0x1c0] sm:$0xff]  ;;  %v296_v11 = vld [vmem:[%s847_s26 + $0x1d0] sm:$0xff]  ;;  %v287_v12 = vld [vmem:[%s847_s26 + $0x188] sm:$0xff] }
  0x13   : > { %615 = vperm.xlu0 %763, %v612_v3   ;;  %330 = vmatprep.subr.mxu0 %v295_v8  ;;  %v289_v13 = vld [vmem:[%s847_s26 + $0x198] sm:$0xff]  ;;  %v286_v14 = vld [vmem:[%s847_s26 + $0x180] sm:$0xff]  ;;  %v288_v15 = vld [vmem:[%s847_s26 + $0x190] sm:$0xff] }
  0x14   : > { %401 = vmatprep.subr.mxu1 %v297_v9  ;;  %331 = vmatpush1.msra.mxu0 %v294_v10  ;;  %v279_v16 = vld [vmem:[%s847_s26 + $0x148] sm:$0xff]  ;;  %v281_v17 = vld [vmem:[%s847_s26 + $0x158] sm:$0xff]  ;;  %v278_v18 = vld [vmem:[%s847_s26 + $0x140] sm:$0xff] }
  0x15   : > { %402 = vmatpush1.msra.mxu1 %v296_v11  ;;  %332 = vmatprep.subr.mxu0 %v287_v12  ;;  %v280_v19 = vld [vmem:[%s847_s26 + $0x150] sm:$0xff]  ;;  %v271_v20 = vld [vmem:[%s847_s26 + $0x108] sm:$0xff]  ;;  %v273_v21 = vld [vmem:[%s847_s26 + $0x118] sm:$0xff] }
  0x16   : > { %403 = vmatprep.subr.mxu1 %v289_v13  ;;  %333 = vmatpush1.msra.mxu0 %v286_v14  ;;  %v270_v22 = vld [vmem:[%s847_s26 + $0x100] sm:$0xff]  ;;  %v272_v23 = vld [vmem:[%s847_s26 + $0x110] sm:$0xff]  ;;  %v263_v24 = vld [vmem:[%s847_s26 + $0xc8] sm:$0xff] }
  0x17   : > { %404 = vmatpush1.msra.mxu1 %v288_v15  ;;  %334 = vmatprep.subr.mxu0 %v279_v16  ;;  %v265_v25 = vld [vmem:[%s847_s26 + $0xd8] sm:$0xff]  ;;  %v262_v26 = vld [vmem:[%s847_s26 + $0xc0] sm:$0xff]  ;;  %v264_v27 = vld [vmem:[%s847_s26 + $0xd0] sm:$0xff] }
  0x18   : > { %405 = vmatprep.subr.mxu1 %v281_v17  ;;  %335 = vmatpush1.msra.mxu0 %v278_v18  ;;  %v255_v28 = vld [vmem:[%s847_s26 + $0x88] sm:$0xff]  ;;  %v257_v29 = vld [vmem:[%s847_s26 + $0x98] sm:$0xff]  ;;  %v254_v30 = vld [vmem:[%s847_s26 + $0x80] sm:$0xff] }
  0x19   : > { %406 = vmatpush1.msra.mxu1 %v280_v19  ;;  %336 = vmatprep.subr.mxu0 %v271_v20  ;;  %v256_v31 = vld [vmem:[%s847_s26 + $0x90] sm:$0xff]  ;;  %v247_v32 = vld [vmem:[%s847_s26 + $0x48] sm:$0xff]  ;;  %v249_v33 = vld [vmem:[%s847_s26 + $0x58] sm:$0xff] }
  0x1a   : > { %407 = vmatprep.subr.mxu1 %v273_v21  ;;  %337 = vmatpush1.msra.mxu0 %v270_v22  ;;  %v246_v34 = vld [vmem:[%s847_s26 + $0x40] sm:$0xff]  ;;  %v248_v35 = vld [vmem:[%s847_s26 + $0x50] sm:$0xff]  ;;  %v239_v36 = vld [vmem:[%s847_s26 + $0x8] sm:$0xff] }
  0x1b   : > { %408 = vmatpush1.msra.mxu1 %v272_v23  ;;  %338 = vmatprep.subr.mxu0 %v263_v24  ;;  %v241_v37 = vld [vmem:[%s847_s26 + $0x18] sm:$0xff]  ;;  %v238_v38 = vld [vmem:[%s847_s26] sm:$0xff]  ;;  %v240_v39 = vld [vmem:[%s847_s26 + $0x10] sm:$0xff] }
  0x1c   : > { %409 = vmatprep.subr.mxu1 %v265_v25  ;;  %339 = vmatpush1.msra.mxu0 %v262_v26  ;;  %v307_v41 = vld [vmem:[%s847_s26 + $0x228] sm:$0xff]  ;;  %v309_v42 = vld [vmem:[%s847_s26 + $0x238] sm:$0xff]  ;;  %v306_v43 = vld [vmem:[%s847_s26 + $0x220] sm:$0xff] }
  0x1d   : > { %410 = vmatpush1.msra.mxu1 %v264_v27  ;;  %340 = vmatprep.subr.mxu0 %v255_v28  ;;  %v308_v44 = vld [vmem:[%s847_s26 + $0x230] sm:$0xff]  ;;  %v299_v45 = vld [vmem:[%s847_s26 + $0x1e8] sm:$0xff]  ;;  %v301_v46 = vld [vmem:[%s847_s26 + $0x1f8] sm:$0xff] }
  0x1e   : > { %411 = vmatprep.subr.mxu1 %v257_v29  ;;  %341 = vmatpush1.msra.mxu0 %v254_v30  ;;  %v298_v47 = vld [vmem:[%s847_s26 + $0x1e0] sm:$0xff]  ;;  %v300_v48 = vld [vmem:[%s847_s26 + $0x1f0] sm:$0xff]  ;;  %v291_v49 = vld [vmem:[%s847_s26 + $0x1a8] sm:$0xff] }
  0x1f   : > { %412 = vmatpush1.msra.mxu1 %v256_v31  ;;  %342 = vmatprep.subr.mxu0 %v247_v32  ;;  %v293_v50 = vld [vmem:[%s847_s26 + $0x1b8] sm:$0xff]  ;;  %v290_v51 = vld [vmem:[%s847_s26 + $0x1a0] sm:$0xff]  ;;  %v292_v52 = vld [vmem:[%s847_s26 + $0x1b0] sm:$0xff] }
  0x20   : > { %413 = vmatprep.subr.mxu1 %v249_v33  ;;  %343 = vmatpush1.msra.mxu0 %v246_v34  ;;  %v283_v53 = vld [vmem:[%s847_s26 + $0x168] sm:$0xff]  ;;  %v285_v54 = vld [vmem:[%s847_s26 + $0x178] sm:$0xff]  ;;  %v282_v55 = vld [vmem:[%s847_s26 + $0x160] sm:$0xff] }
  0x21   : > { %414 = vmatpush1.msra.mxu1 %v248_v35  ;;  %344 = vmatprep.subr.mxu0 %v239_v36  ;;  %v284_v56 = vld [vmem:[%s847_s26 + $0x170] sm:$0xff]  ;;  %v275_v57 = vld [vmem:[%s847_s26 + $0x128] sm:$0xff]  ;;  %v277_v58 = vld [vmem:[%s847_s26 + $0x138] sm:$0xff] }
  0x22   : > { %415 = vmatprep.subr.mxu1 %v241_v37  ;;  %345 = vmatpush1.msra.mxu0 %v238_v38  ;;  %v274_v59 = vld [vmem:[%s847_s26 + $0x120] sm:$0xff]  ;;  %v276_v60 = vld [vmem:[%s847_s26 + $0x130] sm:$0xff]  ;;  %v267_v61 = vld [vmem:[%s847_s26 + $0xe8] sm:$0xff] }
  0x23   : > { %416 = vmatpush1.msra.mxu1 %v240_v39  ;;  %729 = vmatmul.mubr.msk.f32.vlgmr.msra.gmra.mxu0 %vm310_vm0, %v888_v40  ;;  %v269_v62 = vld [vmem:[%s847_s26 + $0xf8] sm:$0xff]  ;;  %v266_v63 = vld [vmem:[%s847_s26 + $0xe0] sm:$0xff]  ;;  %v268_v0 = vld [vmem:[%s847_s26 + $0xf0] sm:$0xff] }
  0x24   : > { %730 = vmatmul.mubr.msk.f32.vlgmr.msra.gmra.mxu1 %vm310_vm0, %v888_v40  ;;  %470 = vmatprep.subr.mxu0 %v307_v41  ;;  %v259_v2 = vld [vmem:[%s847_s26 + $0xa8] sm:$0xff]  ;;  %v261_v3 = vld [vmem:[%s847_s26 + $0xb8] sm:$0xff]  ;;  %v258_v4 = vld [vmem:[%s847_s26 + $0xa0] sm:$0xff] }
  0x25   : > { %541 = vmatprep.subr.mxu1 %v309_v42  ;;  %471 = vmatpush1.msra.mxu0 %v306_v43  ;;  %v260_v5 = vld [vmem:[%s847_s26 + $0xb0] sm:$0xff]  ;;  %v251_v6 = vld [vmem:[%s847_s26 + $0x68] sm:$0xff]  ;;  %v253_v7 = vld [vmem:[%s847_s26 + $0x78] sm:$0xff] }
  0x26   : > { %542 = vmatpush1.msra.mxu1 %v308_v44  ;;  %472 = vmatprep.subr.mxu0 %v299_v45  ;;  %v250_v8 = vld [vmem:[%s847_s26 + $0x60] sm:$0xff]  ;;  %v252_v9 = vld [vmem:[%s847_s26 + $0x70] sm:$0xff]  ;;  %v243_v10 = vld [vmem:[%s847_s26 + $0x28] sm:$0xff] }
  0x27   : > { %543 = vmatprep.subr.mxu1 %v301_v46  ;;  %473 = vmatpush1.msra.mxu0 %v298_v47  ;;  %v245_v11 = vld [vmem:[%s847_s26 + $0x38] sm:$0xff]  ;;  %v242_v12 = vld [vmem:[%s847_s26 + $0x20] sm:$0xff]  ;;  %v244_v13 = vld [vmem:[%s847_s26 + $0x30] sm:$0xff] }
  0x28   : > { %544 = vmatpush1.msra.mxu1 %v300_v48  ;;  %474 = vmatprep.subr.mxu0 %v291_v49 }
  0x29   : > { %545 = vmatprep.subr.mxu1 %v293_v50  ;;  %475 = vmatpush1.msra.mxu0 %v290_v51 }
  0x2a   : > { %546 = vmatpush1.msra.mxu1 %v292_v52  ;;  %476 = vmatprep.subr.mxu0 %v283_v53 }
  0x2b   : > { %547 = vmatprep.subr.mxu1 %v285_v54  ;;  %477 = vmatpush1.msra.mxu0 %v282_v55 }
  0x2c   : > { %548 = vmatpush1.msra.mxu1 %v284_v56  ;;  %478 = vmatprep.subr.mxu0 %v275_v57 }
  0x2d   : > { %549 = vmatprep.subr.mxu1 %v277_v58  ;;  %479 = vmatpush1.msra.mxu0 %v274_v59 }
  0x2e   : > { %550 = vmatpush1.msra.mxu1 %v276_v60  ;;  %480 = vmatprep.subr.mxu0 %v267_v61 }
  0x2f   : > { %551 = vmatprep.subr.mxu1 %v269_v62  ;;  %481 = vmatpush1.msra.mxu0 %v266_v63 }
  0x30   : > { %552 = vmatpush1.msra.mxu1 %v268_v0  ;;  %482 = vmatprep.subr.mxu0 %v259_v2 }
  0x31   : > { %553 = vmatprep.subr.mxu1 %v261_v3  ;;  %483 = vmatpush1.msra.mxu0 %v258_v4 }
  0x32   : > { %554 = vmatpush1.msra.mxu1 %v260_v5  ;;  %484 = vmatprep.subr.mxu0 %v251_v6 }
  0x33   : > { %555 = vmatprep.subr.mxu1 %v253_v7  ;;  %485 = vmatpush1.msra.mxu0 %v250_v8 }
  0x34   : > { %556 = vmatpush1.msra.mxu1 %v252_v9  ;;  %486 = vmatprep.subr.mxu0 %v243_v10 }
  0x35   : > { %557 = vmatprep.subr.mxu1 %v245_v11  ;;  %487 = vmatpush1.msra.mxu0 %v242_v12 }
  0x36   : > { %520 = vmatprep.mubr.f32.mxu0 %v788_v1  ;;  %558 = vmatpush1.msra.mxu1 %v244_v13 }
  0x37   : > { %591 = vmatprep.mubr.f32.mxu1 %v788_v1  ;;  %731 = vmatmul.mubr.msk.f32.vlgmr.msra.gmra.mxu0 %vm310_vm0, %v888_v40 }
  0x38   : > { %732 = vmatmul.mubr.msk.f32.vlgmr.msra.gmra.mxu1 %vm310_vm0, %v888_v40 }
  0x8a   : > { %v602_v14 = vpop.permute.xlu0 %601 }
  0x8e   : > { %v616_v15 = vpop.permute.xlu0 %615 }
  0xe3   : > { %v380_v16 = vpop.f32.mrf.mxu0 }
  0xe4   : > { %v451_v17 = vpop.f32.mrf.mxu1  ;;  %v604_v18 = vmul.f32 %v602_v14, %v380_v16 }
  0xe5   : > { %v606_v19 = vmul.f32 %v602_v14, %v451_v17  ;;  %v382_v20 = vpop.f32.mrf.mxu0 }
  0xe6   : > { %v453_v21 = vpop.f32.mrf.mxu1  ;;  %v605_v1 = vmul.f32 %v602_v14, %v382_v20  ;;  %v618_v23 = vadd.f32 %v616_v15, %v604_v18 }
  0xe7   : > { %v607_v22 = vmul.f32 %v602_v14, %v453_v21  ;;  %v620_v24 = vadd.f32 %v616_v15, %v606_v19 }
  0xe8   : > { %v619_v25 = vadd.f32 %v616_v15, %v605_v1  ;;  %626 = vst [vmem:[%s235_s6] sm:$0xff] %v618_v23 }
  0xe9   : > { %v621_v26 = vadd.f32 %v616_v15, %v607_v22  ;;  %628 = vst [vmem:[%s235_s6 + $0x10] sm:$0xff] %v620_v24 }
  0xea   : > { %627 = vst [vmem:[%s235_s6 + $0x8] sm:$0xff] %v619_v25 }
  0xeb   : > { %629 = vst [vmem:[%s235_s6 + $0x18] sm:$0xff] %v621_v26 }
  0xf7   : > { %v522_v27 = vpop.f32.mrf.mxu0 }
  0xf8   : > { %v593_v28 = vpop.f32.mrf.mxu1  ;;  %v608_v29 = vmul.f32 %v602_v14, %v522_v27 }
  0xf9   : > { %v610_v30 = vmul.f32 %v602_v14, %v593_v28  ;;  %v524_v31 = vpop.f32.mrf.mxu0 }
  0xfa   : > { %v595_v32 = vpop.f32.mrf.mxu1  ;;  %v622_v33 = vadd.f32 %v616_v15, %v608_v29  ;;  %v609_v35 = vmul.f32 %v602_v14, %v524_v31 }
  0xfb   : > { %v624_v34 = vadd.f32 %v616_v15, %v610_v30  ;;  %v611_v36 = vmul.f32 %v602_v14, %v595_v32 }
  0xfc   : > { %630 = vst [vmem:[%s235_s6 + $0x20] sm:$0xff] %v622_v33  ;;  %v623_v37 = vadd.f32 %v616_v15, %v609_v35 }
  0xfd   : > { %632 = vst [vmem:[%s235_s6 + $0x30] sm:$0xff] %v624_v34  ;;  %v625_v38 = vadd.f32 %v616_v15, %v611_v36 }
  0xfe   : > { %631 = vst [vmem:[%s235_s6 + $0x28] sm:$0xff] %v623_v37 }
  0xff   : > { %633 = vst [vmem:[%s235_s6 + $0x38] sm:$0xff] %v625_v38 }
 0x100 PF: > { %s14_s17 = sadd.s32 1, %s786_s17   ;;  %s954_s15 = smov %s782_s16 }
 0x101   : > { %p11_p5 = scmp.ge.s32.totalorder %s14_s17, 4   ;;  %s955_s16 = smov %s957_s18 }
 0x103   :  { %13 = sbr.rel (!%p11_p5) target bundleno = 2 (0x2), region = 66 }

// kernel: up_block_forward.9
= control target key start
LH: loop header
LB: loop body
LE: loop exit
PB: predicated region body
PF: predicated region fallthrough
CT: control target
= control target key end

     0   :  { %s893_s19 = smov 0   ;;  %s895_s20 = smov 0   ;;  %s1013_s0 = inlined_call_operand.vmem [shape: f32[2,50,1024], index: 0, kind: input, shape index: {}]   ;;  %s1014_s1 = inlined_call_operand.vmem [shape: f32[1,50], index: 1, kind: input, shape index: {}]   ;;  %s1015_s2 = inlined_call_operand.<no memory space> [shape: f32[1,1], index: 2, kind: input, shape index: {}]   ;;  %s1016_s4 = inlined_call_operand.vmem [shape: f32[2,1,1024], index: 4, kind: output, shape index: {}]   ;;  %s1017_s3 = inlined_call_operand.<no memory space> [shape: f32[1,1], index: 3, kind: input, shape index: {}]  }
   0x1   :  { %v9_v0 = vstv %s1015_s2  ;;  %v11_v1 = vstv %s1017_s3  ;;  %s897_s21 = smov 0  }
   0x2   :  { %10 = vst [vmem:[#allocation2] sm:$0x1] %v9_v0  ;;  %12 = vst [vmem:[#allocation3] sm:$0x1] %v11_v1 }
   0x3 LB: > { %s30_s2 = sadd.s32 1, %s853_s20  ;;  %p789_p0 = scmp.ge.s32.totalorder %s857_s21, 1  ;;  %s857_s21 = sphi %s897_s21, %s18_s21   ;;  %s853_s20 = sphi %s895_s20, %s1019_s20   ;;  %s849_s19 = sphi %s893_s19, %s1018_s19  }
   0x4   : > { %p32_p1 = scmp.ge.s32.totalorder %s30_s2, 2  ;;  %p187_p2 = scmp.lt.s32.totalorder %s857_s21, 3 }
   0x6   : > { %s1021_s2 = smov (%p32_p1, %s30_s2), 0  ;;  %p188_p3 = pnand %p789_p0, %p187_p2 }
   0x7   : > { %p221_p4 = scmp.lt.s32.totalorder (!%p188_p3), %s849_s19, 1 }
   0x8   : > { %191 = sbr.rel (%p188_p3) target bundleno = 259 (0x103), region = 36 }
   0xd   : > { %v859_v2 = vmov 0.0   ;;  %v609_v3 = vld [vmem:[#allocation2] sm:$0x1]  ;;  %s1023_s19 = smov (!%p221_p4, %s849_s19), 1  ;;  %v860_v4 = vmov 0   ;;  %vm300_vm0 = vcmask 1041408   ;;  %v615_v63 = vlaneseq }
   0xe   : > { %389 = vmatprep.mubr.f32.mxu0 %v859_v2  ;;  %460 = vmatprep.mubr.f32.mxu1 %v859_v2  ;;  %s806_s3 = smul.u32 448, %s1023_s19  ;;  %v627_v5 = vld [vmem:[#allocation3] sm:$0x1]  ;;  %v956_v34 = vld [vmem:[%s1014_s1] sm:$0x1]  ;;  %vm296_vm1 = vcmask 408576  }
   0xf   : > { %834 = vset.pattern.permute.xlu0 %v860_v4  ;;  %v616_v0 = vshrl.u32 %v615_v63, 7  ;;  %s791_s27 = sshll.u32 %s1023_s19, 3 }
  0x10   : > { %612 = vperm.xlu0 %834, %v609_v3   ;;  %s919_s24 = scalar_lea.vmem %s1013_s0, %s806_s3  ;;  %s237_s30 = scalar_lea.vmem %s1016_s4, %s791_s27 }
  0x11   : > { %v289_v6 = vld [vmem:[%s919_s24 + $0x188] sm:$0x3]  ;;  %v291_v7 = vld [vmem:[%s919_s24 + $0x198] sm:$0x3]  ;;  %v288_v8 = vld [vmem:[%s919_s24 + $0x180] sm:$0x3] }
  0x12   : > { %792 = vmatprep.subr.msk.mxu0 %vm300_vm0, %v289_v6  ;;  %795 = vmatprep.subr.msk.mxu1 %vm300_vm0, %v291_v7  ;;  %v290_v9 = vld [vmem:[%s919_s24 + $0x190] sm:$0x3]  ;;  %v281_v10 = vld [vmem:[%s919_s24 + $0x148] sm:$0xff]  ;;  %v283_v11 = vld [vmem:[%s919_s24 + $0x158] sm:$0xff]  ;;  %v617_v3 = vsub.s32 0, %v616_v0 }
  0x13   : > { %793 = vmatpush1.msk.msra.mxu0 %vm300_vm0, %v288_v8  ;;  %796 = vmatpush1.msk.msra.mxu1 %vm300_vm0, %v290_v9  ;;  %v280_v12 = vld [vmem:[%s919_s24 + $0x140] sm:$0xff]  ;;  %v282_v13 = vld [vmem:[%s919_s24 + $0x150] sm:$0xff]  ;;  %v273_v14 = vld [vmem:[%s919_s24 + $0x108] sm:$0xff] }
  0x14   : > { %630 = vperm.xlu0 %834, %v627_v5   ;;  %345 = vmatprep.subr.mxu0 %v281_v10  ;;  %v275_v15 = vld [vmem:[%s919_s24 + $0x118] sm:$0xff]  ;;  %v272_v16 = vld [vmem:[%s919_s24 + $0x100] sm:$0xff]  ;;  %v274_v17 = vld [vmem:[%s919_s24 + $0x110] sm:$0xff]  ;;  %v861_v10 = vmov 1966171168  }
  0x15   : > { %416 = vmatprep.subr.mxu1 %v283_v11  ;;  %346 = vmatpush1.msra.mxu0 %v280_v12  ;;  %v265_v18 = vld [vmem:[%s919_s24 + $0xc8] sm:$0xff]  ;;  %v267_v19 = vld [vmem:[%s919_s24 + $0xd8] sm:$0xff]  ;;  %v264_v20 = vld [vmem:[%s919_s24 + $0xc0] sm:$0xff]  ;;  %v658_v11 = vunpack.c.l.s4 %v861_v10 }
  0x16   : > { %417 = vmatpush1.msra.mxu1 %v282_v13  ;;  %347 = vmatprep.subr.mxu0 %v273_v14  ;;  %v266_v21 = vld [vmem:[%s919_s24 + $0xd0] sm:$0xff]  ;;  %v257_v22 = vld [vmem:[%s919_s24 + $0x88] sm:$0xff]  ;;  %v259_v23 = vld [vmem:[%s919_s24 + $0x98] sm:$0xff] }
  0x17   : > { %418 = vmatprep.subr.mxu1 %v275_v15  ;;  %348 = vmatpush1.msra.mxu0 %v272_v16  ;;  %v256_v24 = vld [vmem:[%s919_s24 + $0x80] sm:$0xff]  ;;  %v258_v25 = vld [vmem:[%s919_s24 + $0x90] sm:$0xff]  ;;  %v249_v26 = vld [vmem:[%s919_s24 + $0x48] sm:$0xff]  ;;  %v659_v16 = vunpack.c.0.s8 %v658_v11 }
  0x18   : > { %419 = vmatpush1.msra.mxu1 %v274_v17  ;;  %349 = vmatprep.subr.mxu0 %v265_v18  ;;  %v251_v27 = vld [vmem:[%s919_s24 + $0x58] sm:$0xff]  ;;  %v248_v28 = vld [vmem:[%s919_s24 + $0x40] sm:$0xff]  ;;  %v250_v29 = vld [vmem:[%s919_s24 + $0x50] sm:$0xff] }
  0x19   : > { %420 = vmatprep.subr.mxu1 %v267_v19  ;;  %350 = vmatpush1.msra.mxu0 %v264_v20  ;;  %v241_v30 = vld [vmem:[%s919_s24 + $0x8] sm:$0xff]  ;;  %v243_v31 = vld [vmem:[%s919_s24 + $0x18] sm:$0xff]  ;;  %v240_v32 = vld [vmem:[%s919_s24] sm:$0xff] }
  0x1a   : > { %421 = vmatpush1.msra.mxu1 %v266_v21  ;;  %351 = vmatprep.subr.mxu0 %v257_v22  ;;  %v242_v33 = vld [vmem:[%s919_s24 + $0x10] sm:$0xff]  ;;  %v293_v35 = vld [vmem:[%s919_s24 + $0x1a8] sm:$0x3]  ;;  %v295_v36 = vld [vmem:[%s919_s24 + $0x1b8] sm:$0x3]  ;;  %v662_v21 = vsub.s32 %v659_v16, %v616_v0 }
  0x1b   : > { %422 = vmatprep.subr.mxu1 %v259_v23  ;;  %352 = vmatpush1.msra.mxu0 %v256_v24  ;;  %v292_v37 = vld [vmem:[%s919_s24 + $0x1a0] sm:$0x3]  ;;  %v294_v38 = vld [vmem:[%s919_s24 + $0x1b0] sm:$0x3]  ;;  %v285_v39 = vld [vmem:[%s919_s24 + $0x168] sm:$0xff] }
  0x1c   : > { %423 = vmatpush1.msra.mxu1 %v258_v25  ;;  %353 = vmatprep.subr.mxu0 %v249_v26  ;;  %v287_v40 = vld [vmem:[%s919_s24 + $0x178] sm:$0xff]  ;;  %v284_v41 = vld [vmem:[%s919_s24 + $0x160] sm:$0xff]  ;;  %v286_v42 = vld [vmem:[%s919_s24 + $0x170] sm:$0xff] }
  0x1d   : > { %424 = vmatprep.subr.mxu1 %v251_v27  ;;  %354 = vmatpush1.msra.mxu0 %v248_v28  ;;  %v277_v43 = vld [vmem:[%s919_s24 + $0x128] sm:$0xff]  ;;  %v279_v44 = vld [vmem:[%s919_s24 + $0x138] sm:$0xff]  ;;  %v276_v45 = vld [vmem:[%s919_s24 + $0x120] sm:$0xff] }
  0x1e   : > { %425 = vmatpush1.msra.mxu1 %v250_v29  ;;  %355 = vmatprep.subr.mxu0 %v241_v30  ;;  %v278_v46 = vld [vmem:[%s919_s24 + $0x130] sm:$0xff]  ;;  %v269_v47 = vld [vmem:[%s919_s24 + $0xe8] sm:$0xff]  ;;  %v271_v48 = vld [vmem:[%s919_s24 + $0xf8] sm:$0xff] }
  0x1f   : > { %426 = vmatprep.subr.mxu1 %v243_v31  ;;  %356 = vmatpush1.msra.mxu0 %v240_v32  ;;  %v268_v49 = vld [vmem:[%s919_s24 + $0xe0] sm:$0xff]  ;;  %v270_v50 = vld [vmem:[%s919_s24 + $0xf0] sm:$0xff]  ;;  %v261_v51 = vld [vmem:[%s919_s24 + $0xa8] sm:$0xff] }
  0x20   : > { %427 = vmatpush1.msra.mxu1 %v242_v33  ;;  %794 = vmatmul.mubr.msk.f32.vlgmr.msra.gmra.mxu0 %vm296_vm1, %v956_v34  ;;  %v263_v52 = vld [vmem:[%s919_s24 + $0xb8] sm:$0xff]  ;;  %v260_v53 = vld [vmem:[%s919_s24 + $0xa0] sm:$0xff]  ;;  %v262_v54 = vld [vmem:[%s919_s24 + $0xb0] sm:$0xff] }
  0x21   : > { %797 = vmatmul.mubr.msk.f32.vlgmr.msra.gmra.mxu1 %vm296_vm1, %v956_v34  ;;  %798 = vmatprep.subr.msk.mxu0 %vm300_vm0, %v293_v35  ;;  %v253_v55 = vld [vmem:[%s919_s24 + $0x68] sm:$0xff]  ;;  %v255_v56 = vld [vmem:[%s919_s24 + $0x78] sm:$0xff]  ;;  %v252_v57 = vld [vmem:[%s919_s24 + $0x60] sm:$0xff] }
  0x22   : > { %801 = vmatprep.subr.msk.mxu1 %vm300_vm0, %v295_v36  ;;  %799 = vmatpush1.msk.msra.mxu0 %vm300_vm0, %v292_v37  ;;  %v254_v58 = vld [vmem:[%s919_s24 + $0x70] sm:$0xff]  ;;  %v245_v59 = vld [vmem:[%s919_s24 + $0x28] sm:$0xff]  ;;  %v247_v60 = vld [vmem:[%s919_s24 + $0x38] sm:$0xff] }
  0x23   : > { %802 = vmatpush1.msk.msra.mxu1 %vm300_vm0, %v294_v38  ;;  %487 = vmatprep.subr.mxu0 %v285_v39  ;;  %v244_v61 = vld [vmem:[%s919_s24 + $0x20] sm:$0xff]  ;;  %v246_v62 = vld [vmem:[%s919_s24 + $0x30] sm:$0xff] }
  0x24   : > { %558 = vmatprep.subr.mxu1 %v287_v40  ;;  %488 = vmatpush1.msra.mxu0 %v284_v41 }
  0x25   : > { %559 = vmatpush1.msra.mxu1 %v286_v42  ;;  %489 = vmatprep.subr.mxu0 %v277_v43 }
  0x26   : > { %560 = vmatprep.subr.mxu1 %v279_v44  ;;  %490 = vmatpush1.msra.mxu0 %v276_v45 }
  0x27   : > { %561 = vmatpush1.msra.mxu1 %v278_v46  ;;  %491 = vmatprep.subr.mxu0 %v269_v47 }
  0x28   : > { %562 = vmatprep.subr.mxu1 %v271_v48  ;;  %492 = vmatpush1.msra.mxu0 %v268_v49 }
  0x29   : > { %563 = vmatpush1.msra.mxu1 %v270_v50  ;;  %493 = vmatprep.subr.mxu0 %v261_v51 }
  0x2a   : > { %564 = vmatprep.subr.mxu1 %v263_v52  ;;  %494 = vmatpush1.msra.mxu0 %v260_v53 }
  0x2b   : > { %565 = vmatpush1.msra.mxu1 %v262_v54  ;;  %495 = vmatprep.subr.mxu0 %v253_v55 }
  0x2c   : > { %566 = vmatprep.subr.mxu1 %v255_v56  ;;  %496 = vmatpush1.msra.mxu0 %v252_v57 }
  0x2d   : > { %567 = vmatpush1.msra.mxu1 %v254_v58  ;;  %497 = vmatprep.subr.mxu0 %v245_v59 }
  0x2e   : > { %568 = vmatprep.subr.mxu1 %v247_v60  ;;  %498 = vmatpush1.msra.mxu0 %v244_v61 }
  0x2f   : > { %531 = vmatprep.mubr.f32.mxu0 %v859_v2  ;;  %569 = vmatpush1.msra.mxu1 %v246_v62 }
  0x30   : > { %602 = vmatprep.mubr.f32.mxu1 %v859_v2  ;;  %800 = vmatmul.mubr.msk.f32.vlgmr.msra.gmra.mxu0 %vm296_vm1, %v956_v34 }
  0x31   : > { %803 = vmatmul.mubr.msk.f32.vlgmr.msra.gmra.mxu1 %vm296_vm1, %v956_v34 }
  0x8b   : > { %v613_v1 = vpop.permute.xlu0 %612 }
  0x8c   : > { %v618_v6 = vrot.slane %v613_v1, %v617_v3 }
  0x8f   : > { %v631_v7 = vpop.permute.xlu0 %630 }
  0x90   : > { %v636_v12 = vrot.slane %v631_v7, %v617_v3 }
  0xe0   : > { %v391_v4 = vpop.f32.mrf.mxu0 }
  0xe1   : > { %v462_v5 = vpop.f32.mrf.mxu1  ;;  %v619_v2 = vmul.f32 %v618_v6, %v391_v4 }
  0xe2   : > { %v393_v8 = vpop.f32.mrf.mxu0  ;;  %v621_v13 = vmul.f32 %v618_v6, %v462_v5 }
  0xe3   : > { %v464_v9 = vpop.f32.mrf.mxu1  ;;  %v620_v14 = vmul.f32 %v618_v6, %v393_v8  ;;  %v637_v17 = vadd.f32 %v636_v12, %v619_v2 }
  0xe4   : > { %v622_v15 = vmul.f32 %v618_v6, %v464_v9  ;;  %v639_v19 = vadd.f32 %v636_v12, %v621_v13 }
  0xe5   : > { %v638_v18 = vadd.f32 %v636_v12, %v620_v14 }
  0xe6   : > { %v640_v20 = vadd.f32 %v636_v12, %v622_v15 }
  0xe7   : > { %v653_v22 = vcombine.low %v637_v17, %v638_v18 }
  0xe8   : > { %v654_v23 = vcombine.low %v639_v19, %v640_v20 }
  0xe9   : > { %v663_v32 = vrot.slane %v653_v22, %v662_v21 }
  0xea   : > { %v670_v33 = vrot.slane %v654_v23, %v662_v21 }
  0xec   : > { %v685_v40 = vcombine.low %v663_v32, %v670_v33 }
  0xee   : > { %v693_v44 = vrot.slane %v685_v40, %v662_v21 }
  0xf0   : > { %v533_v24 = vpop.f32.mrf.mxu0 }
  0xf1   : > { %v604_v25 = vpop.f32.mrf.mxu1  ;;  %v623_v26 = vmul.f32 %v618_v6, %v533_v24 }
  0xf2   : > { %v625_v27 = vmul.f32 %v618_v6, %v604_v25  ;;  %v535_v28 = vpop.f32.mrf.mxu0 }
  0xf3   : > { %v606_v29 = vpop.f32.mrf.mxu1  ;;  %v624_v30 = vmul.f32 %v618_v6, %v535_v28  ;;  %v641_v34 = vadd.f32 %v636_v12, %v623_v26 }
  0xf4   : > { %v626_v31 = vmul.f32 %v618_v6, %v606_v29  ;;  %v643_v35 = vadd.f32 %v636_v12, %v625_v27 }
  0xf5   : > { %v642_v36 = vadd.f32 %v636_v12, %v624_v30 }
  0xf6   : > { %v644_v37 = vadd.f32 %v636_v12, %v626_v31 }
  0xf7   : > { %v655_v38 = vcombine.low %v641_v34, %v642_v36 }
  0xf8   : > { %v656_v39 = vcombine.low %v643_v35, %v644_v37 }
  0xf9   : > { %v677_v41 = vrot.slane %v655_v38, %v662_v21 }
  0xfa   : > { %v684_v42 = vrot.slane %v656_v39, %v662_v21 }
  0xfc   : > { %v686_v43 = vcombine.low %v677_v41, %v684_v42 }
  0xfe   : > { %v700_v45 = vrot.slane %v686_v43, %v662_v21 }
 0x100   : > { %v701_v46 = vcombine.low %v693_v44, %v700_v45 }
 0x102   : > { %703 = vst [vmem:[%s237_s30] sm:$0xff] %v701_v46 }
 0x103 PF: > { %s18_s21 = sadd.s32 1, %s857_s21   ;;  %s1018_s19 = smov %s853_s20 }
 0x104   : > { %p15_p5 = scmp.ge.s32.totalorder %s18_s21, 4   ;;  %s1019_s20 = smov %s1021_s2 }
 0x106   :  { %17 = sbr.rel (!%p15_p5) target bundleno = 3 (0x3), region = 66 }

// kernel: tile.8
= control target key start
LH: loop header
LB: loop body
LE: loop exit
PB: predicated region body
PF: predicated region fallthrough
CT: control target
= control target key end

     0   :  { %s22_s0 = inlined_call_operand.vmem [shape: f32[8], index: 0, kind: input, shape index: {}]   ;;  %s23_s1 = inlined_call_operand.vmem [shape: f32[4,8], index: 1, kind: output, shape index: {}]  }
   0x1   :  { %v4_v0 = vld [vmem:[%s22_s0] ss:$0 sm:$0xff] }
   0x2   :  { %5 = vst [vmem:[%s23_s1] sm:$0xf] %v4_v0 }

// kernel: tile.0
= control target key start
LH: loop header
LB: loop body
LE: loop exit
PB: predicated region body
PF: predicated region fallthrough
CT: control target
= control target key end

     0   :  { %s67_s8 = smov 125   ;;  %vm8_vm0 = vcmask 7168   ;;  %s68_s11 = smov 126   ;;  %s118_s0 = inlined_call_operand.vmem [shape: f32[4,8], index: 0, kind: input, shape index: {}]   ;;  %s119_s1 = inlined_call_operand.vmem [shape: f32[32,1], index: 1, kind: output, shape index: {}]  }
   0x1   :  { %v5_v0 = vld [vmem:[%s118_s0] sm:$0xf]  ;;  %s66_s0 = smov 127   ;;  %s69_s12 = smov 124  }
   0x2   :  { %6 = vst [vmem:[#allocation0] sm:$0xf] %v5_v0  ;;  %s70_s13 = smov 123   ;;  %s71_s14 = smov 122  }
   0x3   :  { %s72_s15 = smov 121  }
   0x9   :  { %v10_v1 = vld [vmem:[#allocation0] sm:$0xf]  }
   0xa   :  { %v22_v2 = vld [vmem:[#allocation0] sm:$0xf]   ;;  %11 = vrot.lane.b32.xlu0 %v10_v1, %s66_s0 }
   0xb   :  { %23 = vrot.lane.b32.xlu1 %v22_v2, %s67_s8  ;;  %v16_v3 = vld [vmem:[#allocation0] sm:$0xf]  }
   0xc   :  { %v28_v4 = vld [vmem:[#allocation0] sm:$0xf]  }
   0xd   :  { %v7_v5 = vld [vmem:[#allocation0] sm:$0xf]  }
   0xe   :  { %9 = vst.msk [vmem:[%s119_s1] ss:$8 sm:$0xf] %vm8_vm0, %v7_v5   ;;  %17 = vrot.lane.b32.xlu0 %v16_v3, %s68_s11  ;;  %v34_v6 = vld [vmem:[#allocation0] sm:$0xf]  }
   0xf   :  { %29 = vrot.lane.b32.xlu1 %v28_v4, %s69_s12  ;;  %v40_v7 = vld [vmem:[#allocation0] sm:$0xf]  }
  0x10   :  { %v46_v8 = vld [vmem:[#allocation0] sm:$0xf]  }
  0x12   :  { %35 = vrot.lane.b32.xlu0 %v34_v6, %s70_s13 }
  0x13   :  { %41 = vrot.lane.b32.xlu1 %v40_v7, %s71_s14 }
  0x16   :  { %47 = vrot.lane.b32.xlu0 %v46_v8, %s72_s15 }
  0x7c   :  { %v12_v9 = vpop.permute.xlu0 %11  }
  0x7d   :  { %v24_v10 = vpop.permute.xlu1 %23   ;;  %52 = vst.msk [vmem:[%s119_s1 + $0x1] ss:$8 sm:$0xf] %vm8_vm0, %v12_v9  }
  0x7e   :  { %54 = vst.msk [vmem:[%s119_s1 + $0x3] ss:$8 sm:$0xf] %vm8_vm0, %v24_v10  }
  0x80   :  { %v18_v11 = vpop.permute.xlu0 %17  }
  0x81   :  { %v30_v12 = vpop.permute.xlu1 %29   ;;  %53 = vst.msk [vmem:[%s119_s1 + $0x2] ss:$8 sm:$0xf] %vm8_vm0, %v18_v11  }
  0x82   :  { %55 = vst.msk [vmem:[%s119_s1 + $0x4] ss:$8 sm:$0xf] %vm8_vm0, %v30_v12  }
  0x84   :  { %v36_v13 = vpop.permute.xlu0 %35  }
  0x85   :  { %v42_v14 = vpop.permute.xlu1 %41   ;;  %56 = vst.msk [vmem:[%s119_s1 + $0x5] ss:$8 sm:$0xf] %vm8_vm0, %v36_v13  }
  0x86   :  { %57 = vst.msk [vmem:[%s119_s1 + $0x6] ss:$8 sm:$0xf] %vm8_vm0, %v42_v14  }
  0x88   :  { %v48_v15 = vpop.permute.xlu0 %47  }
  0x89   :  { %58 = vst.msk [vmem:[%s119_s1 + $0x7] ss:$8 sm:$0xf] %vm8_vm0, %v48_v15  }

// kernel: up_block_forward.10
= control target key start
LH: loop header
LB: loop body
LE: loop exit
PB: predicated region body
PF: predicated region fallthrough
CT: control target
= control target key end

     0   :  { %s1307_s21 = smov 0   ;;  %s1309_s22 = smov 0   ;;  %s1396_s0 = inlined_call_operand.vmem [shape: f32[2,8,1024], index: 0, kind: input, shape index: {}]   ;;  %s1397_s1 = inlined_call_operand.vmem [shape: f32[2,1,1024], index: 1, kind: input, shape index: {}]   ;;  %s1398_s2 = inlined_call_operand.vmem [shape: f32[2,8,1], index: 2, kind: input, shape index: {}]   ;;  %s1399_s3 = inlined_call_operand.vmem [shape: f32[2,8,1024], index: 3, kind: input, shape index: {}]   ;;  %s1400_s4 = inlined_call_operand.vmem [shape: f32[8,8], index: 4, kind: input, shape index: {}]   ;;  %s1401_s5 = inlined_call_operand.vmem [shape: f32[8,8], index: 5, kind: input, shape index: {}]   ;;  %s1402_s6 = inlined_call_operand.vmem [shape: f32[2,8,1024], index: 6, kind: output, shape index: {}]  }
   0x1   :  { %s1311_s23 = smov 0  }
   0x2 LB: > { %s28_s24 = sadd.s32 1, %s1264_s22  ;;  %p1192_p0 = scmp.ge.s32.totalorder %s1268_s23, 1  ;;  %s1268_s23 = sphi %s1311_s23, %s16_s23   ;;  %s1264_s22 = sphi %s1309_s22, %s1404_s22   ;;  %s1260_s21 = sphi %s1307_s21, %s1403_s21  }
   0x3   : > { %p30_p1 = scmp.ge.s32.totalorder %s28_s24, 2  ;;  %p275_p2 = scmp.lt.s32.totalorder %s1268_s23, 3 }
   0x5   : > { %s1406_s24 = smov (%p30_p1, %s28_s24), 0  ;;  %p276_p3 = pnand %p1192_p0, %p275_p2 }
   0x6   : > { %p335_p4 = scmp.lt.s32.totalorder (!%p276_p3), %s1260_s21, 1 }
   0x7   : > { %279 = sbr.rel (%p276_p3) target bundleno = 356 (0x164), region = 44 }
   0xc   : > { %v1270_v0 = vmov 0   ;;  %s1408_s21 = smov (!%p335_p4, %s1260_s21), 1  ;;  %v1271_v2 = vmov 0.0   ;;  %v393_v7 = vlaneseq  ;;  %v456_v47 = vld [vmem:[%s1401_s5] sm:$0xff]  ;;  %vm457_vm0 = vcmask 64512  }
   0xd   : > { %1241 = vset.pattern.permute.xlu0 %v1270_v0  ;;  %s1195_s25 = sshll.u32 %s1408_s21, 3  ;;  %525 = vmatprep.mubr.f32.mxu0 %v1271_v2  ;;  %s1333_s8 = sshll.u32 %s1408_s21, 6  ;;  %v455_v52 = vld [vmem:[%s1400_s4] sm:$0xff] }
   0xe   : > { %s356_s28 = scalar_lea.vmem %s1398_s2, %s1195_s25  ;;  %s351_s7 = scalar_lea.vmem %s1397_s1, %s1195_s25  ;;  %596 = vmatprep.mubr.f32.mxu1 %v1271_v2  ;;  %v394_v8 = vshrl.u32 %v393_v7, 7 }
   0xf   : > { %v441_v1 = vld [vmem:[%s356_s28] sm:$0xff]  ;;  %s342_s11 = scalar_lea.vmem %s1396_s0, %s1333_s8  ;;  %s1363_s18 = scalar_lea.vmem %s1399_s3, %s1333_s8 }
  0x10   : > { %444 = vperm.xlu0 %1241, %v441_v1   ;;  %v385_v3 = vld [vmem:[%s351_s7] sm:$0xff]  ;;  %v399_v9 = vsub.s32 1, %v394_v8  ;;  %v407_v10 = vsub.s32 3, %v394_v8  ;;  %v395_v11 = vsub.s32 0, %v394_v8  ;;  %v403_v12 = vsub.s32 2, %v394_v8  ;;  %v378_v18 = vld [vmem:[%s342_s11 + $0x8] sm:$0xff]  ;;  %s1371_s21 = scalar_lea.vmem %s1402_s6, %s1333_s8 }
  0x11   : > { %v1201_v4 = vmul.f32 -1.442695, %v385_v3  ;;  %v415_v13 = vsub.s32 5, %v394_v8  ;;  %v423_v14 = vsub.s32 7, %v394_v8  ;;  %v411_v15 = vsub.s32 4, %v394_v8  ;;  %v380_v20 = vld [vmem:[%s342_s11 + $0x18] sm:$0xff] }
  0x12   : > { %v419_v16 = vsub.s32 6, %v394_v8  ;;  %v377_v24 = vld [vmem:[%s342_s11] sm:$0xff]  ;;  %v379_v25 = vld [vmem:[%s342_s11 + $0x10] sm:$0xff]  ;;  %v382_v26 = vld [vmem:[%s342_s11 + $0x28] sm:$0xff] }
  0x13   : > { %1242 = vpow2.f32 %v1201_v4  ;;  %v384_v35 = vld [vmem:[%s342_s11 + $0x38] sm:$0xff]  ;;  %v381_v36 = vld [vmem:[%s342_s11 + $0x20] sm:$0xff]  ;;  %v383_v37 = vld [vmem:[%s342_s11 + $0x30] sm:$0xff] }
  0x14   : > { %v1032_v62 = vld [vmem:[%s1363_s18] sm:$0xff]  ;;  %v1034_v0 = vld [vmem:[%s1363_s18 + $0x10] sm:$0xff]  ;;  %v1033_v4 = vld [vmem:[%s1363_s18 + $0x8] sm:$0xff] }
  0x20   : > { %v1243_v5 = vpop.eup %1242 }
  0x21   : > { %v389_v6 = vadd.f32 1.0, %v1243_v5 }
  0x23   : > { %1244 = vrcp.f32 %v389_v6  ;;  %v1035_v6 = vld [vmem:[%s1363_s18 + $0x18] sm:$0xff] }
  0x30   : > { %v1245_v17 = vpop.eup %1244 }
  0x31   : > { %v400_v19 = vrot.slane %v1245_v17, %v399_v9  ;;  %v408_v21 = vrot.slane %v1245_v17, %v407_v10  ;;  %v396_v22 = vrot.slane %v1245_v17, %v395_v11  ;;  %v404_v23 = vrot.slane %v1245_v17, %v403_v12  ;;  %v1036_v12 = vld [vmem:[%s1363_s18 + $0x20] sm:$0xff] }
  0x32   : > { %v416_v27 = vrot.slane %v1245_v17, %v415_v13  ;;  %v424_v28 = vrot.slane %v1245_v17, %v423_v14  ;;  %v412_v29 = vrot.slane %v1245_v17, %v411_v15  ;;  %v420_v30 = vrot.slane %v1245_v17, %v419_v16  ;;  %v1038_v14 = vld [vmem:[%s1363_s18 + $0x30] sm:$0xff] }
  0x33   : > { %v434_v31 = vmul.f32 %v400_v19, %v378_v18  ;;  %v436_v32 = vmul.f32 %v408_v21, %v380_v20  ;;  %v433_v33 = vmul.f32 %v396_v22, %v377_v24  ;;  %v435_v34 = vmul.f32 %v404_v23, %v379_v25  ;;  %v1039_v22 = vld [vmem:[%s1363_s18 + $0x38] sm:$0xff] }
  0x34   : > { %v438_v38 = vmul.f32 %v416_v27, %v382_v26  ;;  %v440_v39 = vmul.f32 %v424_v28, %v384_v35  ;;  %v437_v40 = vmul.f32 %v412_v29, %v381_v36  ;;  %v439_v41 = vmul.f32 %v420_v30, %v383_v37 }
  0x8b   : > { %v445_v42 = vpop.permute.xlu0 %444 }
  0x8c   : > { %v448_v43 = vmul.f32 %v445_v42, %v378_v18  ;;  %v450_v44 = vmul.f32 %v445_v42, %v380_v20  ;;  %v447_v45 = vmul.f32 %v445_v42, %v377_v24  ;;  %v449_v46 = vmul.f32 %v445_v42, %v379_v25  ;;  %v1037_v20 = vld [vmem:[%s1363_s18 + $0x28] sm:$0xff] }
  0x8d   : > { %v452_v48 = vmul.f32 %v445_v42, %v382_v26  ;;  %v454_v49 = vmul.f32 %v445_v42, %v384_v35  ;;  %v451_v50 = vmul.f32 %v445_v42, %v381_v36  ;;  %v453_v51 = vmul.f32 %v445_v42, %v383_v37 }
  0x8e   : > { %491 = vmatprep.subr.mxu0 %v448_v43  ;;  %562 = vmatprep.subr.mxu1 %v450_v44 }
  0x8f   : > { %492 = vmatpush1.msra.mxu0 %v447_v45  ;;  %563 = vmatpush1.msra.mxu1 %v449_v46 }
  0x90   : > { %1202 = vmatmul.mubr.msk.f32.vlgmr.msra.gmra.mxu0 %vm457_vm0, %v456_v47  ;;  %1203 = vmatmul.mubr.msk.f32.vlgmr.msra.gmra.mxu1 %vm457_vm0, %v456_v47 }
  0x91   : > { %633 = vmatprep.subr.mxu0 %v452_v48  ;;  %704 = vmatprep.subr.mxu1 %v454_v49 }
  0x92   : > { %634 = vmatpush1.msra.mxu0 %v451_v50  ;;  %705 = vmatpush1.msra.mxu1 %v453_v51 }
  0x93   : > { %667 = vmatprep.mubr.f32.mxu0 %v1271_v2  ;;  %738 = vmatprep.mubr.f32.mxu1 %v1271_v2 }
  0x94   : > { %1204 = vmatmul.mubr.msk.f32.vlgmr.msra.gmra.mxu0 %vm457_vm0, %v456_v47  ;;  %1205 = vmatmul.mubr.msk.f32.vlgmr.msra.gmra.mxu1 %vm457_vm0, %v456_v47 }
  0x95   : > { %778 = vmatprep.subr.mxu0 %v434_v31  ;;  %849 = vmatprep.subr.mxu1 %v436_v32 }
  0x96   : > { %779 = vmatpush1.msra.mxu0 %v433_v33  ;;  %850 = vmatpush1.msra.mxu1 %v435_v34 }
  0x97   : > { %812 = vmatprep.mubr.f32.mxu0 %v1271_v2  ;;  %883 = vmatprep.mubr.f32.mxu1 %v1271_v2 }
  0x98   : > { %1206 = vmatmul.mubr.msk.f32.vlgmr.msra.gmra.mxu0 %vm457_vm0, %v455_v52  ;;  %1207 = vmatmul.mubr.msk.f32.vlgmr.msra.gmra.mxu1 %vm457_vm0, %v455_v52 }
  0x99   : > { %920 = vmatprep.subr.mxu0 %v438_v38  ;;  %991 = vmatprep.subr.mxu1 %v440_v39 }
  0x9a   : > { %921 = vmatpush1.msra.mxu0 %v437_v40  ;;  %992 = vmatpush1.msra.mxu1 %v439_v41 }
  0x9b   : > { %954 = vmatprep.mubr.f32.mxu0 %v1271_v2  ;;  %1025 = vmatprep.mubr.f32.mxu1 %v1271_v2 }
  0x9c   : > { %1208 = vmatmul.mubr.msk.f32.vlgmr.msra.gmra.mxu0 %vm457_vm0, %v455_v52  ;;  %1209 = vmatmul.mubr.msk.f32.vlgmr.msra.gmra.mxu1 %vm457_vm0, %v455_v52 }
 0x150   : > { %v527_v53 = vpop.f32.mrf.mxu0  ;;  %v598_v54 = vpop.f32.mrf.mxu1 }
 0x152   : > { %v529_v55 = vpop.f32.mrf.mxu0  ;;  %v600_v56 = vpop.f32.mrf.mxu1 }
 0x154   : > { %v669_v57 = vpop.f32.mrf.mxu0  ;;  %v740_v58 = vpop.f32.mrf.mxu1 }
 0x156   : > { %v671_v59 = vpop.f32.mrf.mxu0  ;;  %v742_v60 = vpop.f32.mrf.mxu1 }
 0x158   : > { %v814_v61 = vpop.f32.mrf.mxu0  ;;  %v885_v63 = vpop.f32.mrf.mxu1 }
 0x159   : > { %v815_v1 = vadd.f32 %v814_v61, %v527_v53  ;;  %v886_v2 = vadd.f32 %v885_v63, %v598_v54 }
 0x15a   : > { %v816_v3 = vpop.f32.mrf.mxu0  ;;  %v887_v5 = vpop.f32.mrf.mxu1 }
 0x15b   : > { %v1040_v7 = vadd.f32 %v1032_v62, %v815_v1  ;;  %v1042_v8 = vadd.f32 %v1034_v0, %v886_v2  ;;  %v817_v9 = vadd.f32 %v816_v3, %v529_v55  ;;  %v888_v10 = vadd.f32 %v887_v5, %v600_v56 }
 0x15c   : > { %v956_v11 = vpop.f32.mrf.mxu0  ;;  %v1027_v13 = vpop.f32.mrf.mxu1 }
 0x15d   : > { %1048 = vst [vmem:[%s1371_s21] sm:$0xff] %v1040_v7  ;;  %1050 = vst [vmem:[%s1371_s21 + $0x10] sm:$0xff] %v1042_v8  ;;  %v1041_v15 = vadd.f32 %v1033_v4, %v817_v9  ;;  %v1043_v16 = vadd.f32 %v1035_v6, %v888_v10  ;;  %v957_v17 = vadd.f32 %v956_v11, %v669_v57 }
 0x15e   : > { %v1028_v18 = vadd.f32 %v1027_v13, %v740_v58  ;;  %v958_v19 = vpop.f32.mrf.mxu0  ;;  %v1029_v21 = vpop.f32.mrf.mxu1 }
 0x15f   : > { %1049 = vst [vmem:[%s1371_s21 + $0x8] sm:$0xff] %v1041_v15  ;;  %1051 = vst [vmem:[%s1371_s21 + $0x18] sm:$0xff] %v1043_v16  ;;  %v1044_v23 = vadd.f32 %v1036_v12, %v957_v17  ;;  %v959_v25 = vadd.f32 %v958_v19, %v671_v59  ;;  %v1030_v26 = vadd.f32 %v1029_v21, %v742_v60 }
 0x160   : > { %v1046_v24 = vadd.f32 %v1038_v14, %v1028_v18 }
 0x161   : > { %1052 = vst [vmem:[%s1371_s21 + $0x20] sm:$0xff] %v1044_v23  ;;  %v1045_v27 = vadd.f32 %v1037_v20, %v959_v25  ;;  %v1047_v28 = vadd.f32 %v1039_v22, %v1030_v26 }
 0x162   : > { %1054 = vst [vmem:[%s1371_s21 + $0x30] sm:$0xff] %v1046_v24 }
 0x163   : > { %1053 = vst [vmem:[%s1371_s21 + $0x28] sm:$0xff] %v1045_v27  ;;  %1055 = vst [vmem:[%s1371_s21 + $0x38] sm:$0xff] %v1047_v28 }
 0x164 PF: > { %s16_s23 = sadd.s32 1, %s1268_s23   ;;  %s1403_s21 = smov %s1264_s22 }
 0x165   : > { %p13_p5 = scmp.ge.s32.totalorder %s16_s23, 4   ;;  %s1404_s22 = smov %s1406_s24 }
 0x167   :  { %15 = sbr.rel (!%p13_p5) target bundleno = 2 (0x2), region = 83 }

// kernel: up_block_forward.11
= control target key start
LH: loop header
LB: loop body
LE: loop exit
PB: predicated region body
PF: predicated region fallthrough
CT: control target
= control target key end

     0   :  { %s606_s15 = smov 0   ;;  %s608_s16 = smov 0   ;;  %s683_s0 = inlined_call_operand.vmem [shape: f32[2,16,256], index: 0, kind: input, shape index: {}]   ;;  %s684_s1 = inlined_call_operand.vmem [shape: f32[32,16], index: 1, kind: input, shape index: {}]   ;;  %s685_s2 = inlined_call_operand.vmem [shape: f32[32,1], index: 2, kind: input, shape index: {}]   ;;  %s686_s3 = inlined_call_operand.vmem [shape: f32[32,1], index: 3, kind: input, shape index: {}]   ;;  %s687_s4 = inlined_call_operand.vmem [shape: f32[2,32,256], index: 4, kind: output, shape index: {}]  }
   0x1   :  { %s610_s17 = smov 0  }
   0x2 LB: > { %s26_s18 = sadd.s32 1, %s573_s16  ;;  %p510_p0 = scmp.ge.s32.totalorder %s577_s17, 1  ;;  %s577_s17 = sphi %s610_s17, %s14_s17   ;;  %s573_s16 = sphi %s608_s16, %s689_s16   ;;  %s569_s15 = sphi %s606_s15, %s688_s15  }
   0x3   : > { %p28_p1 = scmp.ge.s32.totalorder %s26_s18, 2  ;;  %p183_p2 = scmp.lt.s32.totalorder %s577_s17, 3 }
   0x5   : > { %s691_s18 = smov (%p28_p1, %s26_s18), 0  ;;  %p184_p3 = pnand %p510_p0, %p183_p2 }
   0x6   : > { %p218_p4 = scmp.lt.s32.totalorder (!%p184_p3), %s569_s15, 1 }
   0x7   : > { %187 = sbr.rel (%p184_p3) target bundleno = 224 (0xe0), region = 36 }
   0xc   : > { %v579_v0 = vmov 0.0   ;;  %v349_v1 = vld [vmem:[%s685_s2 + $0x10] sm:$0xff]  ;;  %v347_v2 = vld [vmem:[%s685_s2] sm:$0xff]  ;;  %s693_s15 = smov (!%p218_p4, %s569_s15), 1  ;;  %v580_v3 = vmov 0   ;;  %vm245_vm0 = vcmask 130048  }
   0xd   : > { %322 = vmatprep.mubr.f32.mxu0 %v579_v0  ;;  %334 = vmatprep.mubr.f32.mxu1 %v579_v0  ;;  %s521_s23 = sshll.u32 %s693_s15, 5  ;;  %v237_v8 = vld [vmem:[%s684_s1] sm:$0xff]  ;;  %v239_v9 = vld [vmem:[%s684_s1 + $0x10] sm:$0xff]  ;;  %v350_v10 = vld [vmem:[%s685_s2 + $0x18] sm:$0xff]  ;;  %s522_s25 = sshll.u32 %s693_s15, 6 }
   0xe   : > { %554 = vset.pattern.permute.xlu1 %v580_v3  ;;  %553 = vset.pattern.permute.xlu0 %v580_v3  ;;  %s225_s26 = scalar_lea.vmem %s683_s0, %s521_s23  ;;  %v348_v11 = vld [vmem:[%s685_s2 + $0x8] sm:$0xff]  ;;  %v240_v13 = vld [vmem:[%s684_s1 + $0x18] sm:$0xff]  ;;  %v379_v15 = vld [vmem:[%s686_s3] sm:$0xff]  ;;  %s235_s28 = scalar_lea.vmem %s687_s4, %s522_s25 }
   0xf   : > { %363 = vperm.xlu1 %554, %v349_v1   ;;  %353 = vperm.xlu0 %553, %v347_v2   ;;  %v244_v4 = vld [vmem:[%s225_s26 + $0x18] sm:$0xff]  ;;  %v243_v5 = vld [vmem:[%s225_s26 + $0x10] sm:$0xff]  ;;  %v242_v6 = vld [vmem:[%s225_s26 + $0x8] sm:$0xff] }
  0x10   : > { %286 = vmatprep.subr.mxu0 %v244_v4  ;;  %523 = vmatprep.subr.mxu1 %v244_v4  ;;  %v241_v7 = vld [vmem:[%s225_s26] sm:$0xff]  ;;  %v238_v12 = vld [vmem:[%s684_s1 + $0x8] sm:$0xff]  ;;  %v382_v16 = vld [vmem:[%s686_s3 + $0x18] sm:$0xff] }
  0x11   : > { %287 = vmatpush1.msra.mxu0 %v243_v5  ;;  %525 = vmatpush1.msra.mxu1 %v243_v5  ;;  %v380_v14 = vld [vmem:[%s686_s3 + $0x8] sm:$0xff]  ;;  %v381_v17 = vld [vmem:[%s686_s3 + $0x10] sm:$0xff] }
  0x12   : > { %288 = vmatprep.subr.mxu0 %v242_v6  ;;  %524 = vmatprep.subr.mxu1 %v242_v6 }
  0x13   : > { %289 = vmatpush1.msra.mxu0 %v241_v7  ;;  %526 = vmatpush1.msra.mxu1 %v241_v7 }
  0x14   : > { %515 = vmatmul.mubr.msk.f32.vlgmr.msra.gmra.mxu0 %vm245_vm0, %v237_v8  ;;  %517 = vmatmul.mubr.msk.f32.vlgmr.msra.gmra.mxu1 %vm245_vm0, %v239_v9 }
  0x15   : > { %328 = vmatprep.mubr.f32.mxu0 %v579_v0  ;;  %340 = vmatprep.mubr.f32.mxu1 %v579_v0 }
  0x16   : > { %368 = vperm.xlu1 %554, %v350_v10   ;;  %358 = vperm.xlu0 %553, %v348_v11  }
  0x18   : > { %516 = vmatmul.mubr.msk.f32.gmra.mxu0 %vm245_vm0, %v238_v12  ;;  %518 = vmatmul.mubr.msk.f32.gmra.mxu1 %vm245_vm0, %v240_v13 }
  0x1a   : > { %390 = vperm.xlu1 %554, %v380_v14   ;;  %385 = vperm.xlu0 %553, %v379_v15  }
  0x1e   : > { %400 = vperm.xlu1 %554, %v382_v16   ;;  %395 = vperm.xlu0 %553, %v381_v17  }
  0x8a   : > { %v354_v18 = vpop.permute.xlu0 %353  ;;  %v364_v19 = vpop.permute.xlu1 %363 }
  0x91   : > { %v359_v20 = vpop.permute.xlu0 %358  ;;  %v369_v21 = vpop.permute.xlu1 %368 }
  0x95   : > { %v386_v22 = vpop.permute.xlu0 %385  ;;  %v391_v23 = vpop.permute.xlu1 %390 }
  0x99   : > { %v396_v26 = vpop.permute.xlu0 %395  ;;  %v401_v37 = vpop.permute.xlu1 %400 }
  0xd4   : > { %v324_v24 = vpop.f32.mrf.mxu0  ;;  %v336_v25 = vpop.f32.mrf.mxu1 }
  0xd5   : > { %v371_v27 = vmul.f32 %v354_v18, %v324_v24  ;;  %v375_v28 = vmul.f32 %v364_v19, %v336_v25 }
  0xd6   : > { %v326_v29 = vpop.f32.mrf.mxu0  ;;  %v338_v30 = vpop.f32.mrf.mxu1 }
  0xd7   : > { %v403_v31 = vadd.f32 %v386_v22, %v371_v27  ;;  %v407_v32 = vadd.f32 %v396_v26, %v375_v28  ;;  %v372_v33 = vmul.f32 %v354_v18, %v326_v29  ;;  %v376_v34 = vmul.f32 %v364_v19, %v338_v30 }
  0xd8   : > { %v330_v35 = vpop.f32.mrf.mxu0  ;;  %v342_v36 = vpop.f32.mrf.mxu1 }
  0xd9   : > { %411 = vst [vmem:[%s235_s28] sm:$0xff] %v403_v31  ;;  %415 = vst [vmem:[%s235_s28 + $0x20] sm:$0xff] %v407_v32  ;;  %v404_v38 = vadd.f32 %v386_v22, %v372_v33  ;;  %v408_v39 = vadd.f32 %v396_v26, %v376_v34  ;;  %v373_v40 = vmul.f32 %v359_v20, %v330_v35 }
  0xda   : > { %v377_v41 = vmul.f32 %v369_v21, %v342_v36  ;;  %v332_v42 = vpop.f32.mrf.mxu0  ;;  %v344_v43 = vpop.f32.mrf.mxu1 }
  0xdb   : > { %412 = vst [vmem:[%s235_s28 + $0x8] sm:$0xff] %v404_v38  ;;  %416 = vst [vmem:[%s235_s28 + $0x28] sm:$0xff] %v408_v39  ;;  %v405_v44 = vadd.f32 %v391_v23, %v373_v40  ;;  %v374_v46 = vmul.f32 %v359_v20, %v332_v42  ;;  %v378_v47 = vmul.f32 %v369_v21, %v344_v43 }
  0xdc   : > { %v409_v45 = vadd.f32 %v401_v37, %v377_v41 }
  0xdd   : > { %413 = vst [vmem:[%s235_s28 + $0x10] sm:$0xff] %v405_v44  ;;  %v406_v48 = vadd.f32 %v391_v23, %v374_v46  ;;  %v410_v49 = vadd.f32 %v401_v37, %v378_v47 }
  0xde   : > { %417 = vst [vmem:[%s235_s28 + $0x30] sm:$0xff] %v409_v45 }
  0xdf   : > { %414 = vst [vmem:[%s235_s28 + $0x18] sm:$0xff] %v406_v48  ;;  %418 = vst [vmem:[%s235_s28 + $0x38] sm:$0xff] %v410_v49 }
  0xe0 PF: > { %s14_s17 = sadd.s32 1, %s577_s17   ;;  %s688_s15 = smov %s573_s16 }
  0xe1   : > { %p11_p5 = scmp.ge.s32.totalorder %s14_s17, 4   ;;  %s689_s16 = smov %s691_s18 }
  0xe3   :  { %13 = sbr.rel (!%p11_p5) target bundleno = 2 (0x2), region = 66 }

// kernel: up_block_forward.12
= control target key start
LH: loop header
LB: loop body
LE: loop exit
PB: predicated region body
PF: predicated region fallthrough
CT: control target
= control target key end

     0   :  { %s894_s15 = smov 0   ;;  %s896_s16 = smov 0   ;;  %s1105_s0 = inlined_call_operand.vmem [shape: f32[2,144,1024], index: 0, kind: input, shape index: {}]   ;;  %s1106_s1 = inlined_call_operand.vmem [shape: f32[8,144], index: 1, kind: input, shape index: {}]   ;;  %s1107_s2 = inlined_call_operand.vmem [shape: f32[8,1], index: 2, kind: input, shape index: {}]   ;;  %s1108_s3 = inlined_call_operand.vmem [shape: f32[8,1], index: 3, kind: input, shape index: {}]   ;;  %s1109_s4 = inlined_call_operand.vmem [shape: f32[2,8,1024], index: 4, kind: output, shape index: {}]  }
   0x1   :  { %s898_s17 = smov 0  }
   0x2 LB: > { %s26_s18 = sadd.s32 1, %s862_s16  ;;  %p806_p0 = scmp.ge.s32.totalorder %s866_s17, 1  ;;  %s866_s17 = sphi %s898_s17, %s14_s17   ;;  %s862_s16 = sphi %s896_s16, %s1111_s16   ;;  %s858_s15 = sphi %s894_s15, %s1110_s15  }
   0x3   : > { %p28_p1 = scmp.ge.s32.totalorder %s26_s18, 2  ;;  %p183_p2 = scmp.lt.s32.totalorder %s866_s17, 3 }
   0x5   : > { %s1113_s18 = smov (%p28_p1, %s26_s18), 0  ;;  %p184_p3 = pnand %p806_p0, %p183_p2 }
   0x6   : > { %p218_p4 = scmp.lt.s32.totalorder (!%p184_p3), %s858_s15, 1 }
   0x7   : > { %187 = sbr.rel (%p184_p3) target bundleno = 294 (0x126), region = 36 }
   0xc   : > { %v915_v0 = vld [vmem:[%s1106_s1 + $0x8] sm:$0xff]  ;;  %vm383_vm0 = vcmask 130048   ;;  %v671_v1 = vld [vmem:[%s1107_s2] sm:$0xff]  ;;  %s1115_s15 = smov (!%p218_p4, %s858_s15), 1  ;;  %v868_v2 = vmov 0  }
   0xd   : > { %810 = vmatprep.mubr.msk.f32.mxu0 %vm383_vm0, %v915_v0  ;;  %811 = vmatprep.mubr.msk.f32.mxu1 %vm383_vm0, %v915_v0  ;;  %s817_s23 = smul.u32 1152, %s1115_s15  ;;  %v685_v3 = vld [vmem:[%s1108_s3] sm:$0xff]  ;;  %s816_s5 = sshll.u32 %s1115_s15, 6 }
   0xe   : > { %843 = vset.pattern.permute.xlu0 %v868_v2  ;;  %s235_s8 = scalar_lea.vmem %s1109_s4, %s816_s5 }
   0xf   : > { %674 = vperm.xlu0 %843, %v671_v1   ;;  %s933_s28 = scalar_lea.vmem %s1105_s0, %s817_s23 }
  0x10   : > { %v360_v4 = vld [vmem:[%s933_s28 + $0x3c8] sm:$0xff]  ;;  %v362_v5 = vld [vmem:[%s933_s28 + $0x3d8] sm:$0xff]  ;;  %v359_v6 = vld [vmem:[%s933_s28 + $0x3c0] sm:$0xff] }
  0x11   : > { %387 = vmatprep.subr.mxu0 %v360_v4  ;;  %458 = vmatprep.subr.mxu1 %v362_v5  ;;  %v361_v7 = vld [vmem:[%s933_s28 + $0x3d0] sm:$0xff]  ;;  %v352_v8 = vld [vmem:[%s933_s28 + $0x388] sm:$0xff]  ;;  %v354_v9 = vld [vmem:[%s933_s28 + $0x398] sm:$0xff] }
  0x12   : > { %388 = vmatpush1.msra.mxu0 %v359_v6  ;;  %459 = vmatpush1.msra.mxu1 %v361_v7  ;;  %v351_v10 = vld [vmem:[%s933_s28 + $0x380] sm:$0xff]  ;;  %v353_v11 = vld [vmem:[%s933_s28 + $0x390] sm:$0xff]  ;;  %v344_v12 = vld [vmem:[%s933_s28 + $0x348] sm:$0xff] }
  0x13   : > { %688 = vperm.xlu0 %843, %v685_v3   ;;  %389 = vmatprep.subr.mxu0 %v352_v8  ;;  %v346_v13 = vld [vmem:[%s933_s28 + $0x358] sm:$0xff]  ;;  %v343_v14 = vld [vmem:[%s933_s28 + $0x340] sm:$0xff]  ;;  %v345_v15 = vld [vmem:[%s933_s28 + $0x350] sm:$0xff] }
  0x14   : > { %460 = vmatprep.subr.mxu1 %v354_v9  ;;  %390 = vmatpush1.msra.mxu0 %v351_v10  ;;  %v336_v16 = vld [vmem:[%s933_s28 + $0x308] sm:$0xff]  ;;  %v338_v17 = vld [vmem:[%s933_s28 + $0x318] sm:$0xff]  ;;  %v335_v18 = vld [vmem:[%s933_s28 + $0x300] sm:$0xff] }
  0x15   : > { %461 = vmatpush1.msra.mxu1 %v353_v11  ;;  %391 = vmatprep.subr.mxu0 %v344_v12  ;;  %v337_v19 = vld [vmem:[%s933_s28 + $0x310] sm:$0xff]  ;;  %v328_v20 = vld [vmem:[%s933_s28 + $0x2c8] sm:$0xff]  ;;  %v330_v21 = vld [vmem:[%s933_s28 + $0x2d8] sm:$0xff] }
  0x16   : > { %462 = vmatprep.subr.mxu1 %v346_v13  ;;  %392 = vmatpush1.msra.mxu0 %v343_v14  ;;  %v327_v22 = vld [vmem:[%s933_s28 + $0x2c0] sm:$0xff]  ;;  %v329_v23 = vld [vmem:[%s933_s28 + $0x2d0] sm:$0xff]  ;;  %v320_v24 = vld [vmem:[%s933_s28 + $0x288] sm:$0xff] }
  0x17   : > { %463 = vmatpush1.msra.mxu1 %v345_v15  ;;  %393 = vmatprep.subr.mxu0 %v336_v16  ;;  %v322_v25 = vld [vmem:[%s933_s28 + $0x298] sm:$0xff]  ;;  %v319_v26 = vld [vmem:[%s933_s28 + $0x280] sm:$0xff]  ;;  %v321_v27 = vld [vmem:[%s933_s28 + $0x290] sm:$0xff] }
  0x18   : > { %464 = vmatprep.subr.mxu1 %v338_v17  ;;  %394 = vmatpush1.msra.mxu0 %v335_v18  ;;  %v312_v28 = vld [vmem:[%s933_s28 + $0x248] sm:$0xff]  ;;  %v314_v29 = vld [vmem:[%s933_s28 + $0x258] sm:$0xff]  ;;  %v311_v30 = vld [vmem:[%s933_s28 + $0x240] sm:$0xff] }
  0x19   : > { %465 = vmatpush1.msra.mxu1 %v337_v19  ;;  %395 = vmatprep.subr.mxu0 %v328_v20  ;;  %v313_v31 = vld [vmem:[%s933_s28 + $0x250] sm:$0xff]  ;;  %v304_v32 = vld [vmem:[%s933_s28 + $0x208] sm:$0xff]  ;;  %v306_v33 = vld [vmem:[%s933_s28 + $0x218] sm:$0xff] }
  0x1a   : > { %466 = vmatprep.subr.mxu1 %v330_v21  ;;  %396 = vmatpush1.msra.mxu0 %v327_v22  ;;  %v303_v34 = vld [vmem:[%s933_s28 + $0x200] sm:$0xff]  ;;  %v305_v35 = vld [vmem:[%s933_s28 + $0x210] sm:$0xff]  ;;  %v296_v36 = vld [vmem:[%s933_s28 + $0x1c8] sm:$0xff] }
  0x1b   : > { %467 = vmatpush1.msra.mxu1 %v329_v23  ;;  %397 = vmatprep.subr.mxu0 %v320_v24  ;;  %v298_v37 = vld [vmem:[%s933_s28 + $0x1d8] sm:$0xff]  ;;  %v295_v38 = vld [vmem:[%s933_s28 + $0x1c0] sm:$0xff]  ;;  %v297_v39 = vld [vmem:[%s933_s28 + $0x1d0] sm:$0xff] }
  0x1c   : > { %468 = vmatprep.subr.mxu1 %v322_v25  ;;  %398 = vmatpush1.msra.mxu0 %v319_v26  ;;  %v288_v40 = vld [vmem:[%s933_s28 + $0x188] sm:$0xff]  ;;  %v290_v41 = vld [vmem:[%s933_s28 + $0x198] sm:$0xff]  ;;  %v287_v42 = vld [vmem:[%s933_s28 + $0x180] sm:$0xff] }
  0x1d   : > { %469 = vmatpush1.msra.mxu1 %v321_v27  ;;  %399 = vmatprep.subr.mxu0 %v312_v28  ;;  %v289_v43 = vld [vmem:[%s933_s28 + $0x190] sm:$0xff]  ;;  %v280_v44 = vld [vmem:[%s933_s28 + $0x148] sm:$0xff]  ;;  %v282_v45 = vld [vmem:[%s933_s28 + $0x158] sm:$0xff] }
  0x1e   : > { %470 = vmatprep.subr.mxu1 %v314_v29  ;;  %400 = vmatpush1.msra.mxu0 %v311_v30  ;;  %v279_v46 = vld [vmem:[%s933_s28 + $0x140] sm:$0xff]  ;;  %v281_v47 = vld [vmem:[%s933_s28 + $0x150] sm:$0xff]  ;;  %v272_v48 = vld [vmem:[%s933_s28 + $0x108] sm:$0xff] }
  0x1f   : > { %471 = vmatpush1.msra.mxu1 %v313_v31  ;;  %401 = vmatprep.subr.mxu0 %v304_v32  ;;  %v274_v49 = vld [vmem:[%s933_s28 + $0x118] sm:$0xff]  ;;  %v271_v50 = vld [vmem:[%s933_s28 + $0x100] sm:$0xff]  ;;  %v273_v51 = vld [vmem:[%s933_s28 + $0x110] sm:$0xff] }
  0x20   : > { %472 = vmatprep.subr.mxu1 %v306_v33  ;;  %402 = vmatpush1.msra.mxu0 %v303_v34  ;;  %v264_v52 = vld [vmem:[%s933_s28 + $0xc8] sm:$0xff]  ;;  %v266_v53 = vld [vmem:[%s933_s28 + $0xd8] sm:$0xff]  ;;  %v263_v54 = vld [vmem:[%s933_s28 + $0xc0] sm:$0xff] }
  0x21   : > { %473 = vmatpush1.msra.mxu1 %v305_v35  ;;  %403 = vmatprep.subr.mxu0 %v296_v36  ;;  %v265_v55 = vld [vmem:[%s933_s28 + $0xd0] sm:$0xff]  ;;  %v256_v56 = vld [vmem:[%s933_s28 + $0x88] sm:$0xff]  ;;  %v258_v57 = vld [vmem:[%s933_s28 + $0x98] sm:$0xff] }
  0x22   : > { %474 = vmatprep.subr.mxu1 %v298_v37  ;;  %404 = vmatpush1.msra.mxu0 %v295_v38  ;;  %v255_v58 = vld [vmem:[%s933_s28 + $0x80] sm:$0xff]  ;;  %v257_v59 = vld [vmem:[%s933_s28 + $0x90] sm:$0xff]  ;;  %v248_v60 = vld [vmem:[%s933_s28 + $0x48] sm:$0xff] }
  0x23   : > { %475 = vmatpush1.msra.mxu1 %v297_v39  ;;  %405 = vmatprep.subr.mxu0 %v288_v40  ;;  %v250_v61 = vld [vmem:[%s933_s28 + $0x58] sm:$0xff]  ;;  %v247_v62 = vld [vmem:[%s933_s28 + $0x40] sm:$0xff]  ;;  %v249_v63 = vld [vmem:[%s933_s28 + $0x50] sm:$0xff] }
  0x24   : > { %476 = vmatprep.subr.mxu1 %v290_v41  ;;  %406 = vmatpush1.msra.mxu0 %v287_v42  ;;  %v240_v1 = vld [vmem:[%s933_s28 + $0x8] sm:$0xff]  ;;  %v242_v2 = vld [vmem:[%s933_s28 + $0x18] sm:$0xff]  ;;  %v239_v3 = vld [vmem:[%s933_s28] sm:$0xff] }
  0x25   : > { %477 = vmatpush1.msra.mxu1 %v289_v43  ;;  %407 = vmatprep.subr.mxu0 %v280_v44  ;;  %v241_v4 = vld [vmem:[%s933_s28 + $0x10] sm:$0xff]  ;;  %v376_v5 = vld [vmem:[%s933_s28 + $0x448] sm:$0xff]  ;;  %v378_v6 = vld [vmem:[%s933_s28 + $0x458] sm:$0xff] }
  0x26   : > { %478 = vmatprep.subr.mxu1 %v282_v45  ;;  %408 = vmatpush1.msra.mxu0 %v279_v46  ;;  %v375_v7 = vld [vmem:[%s933_s28 + $0x440] sm:$0xff]  ;;  %v377_v8 = vld [vmem:[%s933_s28 + $0x450] sm:$0xff]  ;;  %v368_v9 = vld [vmem:[%s933_s28 + $0x408] sm:$0xff] }
  0x27   : > { %479 = vmatpush1.msra.mxu1 %v281_v47  ;;  %409 = vmatprep.subr.mxu0 %v272_v48  ;;  %v370_v10 = vld [vmem:[%s933_s28 + $0x418] sm:$0xff]  ;;  %v367_v11 = vld [vmem:[%s933_s28 + $0x400] sm:$0xff]  ;;  %v369_v12 = vld [vmem:[%s933_s28 + $0x410] sm:$0xff] }
  0x28   : > { %480 = vmatprep.subr.mxu1 %v274_v49  ;;  %410 = vmatpush1.msra.mxu0 %v271_v50  ;;  %v1010_v13 = vld [vmem:[%s1106_s1] sm:$0xff]  ;;  %v364_v14 = vld [vmem:[%s933_s28 + $0x3e8] sm:$0xff]  ;;  %v366_v15 = vld [vmem:[%s933_s28 + $0x3f8] sm:$0xff] }
  0x29   : > { %481 = vmatpush1.msra.mxu1 %v273_v51  ;;  %411 = vmatprep.subr.mxu0 %v264_v52  ;;  %v363_v16 = vld [vmem:[%s933_s28 + $0x3e0] sm:$0xff]  ;;  %v365_v17 = vld [vmem:[%s933_s28 + $0x3f0] sm:$0xff]  ;;  %v356_v18 = vld [vmem:[%s933_s28 + $0x3a8] sm:$0xff] }
  0x2a   : > { %482 = vmatprep.subr.mxu1 %v266_v53  ;;  %412 = vmatpush1.msra.mxu0 %v263_v54  ;;  %v358_v19 = vld [vmem:[%s933_s28 + $0x3b8] sm:$0xff]  ;;  %v355_v20 = vld [vmem:[%s933_s28 + $0x3a0] sm:$0xff]  ;;  %v357_v21 = vld [vmem:[%s933_s28 + $0x3b0] sm:$0xff] }
  0x2b   : > { %483 = vmatpush1.msra.mxu1 %v265_v55  ;;  %413 = vmatprep.subr.mxu0 %v256_v56  ;;  %v348_v22 = vld [vmem:[%s933_s28 + $0x368] sm:$0xff]  ;;  %v350_v23 = vld [vmem:[%s933_s28 + $0x378] sm:$0xff]  ;;  %v347_v24 = vld [vmem:[%s933_s28 + $0x360] sm:$0xff] }
  0x2c   : > { %484 = vmatprep.subr.mxu1 %v258_v57  ;;  %414 = vmatpush1.msra.mxu0 %v255_v58  ;;  %v349_v25 = vld [vmem:[%s933_s28 + $0x370] sm:$0xff]  ;;  %v340_v26 = vld [vmem:[%s933_s28 + $0x328] sm:$0xff]  ;;  %v342_v27 = vld [vmem:[%s933_s28 + $0x338] sm:$0xff] }
  0x2d   : > { %485 = vmatpush1.msra.mxu1 %v257_v59  ;;  %415 = vmatprep.subr.mxu0 %v248_v60  ;;  %v339_v28 = vld [vmem:[%s933_s28 + $0x320] sm:$0xff]  ;;  %v341_v29 = vld [vmem:[%s933_s28 + $0x330] sm:$0xff]  ;;  %v332_v30 = vld [vmem:[%s933_s28 + $0x2e8] sm:$0xff] }
  0x2e   : > { %486 = vmatprep.subr.mxu1 %v250_v61  ;;  %416 = vmatpush1.msra.mxu0 %v247_v62  ;;  %v334_v31 = vld [vmem:[%s933_s28 + $0x2f8] sm:$0xff]  ;;  %v331_v32 = vld [vmem:[%s933_s28 + $0x2e0] sm:$0xff]  ;;  %v333_v33 = vld [vmem:[%s933_s28 + $0x2f0] sm:$0xff] }
  0x2f   : > { %487 = vmatpush1.msra.mxu1 %v249_v63  ;;  %417 = vmatprep.subr.mxu0 %v240_v1  ;;  %v324_v34 = vld [vmem:[%s933_s28 + $0x2a8] sm:$0xff]  ;;  %v326_v35 = vld [vmem:[%s933_s28 + $0x2b8] sm:$0xff]  ;;  %v323_v36 = vld [vmem:[%s933_s28 + $0x2a0] sm:$0xff] }
  0x30   : > { %488 = vmatprep.subr.mxu1 %v242_v2  ;;  %418 = vmatpush1.msra.mxu0 %v239_v3  ;;  %v325_v37 = vld [vmem:[%s933_s28 + $0x2b0] sm:$0xff]  ;;  %v316_v38 = vld [vmem:[%s933_s28 + $0x268] sm:$0xff]  ;;  %v318_v39 = vld [vmem:[%s933_s28 + $0x278] sm:$0xff] }
  0x31   : > { %489 = vmatpush1.msra.mxu1 %v241_v4  ;;  %447 = vmatprep.subr.mxu0 %v376_v5  ;;  %v315_v40 = vld [vmem:[%s933_s28 + $0x260] sm:$0xff]  ;;  %v317_v41 = vld [vmem:[%s933_s28 + $0x270] sm:$0xff]  ;;  %v308_v42 = vld [vmem:[%s933_s28 + $0x228] sm:$0xff] }
  0x32   : > { %518 = vmatprep.subr.mxu1 %v378_v6  ;;  %448 = vmatpush2.msra.mxu0 %v375_v7  ;;  %v310_v43 = vld [vmem:[%s933_s28 + $0x238] sm:$0xff]  ;;  %v307_v44 = vld [vmem:[%s933_s28 + $0x220] sm:$0xff]  ;;  %v309_v45 = vld [vmem:[%s933_s28 + $0x230] sm:$0xff] }
  0x33   : > { %519 = vmatpush2.msra.mxu1 %v377_v8  ;;  %449 = vmatprep.subr.mxu0 %v368_v9  ;;  %v300_v46 = vld [vmem:[%s933_s28 + $0x1e8] sm:$0xff]  ;;  %v302_v47 = vld [vmem:[%s933_s28 + $0x1f8] sm:$0xff]  ;;  %v299_v48 = vld [vmem:[%s933_s28 + $0x1e0] sm:$0xff] }
  0x34   : > { %520 = vmatprep.subr.mxu1 %v370_v10  ;;  %450 = vmatpush2.msra.mxu0 %v367_v11  ;;  %v301_v49 = vld [vmem:[%s933_s28 + $0x1f0] sm:$0xff]  ;;  %v292_v50 = vld [vmem:[%s933_s28 + $0x1a8] sm:$0xff]  ;;  %v294_v51 = vld [vmem:[%s933_s28 + $0x1b8] sm:$0xff] }
  0x35   : > { %521 = vmatpush2.msra.mxu1 %v369_v12  ;;  %452 = vmatmul.mubr.f32.vlgmr.msra.gmra.mxu0 %v1010_v13  ;;  %v291_v52 = vld [vmem:[%s933_s28 + $0x1a0] sm:$0xff]  ;;  %v293_v53 = vld [vmem:[%s933_s28 + $0x1b0] sm:$0xff]  ;;  %v284_v54 = vld [vmem:[%s933_s28 + $0x168] sm:$0xff] }
  0x36   : > { %523 = vmatmul.mubr.f32.vlgmr.msra.gmra.mxu1 %v1010_v13  ;;  %529 = vmatprep.subr.mxu0 %v364_v14  ;;  %v286_v55 = vld [vmem:[%s933_s28 + $0x178] sm:$0xff]  ;;  %v283_v56 = vld [vmem:[%s933_s28 + $0x160] sm:$0xff]  ;;  %v285_v57 = vld [vmem:[%s933_s28 + $0x170] sm:$0xff] }
  0x37   : > { %600 = vmatprep.subr.mxu1 %v366_v15  ;;  %530 = vmatpush1.msra.mxu0 %v363_v16  ;;  %v276_v58 = vld [vmem:[%s933_s28 + $0x128] sm:$0xff]  ;;  %v278_v59 = vld [vmem:[%s933_s28 + $0x138] sm:$0xff]  ;;  %v275_v60 = vld [vmem:[%s933_s28 + $0x120] sm:$0xff] }
  0x38   : > { %601 = vmatpush1.msra.mxu1 %v365_v17  ;;  %531 = vmatprep.subr.mxu0 %v356_v18  ;;  %v277_v61 = vld [vmem:[%s933_s28 + $0x130] sm:$0xff]  ;;  %v268_v62 = vld [vmem:[%s933_s28 + $0xe8] sm:$0xff]  ;;  %v270_v63 = vld [vmem:[%s933_s28 + $0xf8] sm:$0xff] }
  0x39   : > { %602 = vmatprep.subr.mxu1 %v358_v19  ;;  %532 = vmatpush1.msra.mxu0 %v355_v20  ;;  %v267_v1 = vld [vmem:[%s933_s28 + $0xe0] sm:$0xff]  ;;  %v269_v2 = vld [vmem:[%s933_s28 + $0xf0] sm:$0xff]  ;;  %v260_v3 = vld [vmem:[%s933_s28 + $0xa8] sm:$0xff] }
  0x3a   : > { %603 = vmatpush1.msra.mxu1 %v357_v21  ;;  %533 = vmatprep.subr.mxu0 %v348_v22  ;;  %v262_v4 = vld [vmem:[%s933_s28 + $0xb8] sm:$0xff]  ;;  %v259_v5 = vld [vmem:[%s933_s28 + $0xa0] sm:$0xff]  ;;  %v261_v6 = vld [vmem:[%s933_s28 + $0xb0] sm:$0xff] }
  0x3b   : > { %604 = vmatprep.subr.mxu1 %v350_v23  ;;  %534 = vmatpush1.msra.mxu0 %v347_v24  ;;  %v252_v7 = vld [vmem:[%s933_s28 + $0x68] sm:$0xff]  ;;  %v254_v8 = vld [vmem:[%s933_s28 + $0x78] sm:$0xff]  ;;  %v251_v9 = vld [vmem:[%s933_s28 + $0x60] sm:$0xff] }
  0x3c   : > { %605 = vmatpush1.msra.mxu1 %v349_v25  ;;  %535 = vmatprep.subr.mxu0 %v340_v26  ;;  %v253_v10 = vld [vmem:[%s933_s28 + $0x70] sm:$0xff]  ;;  %v244_v11 = vld [vmem:[%s933_s28 + $0x28] sm:$0xff]  ;;  %v246_v12 = vld [vmem:[%s933_s28 + $0x38] sm:$0xff] }
  0x3d   : > { %606 = vmatprep.subr.mxu1 %v342_v27  ;;  %536 = vmatpush1.msra.mxu0 %v339_v28  ;;  %v243_v14 = vld [vmem:[%s933_s28 + $0x20] sm:$0xff]  ;;  %v245_v15 = vld [vmem:[%s933_s28 + $0x30] sm:$0xff]  ;;  %v380_v16 = vld [vmem:[%s933_s28 + $0x468] sm:$0xff] }
  0x3e   : > { %607 = vmatpush1.msra.mxu1 %v341_v29  ;;  %537 = vmatprep.subr.mxu0 %v332_v30  ;;  %v382_v17 = vld [vmem:[%s933_s28 + $0x478] sm:$0xff]  ;;  %v379_v18 = vld [vmem:[%s933_s28 + $0x460] sm:$0xff]  ;;  %v381_v19 = vld [vmem:[%s933_s28 + $0x470] sm:$0xff] }
  0x3f   : > { %608 = vmatprep.subr.mxu1 %v334_v31  ;;  %538 = vmatpush1.msra.mxu0 %v331_v32  ;;  %v372_v20 = vld [vmem:[%s933_s28 + $0x428] sm:$0xff]  ;;  %v374_v21 = vld [vmem:[%s933_s28 + $0x438] sm:$0xff]  ;;  %v371_v22 = vld [vmem:[%s933_s28 + $0x420] sm:$0xff] }
  0x40   : > { %609 = vmatpush1.msra.mxu1 %v333_v33  ;;  %539 = vmatprep.subr.mxu0 %v324_v34  ;;  %v373_v23 = vld [vmem:[%s933_s28 + $0x430] sm:$0xff] }
  0x41   : > { %610 = vmatprep.subr.mxu1 %v326_v35  ;;  %540 = vmatpush1.msra.mxu0 %v323_v36 }
  0x42   : > { %611 = vmatpush1.msra.mxu1 %v325_v37  ;;  %541 = vmatprep.subr.mxu0 %v316_v38 }
  0x43   : > { %612 = vmatprep.subr.mxu1 %v318_v39  ;;  %542 = vmatpush1.msra.mxu0 %v315_v40 }
  0x44   : > { %613 = vmatpush1.msra.mxu1 %v317_v41  ;;  %543 = vmatprep.subr.mxu0 %v308_v42 }
  0x45   : > { %614 = vmatprep.subr.mxu1 %v310_v43  ;;  %544 = vmatpush1.msra.mxu0 %v307_v44 }
  0x46   : > { %615 = vmatpush1.msra.mxu1 %v309_v45  ;;  %545 = vmatprep.subr.mxu0 %v300_v46 }
  0x47   : > { %616 = vmatprep.subr.mxu1 %v302_v47  ;;  %546 = vmatpush1.msra.mxu0 %v299_v48 }
  0x48   : > { %617 = vmatpush1.msra.mxu1 %v301_v49  ;;  %547 = vmatprep.subr.mxu0 %v292_v50 }
  0x49   : > { %618 = vmatprep.subr.mxu1 %v294_v51  ;;  %548 = vmatpush1.msra.mxu0 %v291_v52 }
  0x4a   : > { %619 = vmatpush1.msra.mxu1 %v293_v53  ;;  %549 = vmatprep.subr.mxu0 %v284_v54 }
  0x4b   : > { %620 = vmatprep.subr.mxu1 %v286_v55  ;;  %550 = vmatpush1.msra.mxu0 %v283_v56 }
  0x4c   : > { %621 = vmatpush1.msra.mxu1 %v285_v57  ;;  %551 = vmatprep.subr.mxu0 %v276_v58 }
  0x4d   : > { %622 = vmatprep.subr.mxu1 %v278_v59  ;;  %552 = vmatpush1.msra.mxu0 %v275_v60 }
  0x4e   : > { %623 = vmatpush1.msra.mxu1 %v277_v61  ;;  %553 = vmatprep.subr.mxu0 %v268_v62 }
  0x4f   : > { %624 = vmatprep.subr.mxu1 %v270_v63  ;;  %554 = vmatpush1.msra.mxu0 %v267_v1 }
  0x50   : > { %625 = vmatpush1.msra.mxu1 %v269_v2  ;;  %555 = vmatprep.subr.mxu0 %v260_v3 }
  0x51   : > { %626 = vmatprep.subr.mxu1 %v262_v4  ;;  %556 = vmatpush1.msra.mxu0 %v259_v5 }
  0x52   : > { %627 = vmatpush1.msra.mxu1 %v261_v6  ;;  %557 = vmatprep.subr.mxu0 %v252_v7 }
  0x53   : > { %628 = vmatprep.subr.mxu1 %v254_v8  ;;  %558 = vmatpush1.msra.mxu0 %v251_v9 }
  0x54   : > { %629 = vmatpush1.msra.mxu1 %v253_v10  ;;  %559 = vmatprep.subr.mxu0 %v244_v11 }
  0x55   : > { %630 = vmatprep.subr.mxu1 %v246_v12  ;;  %560 = vmatpush1.msra.mxu0 %v243_v14 }
  0x56   : > { %631 = vmatpush1.msra.mxu1 %v245_v15  ;;  %589 = vmatprep.subr.mxu0 %v380_v16 }
  0x57   : > { %660 = vmatprep.subr.mxu1 %v382_v17  ;;  %590 = vmatpush2.msra.mxu0 %v379_v18 }
  0x58   : > { %661 = vmatpush2.msra.mxu1 %v381_v19  ;;  %591 = vmatprep.subr.mxu0 %v372_v20 }
  0x59   : > { %662 = vmatprep.subr.mxu1 %v374_v21  ;;  %592 = vmatpush2.msra.mxu0 %v371_v22 }
  0x5a   : > { %812 = vmatprep.mubr.msk.f32.mxu0 %vm383_vm0, %v915_v0  ;;  %663 = vmatpush2.msra.mxu1 %v373_v23 }
  0x5b   : > { %813 = vmatprep.mubr.msk.f32.mxu1 %vm383_vm0, %v915_v0  ;;  %594 = vmatmul.mubr.f32.vlgmr.msra.gmra.mxu0 %v1010_v13 }
  0x5c   : > { %665 = vmatmul.mubr.f32.vlgmr.msra.gmra.mxu1 %v1010_v13 }
  0x8a   : > { %v675_v24 = vpop.permute.xlu0 %674 }
  0x8e   : > { %v689_v25 = vpop.permute.xlu0 %688 }
  0xf5   : > { %v453_v26 = vpop.f32.mrf.mxu0 }
  0xf6   : > { %v524_v27 = vpop.f32.mrf.mxu1  ;;  %v677_v28 = vmul.f32 %v675_v24, %v453_v26 }
  0xf7   : > { %v679_v29 = vmul.f32 %v675_v24, %v524_v27  ;;  %v455_v30 = vpop.f32.mrf.mxu0 }
  0xf8   : > { %v526_v31 = vpop.f32.mrf.mxu1  ;;  %v678_v32 = vmul.f32 %v675_v24, %v455_v30  ;;  %v691_v34 = vadd.f32 %v689_v25, %v677_v28 }
  0xf9   : > { %v680_v33 = vmul.f32 %v675_v24, %v526_v31  ;;  %v693_v35 = vadd.f32 %v689_v25, %v679_v29 }
  0xfa   : > { %v692_v0 = vadd.f32 %v689_v25, %v678_v32  ;;  %v699_v13 = vmax.f32 %v691_v34, 0.0 }
  0xfb   : > { %v694_v36 = vadd.f32 %v689_v25, %v680_v33  ;;  %v701_v37 = vmax.f32 %v693_v35, 0.0 }
  0xfc   : > { %v700_v38 = vmax.f32 %v692_v0, 0.0  ;;  %707 = vst [vmem:[%s235_s8] sm:$0xff] %v699_v13 }
  0xfd   : > { %v702_v39 = vmax.f32 %v694_v36, 0.0  ;;  %709 = vst [vmem:[%s235_s8 + $0x10] sm:$0xff] %v701_v37 }
  0xfe   : > { %708 = vst [vmem:[%s235_s8 + $0x8] sm:$0xff] %v700_v38 }
  0xff   : > { %710 = vst [vmem:[%s235_s8 + $0x18] sm:$0xff] %v702_v39 }
 0x11b   : > { %v595_v40 = vpop.f32.mrf.mxu0 }
 0x11c   : > { %v666_v41 = vpop.f32.mrf.mxu1  ;;  %v681_v42 = vmul.f32 %v675_v24, %v595_v40 }
 0x11d   : > { %v683_v43 = vmul.f32 %v675_v24, %v666_v41  ;;  %v597_v44 = vpop.f32.mrf.mxu0 }
 0x11e   : > { %v668_v45 = vpop.f32.mrf.mxu1  ;;  %v695_v46 = vadd.f32 %v689_v25, %v681_v42  ;;  %v682_v48 = vmul.f32 %v675_v24, %v597_v44 }
 0x11f   : > { %v697_v47 = vadd.f32 %v689_v25, %v683_v43  ;;  %v684_v49 = vmul.f32 %v675_v24, %v668_v45 }
 0x120   : > { %v703_v50 = vmax.f32 %v695_v46, 0.0  ;;  %v696_v52 = vadd.f32 %v689_v25, %v682_v48 }
 0x121   : > { %v705_v51 = vmax.f32 %v697_v47, 0.0  ;;  %v698_v53 = vadd.f32 %v689_v25, %v684_v49 }
 0x122   : > { %711 = vst [vmem:[%s235_s8 + $0x20] sm:$0xff] %v703_v50  ;;  %v704_v54 = vmax.f32 %v696_v52, 0.0 }
 0x123   : > { %713 = vst [vmem:[%s235_s8 + $0x30] sm:$0xff] %v705_v51  ;;  %v706_v55 = vmax.f32 %v698_v53, 0.0 }
 0x124   : > { %712 = vst [vmem:[%s235_s8 + $0x28] sm:$0xff] %v704_v54 }
 0x125   : > { %714 = vst [vmem:[%s235_s8 + $0x38] sm:$0xff] %v706_v55 }
 0x126 PF: > { %s14_s17 = sadd.s32 1, %s866_s17   ;;  %s1110_s15 = smov %s862_s16 }
 0x127   : > { %p11_p5 = scmp.ge.s32.totalorder %s14_s17, 4   ;;  %s1111_s16 = smov %s1113_s18 }
 0x129   :  { %13 = sbr.rel (!%p11_p5) target bundleno = 2 (0x2), region = 66 }

// kernel: up_block_forward.13
= control target key start
LH: loop header
LB: loop body
LE: loop exit
PB: predicated region body
PF: predicated region fallthrough
CT: control target
= control target key end

     0   :  { %s823_s15 = smov 0   ;;  %s825_s16 = smov 0   ;;  %s957_s0 = inlined_call_operand.vmem [shape: f32[2,72,1024], index: 0, kind: input, shape index: {}]   ;;  %s958_s1 = inlined_call_operand.vmem [shape: f32[8,72], index: 1, kind: input, shape index: {}]   ;;  %s959_s2 = inlined_call_operand.vmem [shape: f32[8,1], index: 2, kind: input, shape index: {}]   ;;  %s960_s3 = inlined_call_operand.vmem [shape: f32[8,1], index: 3, kind: input, shape index: {}]   ;;  %s961_s4 = inlined_call_operand.vmem [shape: f32[2,8,1024], index: 4, kind: output, shape index: {}]  }
   0x1   :  { %s827_s17 = smov 0  }
   0x2 LB: > { %s26_s18 = sadd.s32 1, %s790_s16  ;;  %p733_p0 = scmp.ge.s32.totalorder %s794_s17, 1  ;;  %s794_s17 = sphi %s827_s17, %s14_s17   ;;  %s790_s16 = sphi %s825_s16, %s963_s16   ;;  %s786_s15 = sphi %s823_s15, %s962_s15  }
   0x3   : > { %p28_p1 = scmp.ge.s32.totalorder %s26_s18, 2  ;;  %p183_p2 = scmp.lt.s32.totalorder %s794_s17, 3 }
   0x5   : > { %s965_s18 = smov (%p28_p1, %s26_s18), 0  ;;  %p184_p3 = pnand %p733_p0, %p183_p2 }
   0x6   : > { %p218_p4 = scmp.lt.s32.totalorder (!%p184_p3), %s786_s15, 1 }
   0x7   : > { %187 = sbr.rel (%p184_p3) target bundleno = 258 (0x102), region = 36 }
   0xc   : > { %v598_v0 = vld [vmem:[%s959_s2] sm:$0xff]  ;;  %v796_v1 = vmov 0.0   ;;  %s967_s15 = smov (!%p218_p4, %s786_s15), 1  ;;  %v797_v2 = vmov 0   ;;  %vm310_vm0 = vcmask 588800  }
   0xd   : > { %378 = vmatprep.mubr.f32.mxu0 %v796_v1  ;;  %449 = vmatprep.mubr.f32.mxu1 %v796_v1  ;;  %s744_s21 = smul.u32 576, %s967_s15  ;;  %v612_v3 = vld [vmem:[%s960_s3] sm:$0xff]  ;;  %s743_s29 = sshll.u32 %s967_s15, 6 }
   0xe   : > { %771 = vset.pattern.permute.xlu0 %v797_v2  ;;  %v896_v40 = vld [vmem:[%s958_s1] sm:$0xff]  ;;  %s235_s6 = scalar_lea.vmem %s961_s4, %s743_s29 }
   0xf   : > { %601 = vperm.xlu0 %771, %v598_v0   ;;  %s855_s26 = scalar_lea.vmem %s957_s0, %s744_s21 }
  0x10   : > { %v303_v4 = vld [vmem:[%s855_s26 + $0x208] sm:$0xff]  ;;  %v305_v5 = vld [vmem:[%s855_s26 + $0x218] sm:$0xff]  ;;  %v302_v6 = vld [vmem:[%s855_s26 + $0x200] sm:$0xff] }
  0x11   : > { %328 = vmatprep.subr.mxu0 %v303_v4  ;;  %399 = vmatprep.subr.mxu1 %v305_v5  ;;  %v304_v7 = vld [vmem:[%s855_s26 + $0x210] sm:$0xff]  ;;  %v295_v8 = vld [vmem:[%s855_s26 + $0x1c8] sm:$0xff]  ;;  %v297_v9 = vld [vmem:[%s855_s26 + $0x1d8] sm:$0xff] }
  0x12   : > { %329 = vmatpush1.msra.mxu0 %v302_v6  ;;  %400 = vmatpush1.msra.mxu1 %v304_v7  ;;  %v294_v10 = vld [vmem:[%s855_s26 + $0x1c0] sm:$0xff]  ;;  %v296_v11 = vld [vmem:[%s855_s26 + $0x1d0] sm:$0xff]  ;;  %v287_v12 = vld [vmem:[%s855_s26 + $0x188] sm:$0xff] }
  0x13   : > { %615 = vperm.xlu0 %771, %v612_v3   ;;  %330 = vmatprep.subr.mxu0 %v295_v8  ;;  %v289_v13 = vld [vmem:[%s855_s26 + $0x198] sm:$0xff]  ;;  %v286_v14 = vld [vmem:[%s855_s26 + $0x180] sm:$0xff]  ;;  %v288_v15 = vld [vmem:[%s855_s26 + $0x190] sm:$0xff] }
  0x14   : > { %401 = vmatprep.subr.mxu1 %v297_v9  ;;  %331 = vmatpush1.msra.mxu0 %v294_v10  ;;  %v279_v16 = vld [vmem:[%s855_s26 + $0x148] sm:$0xff]  ;;  %v281_v17 = vld [vmem:[%s855_s26 + $0x158] sm:$0xff]  ;;  %v278_v18 = vld [vmem:[%s855_s26 + $0x140] sm:$0xff] }
  0x15   : > { %402 = vmatpush1.msra.mxu1 %v296_v11  ;;  %332 = vmatprep.subr.mxu0 %v287_v12  ;;  %v280_v19 = vld [vmem:[%s855_s26 + $0x150] sm:$0xff]  ;;  %v271_v20 = vld [vmem:[%s855_s26 + $0x108] sm:$0xff]  ;;  %v273_v21 = vld [vmem:[%s855_s26 + $0x118] sm:$0xff] }
  0x16   : > { %403 = vmatprep.subr.mxu1 %v289_v13  ;;  %333 = vmatpush1.msra.mxu0 %v286_v14  ;;  %v270_v22 = vld [vmem:[%s855_s26 + $0x100] sm:$0xff]  ;;  %v272_v23 = vld [vmem:[%s855_s26 + $0x110] sm:$0xff]  ;;  %v263_v24 = vld [vmem:[%s855_s26 + $0xc8] sm:$0xff] }
  0x17   : > { %404 = vmatpush1.msra.mxu1 %v288_v15  ;;  %334 = vmatprep.subr.mxu0 %v279_v16  ;;  %v265_v25 = vld [vmem:[%s855_s26 + $0xd8] sm:$0xff]  ;;  %v262_v26 = vld [vmem:[%s855_s26 + $0xc0] sm:$0xff]  ;;  %v264_v27 = vld [vmem:[%s855_s26 + $0xd0] sm:$0xff] }
  0x18   : > { %405 = vmatprep.subr.mxu1 %v281_v17  ;;  %335 = vmatpush1.msra.mxu0 %v278_v18  ;;  %v255_v28 = vld [vmem:[%s855_s26 + $0x88] sm:$0xff]  ;;  %v257_v29 = vld [vmem:[%s855_s26 + $0x98] sm:$0xff]  ;;  %v254_v30 = vld [vmem:[%s855_s26 + $0x80] sm:$0xff] }
  0x19   : > { %406 = vmatpush1.msra.mxu1 %v280_v19  ;;  %336 = vmatprep.subr.mxu0 %v271_v20  ;;  %v256_v31 = vld [vmem:[%s855_s26 + $0x90] sm:$0xff]  ;;  %v247_v32 = vld [vmem:[%s855_s26 + $0x48] sm:$0xff]  ;;  %v249_v33 = vld [vmem:[%s855_s26 + $0x58] sm:$0xff] }
  0x1a   : > { %407 = vmatprep.subr.mxu1 %v273_v21  ;;  %337 = vmatpush1.msra.mxu0 %v270_v22  ;;  %v246_v34 = vld [vmem:[%s855_s26 + $0x40] sm:$0xff]  ;;  %v248_v35 = vld [vmem:[%s855_s26 + $0x50] sm:$0xff]  ;;  %v239_v36 = vld [vmem:[%s855_s26 + $0x8] sm:$0xff] }
  0x1b   : > { %408 = vmatpush1.msra.mxu1 %v272_v23  ;;  %338 = vmatprep.subr.mxu0 %v263_v24  ;;  %v241_v37 = vld [vmem:[%s855_s26 + $0x18] sm:$0xff]  ;;  %v238_v38 = vld [vmem:[%s855_s26] sm:$0xff]  ;;  %v240_v39 = vld [vmem:[%s855_s26 + $0x10] sm:$0xff] }
  0x1c   : > { %409 = vmatprep.subr.mxu1 %v265_v25  ;;  %339 = vmatpush1.msra.mxu0 %v262_v26  ;;  %v307_v41 = vld [vmem:[%s855_s26 + $0x228] sm:$0xff]  ;;  %v309_v42 = vld [vmem:[%s855_s26 + $0x238] sm:$0xff]  ;;  %v306_v43 = vld [vmem:[%s855_s26 + $0x220] sm:$0xff] }
  0x1d   : > { %410 = vmatpush1.msra.mxu1 %v264_v27  ;;  %340 = vmatprep.subr.mxu0 %v255_v28  ;;  %v308_v44 = vld [vmem:[%s855_s26 + $0x230] sm:$0xff]  ;;  %v299_v45 = vld [vmem:[%s855_s26 + $0x1e8] sm:$0xff]  ;;  %v301_v46 = vld [vmem:[%s855_s26 + $0x1f8] sm:$0xff] }
  0x1e   : > { %411 = vmatprep.subr.mxu1 %v257_v29  ;;  %341 = vmatpush1.msra.mxu0 %v254_v30  ;;  %v298_v47 = vld [vmem:[%s855_s26 + $0x1e0] sm:$0xff]  ;;  %v300_v48 = vld [vmem:[%s855_s26 + $0x1f0] sm:$0xff]  ;;  %v291_v49 = vld [vmem:[%s855_s26 + $0x1a8] sm:$0xff] }
  0x1f   : > { %412 = vmatpush1.msra.mxu1 %v256_v31  ;;  %342 = vmatprep.subr.mxu0 %v247_v32  ;;  %v293_v50 = vld [vmem:[%s855_s26 + $0x1b8] sm:$0xff]  ;;  %v290_v51 = vld [vmem:[%s855_s26 + $0x1a0] sm:$0xff]  ;;  %v292_v52 = vld [vmem:[%s855_s26 + $0x1b0] sm:$0xff] }
  0x20   : > { %413 = vmatprep.subr.mxu1 %v249_v33  ;;  %343 = vmatpush1.msra.mxu0 %v246_v34  ;;  %v283_v53 = vld [vmem:[%s855_s26 + $0x168] sm:$0xff]  ;;  %v285_v54 = vld [vmem:[%s855_s26 + $0x178] sm:$0xff]  ;;  %v282_v55 = vld [vmem:[%s855_s26 + $0x160] sm:$0xff] }
  0x21   : > { %414 = vmatpush1.msra.mxu1 %v248_v35  ;;  %344 = vmatprep.subr.mxu0 %v239_v36  ;;  %v284_v56 = vld [vmem:[%s855_s26 + $0x170] sm:$0xff]  ;;  %v275_v57 = vld [vmem:[%s855_s26 + $0x128] sm:$0xff]  ;;  %v277_v58 = vld [vmem:[%s855_s26 + $0x138] sm:$0xff] }
  0x22   : > { %415 = vmatprep.subr.mxu1 %v241_v37  ;;  %345 = vmatpush1.msra.mxu0 %v238_v38  ;;  %v274_v59 = vld [vmem:[%s855_s26 + $0x120] sm:$0xff]  ;;  %v276_v60 = vld [vmem:[%s855_s26 + $0x130] sm:$0xff]  ;;  %v267_v61 = vld [vmem:[%s855_s26 + $0xe8] sm:$0xff] }
  0x23   : > { %416 = vmatpush1.msra.mxu1 %v240_v39  ;;  %737 = vmatmul.mubr.msk.f32.vlgmr.msra.gmra.mxu0 %vm310_vm0, %v896_v40  ;;  %v269_v62 = vld [vmem:[%s855_s26 + $0xf8] sm:$0xff]  ;;  %v266_v63 = vld [vmem:[%s855_s26 + $0xe0] sm:$0xff]  ;;  %v268_v0 = vld [vmem:[%s855_s26 + $0xf0] sm:$0xff] }
  0x24   : > { %738 = vmatmul.mubr.msk.f32.vlgmr.msra.gmra.mxu1 %vm310_vm0, %v896_v40  ;;  %470 = vmatprep.subr.mxu0 %v307_v41  ;;  %v259_v2 = vld [vmem:[%s855_s26 + $0xa8] sm:$0xff]  ;;  %v261_v3 = vld [vmem:[%s855_s26 + $0xb8] sm:$0xff]  ;;  %v258_v4 = vld [vmem:[%s855_s26 + $0xa0] sm:$0xff] }
  0x25   : > { %541 = vmatprep.subr.mxu1 %v309_v42  ;;  %471 = vmatpush1.msra.mxu0 %v306_v43  ;;  %v260_v5 = vld [vmem:[%s855_s26 + $0xb0] sm:$0xff]  ;;  %v251_v6 = vld [vmem:[%s855_s26 + $0x68] sm:$0xff]  ;;  %v253_v7 = vld [vmem:[%s855_s26 + $0x78] sm:$0xff] }
  0x26   : > { %542 = vmatpush1.msra.mxu1 %v308_v44  ;;  %472 = vmatprep.subr.mxu0 %v299_v45  ;;  %v250_v8 = vld [vmem:[%s855_s26 + $0x60] sm:$0xff]  ;;  %v252_v9 = vld [vmem:[%s855_s26 + $0x70] sm:$0xff]  ;;  %v243_v10 = vld [vmem:[%s855_s26 + $0x28] sm:$0xff] }
  0x27   : > { %543 = vmatprep.subr.mxu1 %v301_v46  ;;  %473 = vmatpush1.msra.mxu0 %v298_v47  ;;  %v245_v11 = vld [vmem:[%s855_s26 + $0x38] sm:$0xff]  ;;  %v242_v12 = vld [vmem:[%s855_s26 + $0x20] sm:$0xff]  ;;  %v244_v13 = vld [vmem:[%s855_s26 + $0x30] sm:$0xff] }
  0x28   : > { %544 = vmatpush1.msra.mxu1 %v300_v48  ;;  %474 = vmatprep.subr.mxu0 %v291_v49 }
  0x29   : > { %545 = vmatprep.subr.mxu1 %v293_v50  ;;  %475 = vmatpush1.msra.mxu0 %v290_v51 }
  0x2a   : > { %546 = vmatpush1.msra.mxu1 %v292_v52  ;;  %476 = vmatprep.subr.mxu0 %v283_v53 }
  0x2b   : > { %547 = vmatprep.subr.mxu1 %v285_v54  ;;  %477 = vmatpush1.msra.mxu0 %v282_v55 }
  0x2c   : > { %548 = vmatpush1.msra.mxu1 %v284_v56  ;;  %478 = vmatprep.subr.mxu0 %v275_v57 }
  0x2d   : > { %549 = vmatprep.subr.mxu1 %v277_v58  ;;  %479 = vmatpush1.msra.mxu0 %v274_v59 }
  0x2e   : > { %550 = vmatpush1.msra.mxu1 %v276_v60  ;;  %480 = vmatprep.subr.mxu0 %v267_v61 }
  0x2f   : > { %551 = vmatprep.subr.mxu1 %v269_v62  ;;  %481 = vmatpush1.msra.mxu0 %v266_v63 }
  0x30   : > { %552 = vmatpush1.msra.mxu1 %v268_v0  ;;  %482 = vmatprep.subr.mxu0 %v259_v2 }
  0x31   : > { %553 = vmatprep.subr.mxu1 %v261_v3  ;;  %483 = vmatpush1.msra.mxu0 %v258_v4 }
  0x32   : > { %554 = vmatpush1.msra.mxu1 %v260_v5  ;;  %484 = vmatprep.subr.mxu0 %v251_v6 }
  0x33   : > { %555 = vmatprep.subr.mxu1 %v253_v7  ;;  %485 = vmatpush1.msra.mxu0 %v250_v8 }
  0x34   : > { %556 = vmatpush1.msra.mxu1 %v252_v9  ;;  %486 = vmatprep.subr.mxu0 %v243_v10 }
  0x35   : > { %557 = vmatprep.subr.mxu1 %v245_v11  ;;  %487 = vmatpush1.msra.mxu0 %v242_v12 }
  0x36   : > { %520 = vmatprep.mubr.f32.mxu0 %v796_v1  ;;  %558 = vmatpush1.msra.mxu1 %v244_v13 }
  0x37   : > { %591 = vmatprep.mubr.f32.mxu1 %v796_v1  ;;  %739 = vmatmul.mubr.msk.f32.vlgmr.msra.gmra.mxu0 %vm310_vm0, %v896_v40 }
  0x38   : > { %740 = vmatmul.mubr.msk.f32.vlgmr.msra.gmra.mxu1 %vm310_vm0, %v896_v40 }
  0x8a   : > { %v602_v14 = vpop.permute.xlu0 %601 }
  0x8e   : > { %v616_v15 = vpop.permute.xlu0 %615 }
  0xe3   : > { %v380_v16 = vpop.f32.mrf.mxu0 }
  0xe4   : > { %v451_v17 = vpop.f32.mrf.mxu1  ;;  %v604_v18 = vmul.f32 %v602_v14, %v380_v16 }
  0xe5   : > { %v606_v19 = vmul.f32 %v602_v14, %v451_v17  ;;  %v382_v20 = vpop.f32.mrf.mxu0 }
  0xe6   : > { %v453_v21 = vpop.f32.mrf.mxu1  ;;  %v605_v22 = vmul.f32 %v602_v14, %v382_v20  ;;  %v618_v24 = vadd.f32 %v616_v15, %v604_v18 }
  0xe7   : > { %v607_v23 = vmul.f32 %v602_v14, %v453_v21  ;;  %v620_v25 = vadd.f32 %v616_v15, %v606_v19 }
  0xe8   : > { %v619_v1 = vadd.f32 %v616_v15, %v605_v22  ;;  %v626_v27 = vmax.f32 %v618_v24, 0.0 }
  0xe9   : > { %v621_v26 = vadd.f32 %v616_v15, %v607_v23  ;;  %v628_v28 = vmax.f32 %v620_v25, 0.0 }
  0xea   : > { %v627_v29 = vmax.f32 %v619_v1, 0.0  ;;  %634 = vst [vmem:[%s235_s6] sm:$0xff] %v626_v27 }
  0xeb   : > { %v629_v30 = vmax.f32 %v621_v26, 0.0  ;;  %636 = vst [vmem:[%s235_s6 + $0x10] sm:$0xff] %v628_v28 }
  0xec   : > { %635 = vst [vmem:[%s235_s6 + $0x8] sm:$0xff] %v627_v29 }
  0xed   : > { %637 = vst [vmem:[%s235_s6 + $0x18] sm:$0xff] %v629_v30 }
  0xf7   : > { %v522_v31 = vpop.f32.mrf.mxu0 }
  0xf8   : > { %v593_v32 = vpop.f32.mrf.mxu1  ;;  %v608_v33 = vmul.f32 %v602_v14, %v522_v31 }
  0xf9   : > { %v610_v34 = vmul.f32 %v602_v14, %v593_v32  ;;  %v524_v35 = vpop.f32.mrf.mxu0 }
  0xfa   : > { %v595_v36 = vpop.f32.mrf.mxu1  ;;  %v622_v37 = vadd.f32 %v616_v15, %v608_v33  ;;  %v609_v39 = vmul.f32 %v602_v14, %v524_v35 }
  0xfb   : > { %v624_v38 = vadd.f32 %v616_v15, %v610_v34  ;;  %v611_v40 = vmul.f32 %v602_v14, %v595_v36 }
  0xfc   : > { %v630_v41 = vmax.f32 %v622_v37, 0.0  ;;  %v623_v43 = vadd.f32 %v616_v15, %v609_v39 }
  0xfd   : > { %v632_v42 = vmax.f32 %v624_v38, 0.0  ;;  %v625_v44 = vadd.f32 %v616_v15, %v611_v40 }
  0xfe   : > { %638 = vst [vmem:[%s235_s6 + $0x20] sm:$0xff] %v630_v41  ;;  %v631_v45 = vmax.f32 %v623_v43, 0.0 }
  0xff   : > { %640 = vst [vmem:[%s235_s6 + $0x30] sm:$0xff] %v632_v42  ;;  %v633_v46 = vmax.f32 %v625_v44, 0.0 }
 0x100   : > { %639 = vst [vmem:[%s235_s6 + $0x28] sm:$0xff] %v631_v45 }
 0x101   : > { %641 = vst [vmem:[%s235_s6 + $0x38] sm:$0xff] %v633_v46 }
 0x102 PF: > { %s14_s17 = sadd.s32 1, %s794_s17   ;;  %s962_s15 = smov %s790_s16 }
 0x103   : > { %p11_p5 = scmp.ge.s32.totalorder %s14_s17, 4   ;;  %s963_s16 = smov %s965_s18 }
 0x105   :  { %13 = sbr.rel (!%p11_p5) target bundleno = 2 (0x2), region = 66 }

</bundles_post_ra>
